<compile_context>
chip_gen: v7x
topology: tpu7x:2x2x1
jax: 0.10.0
libtpu: 0.0.40
codegen_flags: <defaults>
</compile_context>

<pallas_src>
import math

import jax
import jax.numpy as jnp
from jax import lax
from jax.experimental import pallas as pl
from jax.experimental.pallas import tpu as pltpu

IN_CH = 384            # visual_conv in_channels
CH = 512               # channel_size == embed_dim
HEADS = 8
HEAD_D = CH // HEADS   # 64


# --------------------------------------------------------------------------
# Fused kernel:
#   1x1 conv -> GAT self-attention (pool-folded) -> avg-pool -> similarity_att
# Grid iterates over the visual batch ("parallel" -> shards across TCs).
# --------------------------------------------------------------------------
def cross_attention_kernel(x_ref, txt_ref, cw_ref, wqkv_ref, wo_ref, wfv_ref,
                           wft_ref, bqkv_ref, bmisc_ref, o_ref,
                           q_s, k_s, v_s, ctxm_s):
    bm = bmisc_ref[...]                                       # (4, CH) f32
    cb, bo, bfv, bft = bm[0:1], bm[1:2], bm[2:3], bm[3:4]     # conv / out / fc biases

    x = x_ref[0]                                              # (N, IN_CH) bf16
    # --- 1x1 conv == pixel-wise matmul (f32 accumulate) ---
    feat_f32 = jnp.dot(x, cw_ref[...],
                       preferred_element_type=jnp.float32) + cb        # (N, CH)
    # Pool-fold residual: mean over spatial tokens taken here so the full f32
    # slab dies immediately; only the bf16 copy feeds the QKV projection.
    feat_mean = jnp.mean(feat_f32, axis=0, keepdims=True)              # (1, CH) f32
    feat = feat_f32.astype(jnp.bfloat16)

    # --- single fused QKV projection (1536-wide, lane-dense); 1/sqrt(d) is
    # already folded into the Q columns of wqkv / bqkv at param-prep time ---
    qkv = (jnp.dot(feat, wqkv_ref[...], preferred_element_type=jnp.float32)
           + bqkv_ref[...]).astype(jnp.bfloat16)                       # (N, 3*CH)
    q_s[...] = qkv[:, :CH]
    k_s[...] = qkv[:, CH:2 * CH]
    v_s[...] = qkv[:, 2 * CH:]

    # --- per-head attention; K consumed untransposed via dot_general ---
    # Pool-fold: only the column-mean of the softmax is needed, so the P@V
    # matmul collapses to a (1,N)@(N,64) matvec per head.
    # TODO(synk): for N >~ 1k tokens switch this static head loop to a
    # fori_loop with flash-style KV tiling so only a tile of the (N, N) f32
    # scores is live (needed to stay inside v7x's 64 MiB VMEM).
    dn = (((1,), (1,)), ((), ()))
    for h in range(HEADS):                                    # static unroll
        sl = slice(h * HEAD_D, (h + 1) * HEAD_D)
        s = lax.dot_general(q_s[:, sl], k_s[:, sl], dn,
                            preferred_element_type=jnp.float32)        # (N, N)
        p = jax.nn.softmax(s, axis=-1)
        pm = jnp.mean(p, axis=0, keepdims=True)                        # (1, N)
        ctxm_s[:, sl] = jnp.dot(pm.astype(jnp.bfloat16), v_s[:, sl],
                                preferred_element_type=jnp.float32)    # (1, 64)

    # --- pooled GAT output: ONE (1,512)@(512,512) projection + residual ---
    pooled = (jnp.dot(ctxm_s[...].astype(jnp.bfloat16), wo_ref[...],
                      preferred_element_type=jnp.float32)
              + bo + feat_mean)                                         # (1, CH)

    # --- similarity_att fused into the epilogue ---
    visp = (jnp.dot(pooled.astype(jnp.bfloat16), wfv_ref[...],
                    preferred_element_type=jnp.float32) + bfv)          # (1, CH)
    txtp = (jnp.dot(txt_ref[...], wft_ref[...],
                    preferred_element_type=jnp.float32) + bft)          # (B_t, CH)
    sims = visp * txtp                                                  # (B_t, CH)
    o_ref[0] = jax.nn.sigmoid(sims) * txtp


def cross_attention_forward(visual_nchw, text, kp):
    """visual_nchw: (B_v, 384, H, W) f32; text: (B_t, 512) f32; kp: prepared params."""
    B_v, Cin, H, W = visual_nchw.shape
    N = H * W
    B_t = text.shape[0]

    # NCHW -> (B, H*W, C_in); bf16 at the kernel boundary (f32 accumulation inside)
    x = visual_nchw.transpose(0, 2, 3, 1).reshape(B_v, N, Cin).astype(jnp.bfloat16)
    txt = text.astype(jnp.bfloat16)

    wfull = lambda b: (0, 0)
    flops = B_v * (2 * N * Cin * CH              # conv
                   + 2 * N * CH * 3 * CH         # fused QKV projection
                   + 2 * N * N * CH              # scores (all heads)
                   + 2 * N * CH                  # pm @ V matvecs (all heads)
                   + 2 * CH * CH                 # output projection (pooled)
                   + 2 * CH * CH                 # fc_visual
                   + B_t * 2 * CH * CH)          # fc_text
    trans = B_v * (HEADS * N * N + B_t * CH)     # softmax exp + sigmoid
    bytes_acc = (B_v * N * Cin * 2 + B_t * CH * 2
                 + (Cin * CH + 3 * CH * CH + 3 * CH * CH) * 2
                 + (3 * CH + 4 * CH) * 4
                 + B_v * B_t * CH * 4)

    return pl.pallas_call(
        cross_attention_kernel,
        out_shape=jax.ShapeDtypeStruct((B_v, B_t, CH), jnp.float32),
        grid=(B_v,),
        in_specs=[
            pl.BlockSpec((1, N, Cin), lambda b: (b, 0, 0)),   # per-batch pixel block
            pl.BlockSpec((B_t, CH), wfull),                   # text (resident)
            pl.BlockSpec((Cin, CH), wfull),                   # conv weight
            pl.BlockSpec((CH, 3 * CH), wfull),                # fused Wq|Wk|Wv
            pl.BlockSpec((CH, CH), wfull),                    # wo
            pl.BlockSpec((CH, CH), wfull),                    # wfv
            pl.BlockSpec((CH, CH), wfull),                    # wft
            pl.BlockSpec((1, 3 * CH), wfull),                 # fused bq|bk|bv
            pl.BlockSpec((4, CH), wfull),                     # packed [cb, bo, bfv, bft]
        ],
        out_specs=pl.BlockSpec((1, B_t, CH), lambda b: (b, 0, 0)),
        scratch_shapes=[
            pltpu.VMEM((N, CH), jnp.bfloat16),                # Q staging
            pltpu.VMEM((N, CH), jnp.bfloat16),                # K staging
            pltpu.VMEM((N, CH), jnp.bfloat16),                # V staging
            pltpu.VMEM((1, CH), jnp.float32),                 # per-head ctx mean
        ],
        compiler_params=pltpu.CompilerParams(
            dimension_semantics=("parallel",),
        ),
        cost_estimate=pl.CostEstimate(flops=flops, transcendentals=trans,
                                      bytes_accessed=bytes_acc),
    )(x, txt, kp["cw"], kp["wqkv"], kp["wo"], kp["wfv"], kp["wft"],
      kp["bqkv"], kp["bmisc"])


# --------------------------------------------------------------------------
# Parameters (deterministic synthetic init) + one-time kernel-ready transform
# --------------------------------------------------------------------------
def init_params(key):
    ks = jax.random.split(key, 16)
    nrm = lambda k, s, scale=0.02: scale * jax.random.normal(k, s, jnp.float32)
    return {
        "conv_w": nrm(ks[0], (IN_CH, CH)),
        "conv_b": nrm(ks[1], (1, CH), 0.01),
        "wq": nrm(ks[2], (CH, CH)), "bq": nrm(ks[3], (CH,), 0.01),
        "wk": nrm(ks[4], (CH, CH)), "bk": nrm(ks[5], (CH,), 0.01),
        "wv": nrm(ks[6], (CH, CH)), "bv": nrm(ks[7], (CH,), 0.01),
        "wo": nrm(ks[8], (CH, CH)), "bo": nrm(ks[9], (1, CH), 0.01),
        "wfv": nrm(ks[10], (CH, CH)), "bfv": nrm(ks[11], (1, CH), 0.01),
        "wft": nrm(ks[12], (CH, CH)), "bft": nrm(ks[13], (1, CH), 0.01),
    }


def prepare_params(p):
    """One-time parameter transform: fold 1/sqrt(d) into Q, fuse QKV, pack biases, bf16 weights."""
    scale = 1.0 / math.sqrt(HEAD_D)
    bf = lambda a: a.astype(jnp.bfloat16)
    wqkv = jnp.concatenate([p["wq"] * scale, p["wk"], p["wv"]], axis=1)      # (CH, 3*CH)
    bqkv = jnp.concatenate([p["bq"] * scale, p["bk"], p["bv"]]).reshape(1, 3 * CH)
    bmisc = jnp.concatenate([p["conv_b"], p["bo"], p["bfv"], p["bft"]], axis=0)  # (4, CH)
    return {
        "cw": bf(p["conv_w"]), "wqkv": bf(wqkv), "wo": bf(p["wo"]),
        "wfv": bf(p["wfv"]), "wft": bf(p["wft"]),
        "bqkv": bqkv.astype(jnp.float32), "bmisc": bmisc.astype(jnp.float32),
    }


# --------------------------------------------------------------------------
# Pure-JAX f32 reference for correctness checking
# --------------------------------------------------------------------------
def reference(visual_nchw, text, p):
    B_v, Cin, H, W = visual_nchw.shape
    x = visual_nchw.transpose(0, 2, 3, 1).reshape(B_v, H * W, Cin)
    f = x @ p["conv_w"] + p["conv_b"]                              # (B, N, C)
    q = f @ p["wq"] + p["bq"]
    k = f @ p["wk"] + p["bk"]
    v = f @ p["wv"] + p["bv"]
    split = lambda t: t.reshape(B_v, -1, HEADS, HEAD_D).transpose(0, 2, 1, 3)
    qh, kh, vh = split(q), split(k), split(v)
    s = jnp.einsum("bhnd,bhmd->bhnm", qh, kh) / math.sqrt(HEAD_D)
    pr = jax.nn.softmax(s, axis=-1)
    ctx = jnp.einsum("bhnm,bhmd->bhnd", pr, vh).transpose(0, 2, 1, 3)
    ctx = ctx.reshape(B_v, -1, CH)
    gat = ctx @ p["wo"] + p["bo"] + f
    pooled = gat.mean(axis=1)                                      # avg pool
    visp = pooled @ p["wfv"] + p["bfv"]
    txtp = text @ p["wft"] + p["bft"]
    sims = visp[:, None, :] * txtp[None, :, :]
    return jax.nn.sigmoid(sims) * txtp[None, :, :]


if __name__ == "__main__":
    key = jax.random.PRNGKey(0)
    k_p, k_v, k_t = jax.random.split(key, 3)

    B_v, H, W = 2, 4, 4
    B_t = 4
    visual = jax.random.normal(k_v, (B_v, IN_CH, H, W), jnp.float32)
    text = jax.random.normal(k_t, (B_t, CH), jnp.float32)
    params = init_params(k_p)
    kparams = prepare_params(params)     # one-time, not per-call

    out = jax.block_until_ready(cross_attention_forward(visual, text, kparams))
    ref = jax.block_until_ready(reference(visual, text, params))

    assert out.shape == (B_v, B_t, CH), out.shape
    if not bool(jnp.allclose(out, ref, atol=2e-2, rtol=2e-2)):
        err = float(jnp.max(jnp.abs(out - ref)))
        raise AssertionError(f"Pallas output does not match reference (max abs err={err})")

    print("KERNEL_OK")
</pallas_src>

<mosaic_0001>
module attributes {stable_mosaic.version = 11 : i64} {
  func.func @cross_attention_kernel(%arg0: i32, %arg1: memref<1x16x384xbf16, #tpu.memory_space<vmem>>, %arg2: memref<4x512xbf16, #tpu.memory_space<vmem>>, %arg3: memref<384x512xbf16, #tpu.memory_space<vmem>>, %arg4: memref<512x1536xbf16, #tpu.memory_space<vmem>>, %arg5: memref<512x512xbf16, #tpu.memory_space<vmem>>, %arg6: memref<512x512xbf16, #tpu.memory_space<vmem>>, %arg7: memref<512x512xbf16, #tpu.memory_space<vmem>>, %arg8: memref<1x1536xf32, #tpu.memory_space<vmem>>, %arg9: memref<4x512xf32, #tpu.memory_space<vmem>>, %arg10: memref<1x4x512xf32, #tpu.memory_space<vmem>>, %arg11: memref<16x512xbf16, #tpu.memory_space<vmem>>, %arg12: memref<16x512xbf16, #tpu.memory_space<vmem>>, %arg13: memref<16x512xbf16, #tpu.memory_space<vmem>>, %arg14: memref<1x512xf32, #tpu.memory_space<vmem>>) attributes {dimension_semantics = [#tpu.dimension_semantics<parallel>], iteration_bounds = array<i64: 2>, scalar_prefetch = 0 : i64, scratch_operands = 4 : i64, tpu.core_type = #tpu.core_type<tc>, window_params = [{transform_indices = @transform_0, window_bounds = array<i64: 1, 16, 384>}, {pipeline_mode = #tpu.pipeline_mode<synchronous>, transform_indices = @transform_1, window_bounds = array<i64: 4, 512>}, {pipeline_mode = #tpu.pipeline_mode<synchronous>, transform_indices = @transform_2, window_bounds = array<i64: 384, 512>}, {pipeline_mode = #tpu.pipeline_mode<synchronous>, transform_indices = @transform_3, window_bounds = array<i64: 512, 1536>}, {pipeline_mode = #tpu.pipeline_mode<synchronous>, transform_indices = @transform_4, window_bounds = array<i64: 512, 512>}, {pipeline_mode = #tpu.pipeline_mode<synchronous>, transform_indices = @transform_5, window_bounds = array<i64: 512, 512>}, {pipeline_mode = #tpu.pipeline_mode<synchronous>, transform_indices = @transform_6, window_bounds = array<i64: 512, 512>}, {pipeline_mode = #tpu.pipeline_mode<synchronous>, transform_indices = @transform_7, window_bounds = array<i64: 1, 1536>}, {pipeline_mode = #tpu.pipeline_mode<synchronous>, transform_indices = @transform_8, window_bounds = array<i64: 4, 512>}, {transform_indices = @transform_9, window_bounds = array<i64: 1, 4, 512>}]} {
    %c0 = arith.constant 0 : index
    %c0_0 = arith.constant 0 : index
    %0 = vector.load %arg9[%c0, %c0_0] : memref<4x512xf32, #tpu.memory_space<vmem>>, vector<4x512xf32>
    %1 = vector.extract_strided_slice %0 {offsets = [0, 0], sizes = [1, 512], strides = [1, 1]} : vector<4x512xf32> to vector<1x512xf32>
    %2 = vector.extract_strided_slice %0 {offsets = [1, 0], sizes = [1, 512], strides = [1, 1]} : vector<4x512xf32> to vector<1x512xf32>
    %3 = vector.extract_strided_slice %0 {offsets = [2, 0], sizes = [1, 512], strides = [1, 1]} : vector<4x512xf32> to vector<1x512xf32>
    %4 = vector.extract_strided_slice %0 {offsets = [3, 0], sizes = [1, 512], strides = [1, 1]} : vector<4x512xf32> to vector<1x512xf32>
    %c0_1 = arith.constant 0 : index
    %c0_2 = arith.constant 0 : index
    %c0_3 = arith.constant 0 : index
    %5 = vector.load %arg1[%c0_1, %c0_2, %c0_3] : memref<1x16x384xbf16, #tpu.memory_space<vmem>>, vector<1x16x384xbf16>
    %6 = vector.shape_cast %5 : vector<1x16x384xbf16> to vector<16x384xbf16>
    %c0_4 = arith.constant 0 : index
    %c0_5 = arith.constant 0 : index
    %7 = vector.load %arg3[%c0_4, %c0_5] : memref<384x512xbf16, #tpu.memory_space<vmem>>, vector<384x512xbf16>
    %cst = arith.constant dense<0.000000e+00> : vector<16x512xf32>
    %8 = tpu.matmul %6, %7, %cst {dimension_numbers = #tpu.dot_dimension_numbers<[1], [0], [0], [1], [0, 0, 1, 1], [], []>} : vector<16x384xbf16>, vector<384x512xbf16>, vector<16x512xf32> -> vector<16x512xf32>
    %9 = vector.broadcast %1 : vector<1x512xf32> to vector<16x512xf32>
    %10 = arith.addf %8, %9 : vector<16x512xf32>
    %cst_6 = arith.constant dense<0.000000e+00> : vector<512xf32>
    %11 = vector.multi_reduction <add>, %10, %cst_6 [0] : vector<16x512xf32> to vector<512xf32>
    %12 = vector.shape_cast %11 : vector<512xf32> to vector<1x512xf32>
    %cst_7 = arith.constant 1.600000e+01 : f32
    %13 = vector.broadcast %cst_7 : f32 to vector<1x512xf32>
    %14 = arith.divf %12, %13 : vector<1x512xf32>
    %15 = arith.truncf %10 : vector<16x512xf32> to vector<16x512xbf16>
    %c0_8 = arith.constant 0 : index
    %c0_9 = arith.constant 0 : index
    %16 = vector.load %arg4[%c0_8, %c0_9] : memref<512x1536xbf16, #tpu.memory_space<vmem>>, vector<512x1536xbf16>
    %cst_10 = arith.constant dense<0.000000e+00> : vector<16x1536xf32>
    %17 = tpu.matmul %15, %16, %cst_10 {dimension_numbers = #tpu.dot_dimension_numbers<[1], [0], [0], [1], [0, 0, 1, 1], [], []>} : vector<16x512xbf16>, vector<512x1536xbf16>, vector<16x1536xf32> -> vector<16x1536xf32>
    %c0_11 = arith.constant 0 : index
    %c0_12 = arith.constant 0 : index
    %18 = vector.load %arg8[%c0_11, %c0_12] : memref<1x1536xf32, #tpu.memory_space<vmem>>, vector<1x1536xf32>
    %19 = vector.broadcast %18 : vector<1x1536xf32> to vector<16x1536xf32>
    %20 = arith.addf %17, %19 : vector<16x1536xf32>
    %21 = arith.truncf %20 : vector<16x1536xf32> to vector<16x1536xbf16>
    %22 = vector.extract_strided_slice %21 {offsets = [0, 0], sizes = [16, 512], strides = [1, 1]} : vector<16x1536xbf16> to vector<16x512xbf16>
    %c0_13 = arith.constant 0 : index
    %c0_14 = arith.constant 0 : index
    %23 = vector.load %arg11[%c0_13, %c0_14] : memref<16x512xbf16, #tpu.memory_space<vmem>>, vector<16x512xbf16>
    tpu.vector_store %arg11[%c0_13, %c0_14], %22 {strides = array<i32>} : memref<16x512xbf16, #tpu.memory_space<vmem>>, vector<16x512xbf16>,
    %24 = vector.extract_strided_slice %21 {offsets = [0, 512], sizes = [16, 512], strides = [1, 1]} : vector<16x1536xbf16> to vector<16x512xbf16>
    %c0_15 = arith.constant 0 : index
    %c0_16 = arith.constant 0 : index
    %25 = vector.load %arg12[%c0_15, %c0_16] : memref<16x512xbf16, #tpu.memory_space<vmem>>, vector<16x512xbf16>
    tpu.vector_store %arg12[%c0_15, %c0_16], %24 {strides = array<i32>} : memref<16x512xbf16, #tpu.memory_space<vmem>>, vector<16x512xbf16>,
    %26 = vector.extract_strided_slice %21 {offsets = [0, 1024], sizes = [16, 512], strides = [1, 1]} : vector<16x1536xbf16> to vector<16x512xbf16>
    %c0_17 = arith.constant 0 : index
    %c0_18 = arith.constant 0 : index
    %27 = vector.load %arg13[%c0_17, %c0_18] : memref<16x512xbf16, #tpu.memory_space<vmem>>, vector<16x512xbf16>
    tpu.vector_store %arg13[%c0_17, %c0_18], %26 {strides = array<i32>} : memref<16x512xbf16, #tpu.memory_space<vmem>>, vector<16x512xbf16>,
    %c0_19 = arith.constant 0 : index
    %c0_20 = arith.constant 0 : index
    %28 = vector.load %arg11[%c0_19, %c0_20] : memref<16x512xbf16, #tpu.memory_space<vmem>>, vector<16x64xbf16>
    %c0_21 = arith.constant 0 : index
    %c0_22 = arith.constant 0 : index
    %29 = vector.load %arg12[%c0_21, %c0_22] : memref<16x512xbf16, #tpu.memory_space<vmem>>, vector<16x64xbf16>
    %cst_23 = arith.constant dense<0.000000e+00> : vector<16x16xf32>
    %30 = tpu.matmul %28, %29, %cst_23 {dimension_numbers = #tpu.dot_dimension_numbers<[1], [1], [0], [0], [0, 0, 1, 0], [], []>} : vector<16x64xbf16>, vector<16x64xbf16>, vector<16x16xf32> -> vector<16x16xf32>
    %cst_24 = arith.constant dense<0xFF800000> : vector<16xf32>
    %31 = vector.multi_reduction <maximumf>, %30, %cst_24 [1] : vector<16x16xf32> to vector<16xf32>
    %cst_25 = arith.constant 0xFF800000 : f32
    %32 = vector.broadcast %cst_25 : f32 to vector<16xf32>
    %33 = arith.maximumf %32, %31 : vector<16xf32>
    %34 = vector.shape_cast %33 : vector<16xf32> to vector<16x1xf32>
    %35 = vector.broadcast %34 : vector<16x1xf32> to vector<16x16xf32>
    %36 = arith.subf %30, %35 : vector<16x16xf32>
    %37 = math.exp %36 : vector<16x16xf32>
    %cst_26 = arith.constant dense<0.000000e+00> : vector<16xf32>
    %38 = vector.multi_reduction <add>, %37, %cst_26 [1] : vector<16x16xf32> to vector<16xf32>
    %39 = vector.shape_cast %38 : vector<16xf32> to vector<16x1xf32>
    %40 = vector.broadcast %39 : vector<16x1xf32> to vector<16x16xf32>
    %41 = arith.divf %37, %40 : vector<16x16xf32>
    %cst_27 = arith.constant dense<0.000000e+00> : vector<16xf32>
    %42 = vector.multi_reduction <add>, %41, %cst_27 [0] : vector<16x16xf32> to vector<16xf32>
    %43 = vector.shape_cast %42 : vector<16xf32> to vector<1x16xf32>
    %cst_28 = arith.constant 1.600000e+01 : f32
    %44 = vector.broadcast %cst_28 : f32 to vector<1x16xf32>
    %45 = arith.divf %43, %44 : vector<1x16xf32>
    %46 = arith.truncf %45 : vector<1x16xf32> to vector<1x16xbf16>
    %c0_29 = arith.constant 0 : index
    %c0_30 = arith.constant 0 : index
    %47 = vector.load %arg13[%c0_29, %c0_30] : memref<16x512xbf16, #tpu.memory_space<vmem>>, vector<16x64xbf16>
    %cst_31 = arith.constant dense<0.000000e+00> : vector<1x64xf32>
    %48 = tpu.matmul %46, %47, %cst_31 {dimension_numbers = #tpu.dot_dimension_numbers<[1], [0], [0], [1], [0, 0, 1, 1], [], []>} : vector<1x16xbf16>, vector<16x64xbf16>, vector<1x64xf32> -> vector<1x64xf32>
    %c0_32 = arith.constant 0 : index
    %c0_33 = arith.constant 0 : index
    %49 = vector.load %arg14[%c0_32, %c0_33] : memref<1x512xf32, #tpu.memory_space<vmem>>, vector<1x64xf32>
    tpu.vector_store %arg14[%c0_32, %c0_33], %48 {strides = array<i32>} : memref<1x512xf32, #tpu.memory_space<vmem>>, vector<1x64xf32>,
    %c0_34 = arith.constant 0 : index
    %c64 = arith.constant 64 : index
    %50 = vector.load %arg11[%c0_34, %c64] : memref<16x512xbf16, #tpu.memory_space<vmem>>, vector<16x64xbf16>
    %c0_35 = arith.constant 0 : index
    %c64_36 = arith.constant 64 : index
    %51 = vector.load %arg12[%c0_35, %c64_36] : memref<16x512xbf16, #tpu.memory_space<vmem>>, vector<16x64xbf16>
    %cst_37 = arith.constant dense<0.000000e+00> : vector<16x16xf32>
    %52 = tpu.matmul %50, %51, %cst_37 {dimension_numbers = #tpu.dot_dimension_numbers<[1], [1], [0], [0], [0, 0, 1, 0], [], []>} : vector<16x64xbf16>, vector<16x64xbf16>, vector<16x16xf32> -> vector<16x16xf32>
    %cst_38 = arith.constant dense<0xFF800000> : vector<16xf32>
    %53 = vector.multi_reduction <maximumf>, %52, %cst_38 [1] : vector<16x16xf32> to vector<16xf32>
    %cst_39 = arith.constant 0xFF800000 : f32
    %54 = vector.broadcast %cst_39 : f32 to vector<16xf32>
    %55 = arith.maximumf %54, %53 : vector<16xf32>
    %56 = vector.shape_cast %55 : vector<16xf32> to vector<16x1xf32>
    %57 = vector.broadcast %56 : vector<16x1xf32> to vector<16x16xf32>
    %58 = arith.subf %52, %57 : vector<16x16xf32>
    %59 = math.exp %58 : vector<16x16xf32>
    %cst_40 = arith.constant dense<0.000000e+00> : vector<16xf32>
    %60 = vector.multi_reduction <add>, %59, %cst_40 [1] : vector<16x16xf32> to vector<16xf32>
    %61 = vector.shape_cast %60 : vector<16xf32> to vector<16x1xf32>
    %62 = vector.broadcast %61 : vector<16x1xf32> to vector<16x16xf32>
    %63 = arith.divf %59, %62 : vector<16x16xf32>
    %cst_41 = arith.constant dense<0.000000e+00> : vector<16xf32>
    %64 = vector.multi_reduction <add>, %63, %cst_41 [0] : vector<16x16xf32> to vector<16xf32>
    %65 = vector.shape_cast %64 : vector<16xf32> to vector<1x16xf32>
    %cst_42 = arith.constant 1.600000e+01 : f32
    %66 = vector.broadcast %cst_42 : f32 to vector<1x16xf32>
    %67 = arith.divf %65, %66 : vector<1x16xf32>
    %68 = arith.truncf %67 : vector<1x16xf32> to vector<1x16xbf16>
    %c0_43 = arith.constant 0 : index
    %c64_44 = arith.constant 64 : index
    %69 = vector.load %arg13[%c0_43, %c64_44] : memref<16x512xbf16, #tpu.memory_space<vmem>>, vector<16x64xbf16>
    %cst_45 = arith.constant dense<0.000000e+00> : vector<1x64xf32>
    %70 = tpu.matmul %68, %69, %cst_45 {dimension_numbers = #tpu.dot_dimension_numbers<[1], [0], [0], [1], [0, 0, 1, 1], [], []>} : vector<1x16xbf16>, vector<16x64xbf16>, vector<1x64xf32> -> vector<1x64xf32>
    %c0_46 = arith.constant 0 : index
    %c64_47 = arith.constant 64 : index
    %71 = vector.load %arg14[%c0_46, %c64_47] : memref<1x512xf32, #tpu.memory_space<vmem>>, vector<1x64xf32>
    tpu.vector_store %arg14[%c0_46, %c64_47], %70 {strides = array<i32>} : memref<1x512xf32, #tpu.memory_space<vmem>>, vector<1x64xf32>,
    %c0_48 = arith.constant 0 : index
    %c128 = arith.constant 128 : index
    %72 = vector.load %arg11[%c0_48, %c128] : memref<16x512xbf16, #tpu.memory_space<vmem>>, vector<16x64xbf16>
    %c0_49 = arith.constant 0 : index
    %c128_50 = arith.constant 128 : index
    %73 = vector.load %arg12[%c0_49, %c128_50] : memref<16x512xbf16, #tpu.memory_space<vmem>>, vector<16x64xbf16>
    %cst_51 = arith.constant dense<0.000000e+00> : vector<16x16xf32>
    %74 = tpu.matmul %72, %73, %cst_51 {dimension_numbers = #tpu.dot_dimension_numbers<[1], [1], [0], [0], [0, 0, 1, 0], [], []>} : vector<16x64xbf16>, vector<16x64xbf16>, vector<16x16xf32> -> vector<16x16xf32>
    %cst_52 = arith.constant dense<0xFF800000> : vector<16xf32>
    %75 = vector.multi_reduction <maximumf>, %74, %cst_52 [1] : vector<16x16xf32> to vector<16xf32>
    %cst_53 = arith.constant 0xFF800000 : f32
    %76 = vector.broadcast %cst_53 : f32 to vector<16xf32>
    %77 = arith.maximumf %76, %75 : vector<16xf32>
    %78 = vector.shape_cast %77 : vector<16xf32> to vector<16x1xf32>
    %79 = vector.broadcast %78 : vector<16x1xf32> to vector<16x16xf32>
    %80 = arith.subf %74, %79 : vector<16x16xf32>
    %81 = math.exp %80 : vector<16x16xf32>
    %cst_54 = arith.constant dense<0.000000e+00> : vector<16xf32>
    %82 = vector.multi_reduction <add>, %81, %cst_54 [1] : vector<16x16xf32> to vector<16xf32>
    %83 = vector.shape_cast %82 : vector<16xf32> to vector<16x1xf32>
    %84 = vector.broadcast %83 : vector<16x1xf32> to vector<16x16xf32>
    %85 = arith.divf %81, %84 : vector<16x16xf32>
    %cst_55 = arith.constant dense<0.000000e+00> : vector<16xf32>
    %86 = vector.multi_reduction <add>, %85, %cst_55 [0] : vector<16x16xf32> to vector<16xf32>
    %87 = vector.shape_cast %86 : vector<16xf32> to vector<1x16xf32>
    %cst_56 = arith.constant 1.600000e+01 : f32
    %88 = vector.broadcast %cst_56 : f32 to vector<1x16xf32>
    %89 = arith.divf %87, %88 : vector<1x16xf32>
    %90 = arith.truncf %89 : vector<1x16xf32> to vector<1x16xbf16>
    %c0_57 = arith.constant 0 : index
    %c128_58 = arith.constant 128 : index
    %91 = vector.load %arg13[%c0_57, %c128_58] : memref<16x512xbf16, #tpu.memory_space<vmem>>, vector<16x64xbf16>
    %cst_59 = arith.constant dense<0.000000e+00> : vector<1x64xf32>
    %92 = tpu.matmul %90, %91, %cst_59 {dimension_numbers = #tpu.dot_dimension_numbers<[1], [0], [0], [1], [0, 0, 1, 1], [], []>} : vector<1x16xbf16>, vector<16x64xbf16>, vector<1x64xf32> -> vector<1x64xf32>
    %c0_60 = arith.constant 0 : index
    %c128_61 = arith.constant 128 : index
    %93 = vector.load %arg14[%c0_60, %c128_61] : memref<1x512xf32, #tpu.memory_space<vmem>>, vector<1x64xf32>
    tpu.vector_store %arg14[%c0_60, %c128_61], %92 {strides = array<i32>} : memref<1x512xf32, #tpu.memory_space<vmem>>, vector<1x64xf32>,
    %c0_62 = arith.constant 0 : index
    %c192 = arith.constant 192 : index
    %94 = vector.load %arg11[%c0_62, %c192] : memref<16x512xbf16, #tpu.memory_space<vmem>>, vector<16x64xbf16>
    %c0_63 = arith.constant 0 : index
    %c192_64 = arith.constant 192 : index
    %95 = vector.load %arg12[%c0_63, %c192_64] : memref<16x512xbf16, #tpu.memory_space<vmem>>, vector<16x64xbf16>
    %cst_65 = arith.constant dense<0.000000e+00> : vector<16x16xf32>
    %96 = tpu.matmul %94, %95, %cst_65 {dimension_numbers = #tpu.dot_dimension_numbers<[1], [1], [0], [0], [0, 0, 1, 0], [], []>} : vector<16x64xbf16>, vector<16x64xbf16>, vector<16x16xf32> -> vector<16x16xf32>
    %cst_66 = arith.constant dense<0xFF800000> : vector<16xf32>
    %97 = vector.multi_reduction <maximumf>, %96, %cst_66 [1] : vector<16x16xf32> to vector<16xf32>
    %cst_67 = arith.constant 0xFF800000 : f32
    %98 = vector.broadcast %cst_67 : f32 to vector<16xf32>
    %99 = arith.maximumf %98, %97 : vector<16xf32>
    %100 = vector.shape_cast %99 : vector<16xf32> to vector<16x1xf32>
    %101 = vector.broadcast %100 : vector<16x1xf32> to vector<16x16xf32>
    %102 = arith.subf %96, %101 : vector<16x16xf32>
    %103 = math.exp %102 : vector<16x16xf32>
    %cst_68 = arith.constant dense<0.000000e+00> : vector<16xf32>
    %104 = vector.multi_reduction <add>, %103, %cst_68 [1] : vector<16x16xf32> to vector<16xf32>
    %105 = vector.shape_cast %104 : vector<16xf32> to vector<16x1xf32>
    %106 = vector.broadcast %105 : vector<16x1xf32> to vector<16x16xf32>
    %107 = arith.divf %103, %106 : vector<16x16xf32>
    %cst_69 = arith.constant dense<0.000000e+00> : vector<16xf32>
    %108 = vector.multi_reduction <add>, %107, %cst_69 [0] : vector<16x16xf32> to vector<16xf32>
    %109 = vector.shape_cast %108 : vector<16xf32> to vector<1x16xf32>
    %cst_70 = arith.constant 1.600000e+01 : f32
    %110 = vector.broadcast %cst_70 : f32 to vector<1x16xf32>
    %111 = arith.divf %109, %110 : vector<1x16xf32>
    %112 = arith.truncf %111 : vector<1x16xf32> to vector<1x16xbf16>
    %c0_71 = arith.constant 0 : index
    %c192_72 = arith.constant 192 : index
    %113 = vector.load %arg13[%c0_71, %c192_72] : memref<16x512xbf16, #tpu.memory_space<vmem>>, vector<16x64xbf16>
    %cst_73 = arith.constant dense<0.000000e+00> : vector<1x64xf32>
    %114 = tpu.matmul %112, %113, %cst_73 {dimension_numbers = #tpu.dot_dimension_numbers<[1], [0], [0], [1], [0, 0, 1, 1], [], []>} : vector<1x16xbf16>, vector<16x64xbf16>, vector<1x64xf32> -> vector<1x64xf32>
    %c0_74 = arith.constant 0 : index
    %c192_75 = arith.constant 192 : index
    %115 = vector.load %arg14[%c0_74, %c192_75] : memref<1x512xf32, #tpu.memory_space<vmem>>, vector<1x64xf32>
    tpu.vector_store %arg14[%c0_74, %c192_75], %114 {strides = array<i32>} : memref<1x512xf32, #tpu.memory_space<vmem>>, vector<1x64xf32>,
    %c0_76 = arith.constant 0 : index
    %c256 = arith.constant 256 : index
    %116 = vector.load %arg11[%c0_76, %c256] : memref<16x512xbf16, #tpu.memory_space<vmem>>, vector<16x64xbf16>
    %c0_77 = arith.constant 0 : index
    %c256_78 = arith.constant 256 : index
    %117 = vector.load %arg12[%c0_77, %c256_78] : memref<16x512xbf16, #tpu.memory_space<vmem>>, vector<16x64xbf16>
    %cst_79 = arith.constant dense<0.000000e+00> : vector<16x16xf32>
    %118 = tpu.matmul %116, %117, %cst_79 {dimension_numbers = #tpu.dot_dimension_numbers<[1], [1], [0], [0], [0, 0, 1, 0], [], []>} : vector<16x64xbf16>, vector<16x64xbf16>, vector<16x16xf32> -> vector<16x16xf32>
    %cst_80 = arith.constant dense<0xFF800000> : vector<16xf32>
    %119 = vector.multi_reduction <maximumf>, %118, %cst_80 [1] : vector<16x16xf32> to vector<16xf32>
    %cst_81 = arith.constant 0xFF800000 : f32
    %120 = vector.broadcast %cst_81 : f32 to vector<16xf32>
    %121 = arith.maximumf %120, %119 : vector<16xf32>
    %122 = vector.shape_cast %121 : vector<16xf32> to vector<16x1xf32>
    %123 = vector.broadcast %122 : vector<16x1xf32> to vector<16x16xf32>
    %124 = arith.subf %118, %123 : vector<16x16xf32>
    %125 = math.exp %124 : vector<16x16xf32>
    %cst_82 = arith.constant dense<0.000000e+00> : vector<16xf32>
    %126 = vector.multi_reduction <add>, %125, %cst_82 [1] : vector<16x16xf32> to vector<16xf32>
    %127 = vector.shape_cast %126 : vector<16xf32> to vector<16x1xf32>
    %128 = vector.broadcast %127 : vector<16x1xf32> to vector<16x16xf32>
    %129 = arith.divf %125, %128 : vector<16x16xf32>
    %cst_83 = arith.constant dense<0.000000e+00> : vector<16xf32>
    %130 = vector.multi_reduction <add>, %129, %cst_83 [0] : vector<16x16xf32> to vector<16xf32>
    %131 = vector.shape_cast %130 : vector<16xf32> to vector<1x16xf32>
    %cst_84 = arith.constant 1.600000e+01 : f32
    %132 = vector.broadcast %cst_84 : f32 to vector<1x16xf32>
    %133 = arith.divf %131, %132 : vector<1x16xf32>
    %134 = arith.truncf %133 : vector<1x16xf32> to vector<1x16xbf16>
    %c0_85 = arith.constant 0 : index
    %c256_86 = arith.constant 256 : index
    %135 = vector.load %arg13[%c0_85, %c256_86] : memref<16x512xbf16, #tpu.memory_space<vmem>>, vector<16x64xbf16>
    %cst_87 = arith.constant dense<0.000000e+00> : vector<1x64xf32>
    %136 = tpu.matmul %134, %135, %cst_87 {dimension_numbers = #tpu.dot_dimension_numbers<[1], [0], [0], [1], [0, 0, 1, 1], [], []>} : vector<1x16xbf16>, vector<16x64xbf16>, vector<1x64xf32> -> vector<1x64xf32>
    %c0_88 = arith.constant 0 : index
    %c256_89 = arith.constant 256 : index
    %137 = vector.load %arg14[%c0_88, %c256_89] : memref<1x512xf32, #tpu.memory_space<vmem>>, vector<1x64xf32>
    tpu.vector_store %arg14[%c0_88, %c256_89], %136 {strides = array<i32>} : memref<1x512xf32, #tpu.memory_space<vmem>>, vector<1x64xf32>,
    %c0_90 = arith.constant 0 : index
    %c320 = arith.constant 320 : index
    %138 = vector.load %arg11[%c0_90, %c320] : memref<16x512xbf16, #tpu.memory_space<vmem>>, vector<16x64xbf16>
    %c0_91 = arith.constant 0 : index
    %c320_92 = arith.constant 320 : index
    %139 = vector.load %arg12[%c0_91, %c320_92] : memref<16x512xbf16, #tpu.memory_space<vmem>>, vector<16x64xbf16>
    %cst_93 = arith.constant dense<0.000000e+00> : vector<16x16xf32>
    %140 = tpu.matmul %138, %139, %cst_93 {dimension_numbers = #tpu.dot_dimension_numbers<[1], [1], [0], [0], [0, 0, 1, 0], [], []>} : vector<16x64xbf16>, vector<16x64xbf16>, vector<16x16xf32> -> vector<16x16xf32>
    %cst_94 = arith.constant dense<0xFF800000> : vector<16xf32>
    %141 = vector.multi_reduction <maximumf>, %140, %cst_94 [1] : vector<16x16xf32> to vector<16xf32>
    %cst_95 = arith.constant 0xFF800000 : f32
    %142 = vector.broadcast %cst_95 : f32 to vector<16xf32>
    %143 = arith.maximumf %142, %141 : vector<16xf32>
    %144 = vector.shape_cast %143 : vector<16xf32> to vector<16x1xf32>
    %145 = vector.broadcast %144 : vector<16x1xf32> to vector<16x16xf32>
    %146 = arith.subf %140, %145 : vector<16x16xf32>
    %147 = math.exp %146 : vector<16x16xf32>
    %cst_96 = arith.constant dense<0.000000e+00> : vector<16xf32>
    %148 = vector.multi_reduction <add>, %147, %cst_96 [1] : vector<16x16xf32> to vector<16xf32>
    %149 = vector.shape_cast %148 : vector<16xf32> to vector<16x1xf32>
    %150 = vector.broadcast %149 : vector<16x1xf32> to vector<16x16xf32>
    %151 = arith.divf %147, %150 : vector<16x16xf32>
    %cst_97 = arith.constant dense<0.000000e+00> : vector<16xf32>
    %152 = vector.multi_reduction <add>, %151, %cst_97 [0] : vector<16x16xf32> to vector<16xf32>
    %153 = vector.shape_cast %152 : vector<16xf32> to vector<1x16xf32>
    %cst_98 = arith.constant 1.600000e+01 : f32
    %154 = vector.broadcast %cst_98 : f32 to vector<1x16xf32>
    %155 = arith.divf %153, %154 : vector<1x16xf32>
    %156 = arith.truncf %155 : vector<1x16xf32> to vector<1x16xbf16>
    %c0_99 = arith.constant 0 : index
    %c320_100 = arith.constant 320 : index
    %157 = vector.load %arg13[%c0_99, %c320_100] : memref<16x512xbf16, #tpu.memory_space<vmem>>, vector<16x64xbf16>
    %cst_101 = arith.constant dense<0.000000e+00> : vector<1x64xf32>
    %158 = tpu.matmul %156, %157, %cst_101 {dimension_numbers = #tpu.dot_dimension_numbers<[1], [0], [0], [1], [0, 0, 1, 1], [], []>} : vector<1x16xbf16>, vector<16x64xbf16>, vector<1x64xf32> -> vector<1x64xf32>
    %c0_102 = arith.constant 0 : index
    %c320_103 = arith.constant 320 : index
    %159 = vector.load %arg14[%c0_102, %c320_103] : memref<1x512xf32, #tpu.memory_space<vmem>>, vector<1x64xf32>
    tpu.vector_store %arg14[%c0_102, %c320_103], %158 {strides = array<i32>} : memref<1x512xf32, #tpu.memory_space<vmem>>, vector<1x64xf32>,
    %c0_104 = arith.constant 0 : index
    %c384 = arith.constant 384 : index
    %160 = vector.load %arg11[%c0_104, %c384] : memref<16x512xbf16, #tpu.memory_space<vmem>>, vector<16x64xbf16>
    %c0_105 = arith.constant 0 : index
    %c384_106 = arith.constant 384 : index
    %161 = vector.load %arg12[%c0_105, %c384_106] : memref<16x512xbf16, #tpu.memory_space<vmem>>, vector<16x64xbf16>
    %cst_107 = arith.constant dense<0.000000e+00> : vector<16x16xf32>
    %162 = tpu.matmul %160, %161, %cst_107 {dimension_numbers = #tpu.dot_dimension_numbers<[1], [1], [0], [0], [0, 0, 1, 0], [], []>} : vector<16x64xbf16>, vector<16x64xbf16>, vector<16x16xf32> -> vector<16x16xf32>
    %cst_108 = arith.constant dense<0xFF800000> : vector<16xf32>
    %163 = vector.multi_reduction <maximumf>, %162, %cst_108 [1] : vector<16x16xf32> to vector<16xf32>
    %cst_109 = arith.constant 0xFF800000 : f32
    %164 = vector.broadcast %cst_109 : f32 to vector<16xf32>
    %165 = arith.maximumf %164, %163 : vector<16xf32>
    %166 = vector.shape_cast %165 : vector<16xf32> to vector<16x1xf32>
    %167 = vector.broadcast %166 : vector<16x1xf32> to vector<16x16xf32>
    %168 = arith.subf %162, %167 : vector<16x16xf32>
    %169 = math.exp %168 : vector<16x16xf32>
    %cst_110 = arith.constant dense<0.000000e+00> : vector<16xf32>
    %170 = vector.multi_reduction <add>, %169, %cst_110 [1] : vector<16x16xf32> to vector<16xf32>
    %171 = vector.shape_cast %170 : vector<16xf32> to vector<16x1xf32>
    %172 = vector.broadcast %171 : vector<16x1xf32> to vector<16x16xf32>
    %173 = arith.divf %169, %172 : vector<16x16xf32>
    %cst_111 = arith.constant dense<0.000000e+00> : vector<16xf32>
    %174 = vector.multi_reduction <add>, %173, %cst_111 [0] : vector<16x16xf32> to vector<16xf32>
    %175 = vector.shape_cast %174 : vector<16xf32> to vector<1x16xf32>
    %cst_112 = arith.constant 1.600000e+01 : f32
    %176 = vector.broadcast %cst_112 : f32 to vector<1x16xf32>
    %177 = arith.divf %175, %176 : vector<1x16xf32>
    %178 = arith.truncf %177 : vector<1x16xf32> to vector<1x16xbf16>
    %c0_113 = arith.constant 0 : index
    %c384_114 = arith.constant 384 : index
    %179 = vector.load %arg13[%c0_113, %c384_114] : memref<16x512xbf16, #tpu.memory_space<vmem>>, vector<16x64xbf16>
    %cst_115 = arith.constant dense<0.000000e+00> : vector<1x64xf32>
    %180 = tpu.matmul %178, %179, %cst_115 {dimension_numbers = #tpu.dot_dimension_numbers<[1], [0], [0], [1], [0, 0, 1, 1], [], []>} : vector<1x16xbf16>, vector<16x64xbf16>, vector<1x64xf32> -> vector<1x64xf32>
    %c0_116 = arith.constant 0 : index
    %c384_117 = arith.constant 384 : index
    %181 = vector.load %arg14[%c0_116, %c384_117] : memref<1x512xf32, #tpu.memory_space<vmem>>, vector<1x64xf32>
    tpu.vector_store %arg14[%c0_116, %c384_117], %180 {strides = array<i32>} : memref<1x512xf32, #tpu.memory_space<vmem>>, vector<1x64xf32>,
    %c0_118 = arith.constant 0 : index
    %c448 = arith.constant 448 : index
    %182 = vector.load %arg11[%c0_118, %c448] : memref<16x512xbf16, #tpu.memory_space<vmem>>, vector<16x64xbf16>
    %c0_119 = arith.constant 0 : index
    %c448_120 = arith.constant 448 : index
    %183 = vector.load %arg12[%c0_119, %c448_120] : memref<16x512xbf16, #tpu.memory_space<vmem>>, vector<16x64xbf16>
    %cst_121 = arith.constant dense<0.000000e+00> : vector<16x16xf32>
    %184 = tpu.matmul %182, %183, %cst_121 {dimension_numbers = #tpu.dot_dimension_numbers<[1], [1], [0], [0], [0, 0, 1, 0], [], []>} : vector<16x64xbf16>, vector<16x64xbf16>, vector<16x16xf32> -> vector<16x16xf32>
    %cst_122 = arith.constant dense<0xFF800000> : vector<16xf32>
    %185 = vector.multi_reduction <maximumf>, %184, %cst_122 [1] : vector<16x16xf32> to vector<16xf32>
    %cst_123 = arith.constant 0xFF800000 : f32
    %186 = vector.broadcast %cst_123 : f32 to vector<16xf32>
    %187 = arith.maximumf %186, %185 : vector<16xf32>
    %188 = vector.shape_cast %187 : vector<16xf32> to vector<16x1xf32>
    %189 = vector.broadcast %188 : vector<16x1xf32> to vector<16x16xf32>
    %190 = arith.subf %184, %189 : vector<16x16xf32>
    %191 = math.exp %190 : vector<16x16xf32>
    %cst_124 = arith.constant dense<0.000000e+00> : vector<16xf32>
    %192 = vector.multi_reduction <add>, %191, %cst_124 [1] : vector<16x16xf32> to vector<16xf32>
    %193 = vector.shape_cast %192 : vector<16xf32> to vector<16x1xf32>
    %194 = vector.broadcast %193 : vector<16x1xf32> to vector<16x16xf32>
    %195 = arith.divf %191, %194 : vector<16x16xf32>
    %cst_125 = arith.constant dense<0.000000e+00> : vector<16xf32>
    %196 = vector.multi_reduction <add>, %195, %cst_125 [0] : vector<16x16xf32> to vector<16xf32>
    %197 = vector.shape_cast %196 : vector<16xf32> to vector<1x16xf32>
    %cst_126 = arith.constant 1.600000e+01 : f32
    %198 = vector.broadcast %cst_126 : f32 to vector<1x16xf32>
    %199 = arith.divf %197, %198 : vector<1x16xf32>
    %200 = arith.truncf %199 : vector<1x16xf32> to vector<1x16xbf16>
    %c0_127 = arith.constant 0 : index
    %c448_128 = arith.constant 448 : index
    %201 = vector.load %arg13[%c0_127, %c448_128] : memref<16x512xbf16, #tpu.memory_space<vmem>>, vector<16x64xbf16>
    %cst_129 = arith.constant dense<0.000000e+00> : vector<1x64xf32>
    %202 = tpu.matmul %200, %201, %cst_129 {dimension_numbers = #tpu.dot_dimension_numbers<[1], [0], [0], [1], [0, 0, 1, 1], [], []>} : vector<1x16xbf16>, vector<16x64xbf16>, vector<1x64xf32> -> vector<1x64xf32>
    %c0_130 = arith.constant 0 : index
    %c448_131 = arith.constant 448 : index
    %203 = vector.load %arg14[%c0_130, %c448_131] : memref<1x512xf32, #tpu.memory_space<vmem>>, vector<1x64xf32>
    tpu.vector_store %arg14[%c0_130, %c448_131], %202 {strides = array<i32>} : memref<1x512xf32, #tpu.memory_space<vmem>>, vector<1x64xf32>,
    %c0_132 = arith.constant 0 : index
    %c0_133 = arith.constant 0 : index
    %204 = vector.load %arg14[%c0_132, %c0_133] : memref<1x512xf32, #tpu.memory_space<vmem>>, vector<1x512xf32>
    %205 = arith.truncf %204 : vector<1x512xf32> to vector<1x512xbf16>
    %c0_134 = arith.constant 0 : index
    %c0_135 = arith.constant 0 : index
    %206 = vector.load %arg5[%c0_134, %c0_135] : memref<512x512xbf16, #tpu.memory_space<vmem>>, vector<512x512xbf16>
    %cst_136 = arith.constant dense<0.000000e+00> : vector<1x512xf32>
    %207 = tpu.matmul %205, %206, %cst_136 {dimension_numbers = #tpu.dot_dimension_numbers<[1], [0], [0], [1], [0, 0, 1, 1], [], []>} : vector<1x512xbf16>, vector<512x512xbf16>, vector<1x512xf32> -> vector<1x512xf32>
    %208 = arith.addf %207, %2 : vector<1x512xf32>
    %209 = arith.addf %208, %14 : vector<1x512xf32>
    %210 = arith.truncf %209 : vector<1x512xf32> to vector<1x512xbf16>
    %c0_137 = arith.constant 0 : index
    %c0_138 = arith.constant 0 : index
    %211 = vector.load %arg6[%c0_137, %c0_138] : memref<512x512xbf16, #tpu.memory_space<vmem>>, vector<512x512xbf16>
    %cst_139 = arith.constant dense<0.000000e+00> : vector<1x512xf32>
    %212 = tpu.matmul %210, %211, %cst_139 {dimension_numbers = #tpu.dot_dimension_numbers<[1], [0], [0], [1], [0, 0, 1, 1], [], []>} : vector<1x512xbf16>, vector<512x512xbf16>, vector<1x512xf32> -> vector<1x512xf32>
    %213 = arith.addf %212, %3 : vector<1x512xf32>
    %c0_140 = arith.constant 0 : index
    %c0_141 = arith.constant 0 : index
    %214 = vector.load %arg2[%c0_140, %c0_141] : memref<4x512xbf16, #tpu.memory_space<vmem>>, vector<4x512xbf16>
    %c0_142 = arith.constant 0 : index
    %c0_143 = arith.constant 0 : index
    %215 = vector.load %arg7[%c0_142, %c0_143] : memref<512x512xbf16, #tpu.memory_space<vmem>>, vector<512x512xbf16>
    %cst_144 = arith.constant dense<0.000000e+00> : vector<4x512xf32>
    %216 = tpu.matmul %214, %215, %cst_144 {dimension_numbers = #tpu.dot_dimension_numbers<[1], [0], [0], [1], [0, 0, 1, 1], [], []>} : vector<4x512xbf16>, vector<512x512xbf16>, vector<4x512xf32> -> vector<4x512xf32>
    %217 = vector.broadcast %4 : vector<1x512xf32> to vector<4x512xf32>
    %218 = arith.addf %216, %217 : vector<4x512xf32>
    %219 = vector.broadcast %213 : vector<1x512xf32> to vector<4x512xf32>
    %220 = arith.mulf %219, %218 : vector<4x512xf32>
    %221 = arith.negf %220 : vector<4x512xf32>
    %222 = math.exp %221 : vector<4x512xf32>
    %cst_145 = arith.constant 1.000000e+00 : f32
    %223 = vector.broadcast %cst_145 : f32 to vector<4x512xf32>
    %224 = arith.addf %223, %222 : vector<4x512xf32>
    %225 = arith.divf %223, %224 : vector<4x512xf32>
    %226 = arith.mulf %225, %218 : vector<4x512xf32>
    %c0_146 = arith.constant 0 : index
    %c0_147 = arith.constant 0 : index
    %c0_148 = arith.constant 0 : index
    %227 = vector.load %arg10[%c0_146, %c0_147, %c0_148] : memref<1x4x512xf32, #tpu.memory_space<vmem>>, vector<1x4x512xf32>
    %228 = vector.shape_cast %227 : vector<1x4x512xf32> to vector<4x512xf32>
    %229 = vector.shape_cast %226 : vector<4x512xf32> to vector<1x4x512xf32>
    tpu.vector_store %arg10[%c0_146, %c0_147, %c0_148], %229 {strides = array<i32>} : memref<1x4x512xf32, #tpu.memory_space<vmem>>, vector<1x4x512xf32>,
    return
  }
  func.func @transform_0(%arg0: i32) -> (i32, i32, i32) {
    %c0_i32 = arith.constant 0 : i32
    %c0_i32_0 = arith.constant 0 : i32
    %c0_i32_1 = arith.constant 0 : i32
    return %arg0, %c0_i32, %c0_i32_0 : i32, i32, i32
  }
  func.func @transform_1(%arg0: i32) -> (i32, i32) {
    %c0_i32 = arith.constant 0 : i32
    %c0_i32_0 = arith.constant 0 : i32
    %c0_i32_1 = arith.constant 0 : i32
    return %c0_i32, %c0_i32_0 : i32, i32
  }
  func.func @transform_2(%arg0: i32) -> (i32, i32) {
    %c0_i32 = arith.constant 0 : i32
    %c0_i32_0 = arith.constant 0 : i32
    %c0_i32_1 = arith.constant 0 : i32
    return %c0_i32, %c0_i32_0 : i32, i32
  }
  func.func @transform_3(%arg0: i32) -> (i32, i32) {
    %c0_i32 = arith.constant 0 : i32
    %c0_i32_0 = arith.constant 0 : i32
    %c0_i32_1 = arith.constant 0 : i32
    return %c0_i32, %c0_i32_0 : i32, i32
  }
  func.func @transform_4(%arg0: i32) -> (i32, i32) {
    %c0_i32 = arith.constant 0 : i32
    %c0_i32_0 = arith.constant 0 : i32
    %c0_i32_1 = arith.constant 0 : i32
    return %c0_i32, %c0_i32_0 : i32, i32
  }
  func.func @transform_5(%arg0: i32) -> (i32, i32) {
    %c0_i32 = arith.constant 0 : i32
    %c0_i32_0 = arith.constant 0 : i32
    %c0_i32_1 = arith.constant 0 : i32
    return %c0_i32, %c0_i32_0 : i32, i32
  }
  func.func @transform_6(%arg0: i32) -> (i32, i32) {
    %c0_i32 = arith.constant 0 : i32
    %c0_i32_0 = arith.constant 0 : i32
    %c0_i32_1 = arith.constant 0 : i32
    return %c0_i32, %c0_i32_0 : i32, i32
  }
  func.func @transform_7(%arg0: i32) -> (i32, i32) {
    %c0_i32 = arith.constant 0 : i32
    %c0_i32_0 = arith.constant 0 : i32
    %c0_i32_1 = arith.constant 0 : i32
    return %c0_i32, %c0_i32_0 : i32, i32
  }
  func.func @transform_8(%arg0: i32) -> (i32, i32) {
    %c0_i32 = arith.constant 0 : i32
    %c0_i32_0 = arith.constant 0 : i32
    %c0_i32_1 = arith.constant 0 : i32
    return %c0_i32, %c0_i32_0 : i32, i32
  }
  func.func @transform_9(%arg0: i32) -> (i32, i32, i32) {
    %c0_i32 = arith.constant 0 : i32
    %c0_i32_0 = arith.constant 0 : i32
    %c0_i32_1 = arith.constant 0 : i32
    return %arg0, %c0_i32, %c0_i32_0 : i32, i32, i32
  }
}

</mosaic_0001>

<bundles_post_ra>
// kernel: tpu_custom_call.1
= control target key start
LH: loop header
LB: loop body
LE: loop exit
PB: predicated region body
PF: predicated region fallthrough
CT: control target
= control target key end

     0   :  { %s12423_s0 = inlined_call_operand.hbm [shape: bf16[2,16,384], index: 0, kind: input, shape index: {}]   ;;  %s12424_s1 = inlined_call_operand.hbm [shape: bf16[4,512], index: 1, kind: input, shape index: {}]   ;;  %s12425_s2 = inlined_call_operand.hbm [shape: bf16[384,512], index: 2, kind: input, shape index: {}]   ;;  %s12426_s3 = inlined_call_operand.hbm [shape: bf16[512,1536], index: 3, kind: input, shape index: {}]   ;;  %s12427_s4 = inlined_call_operand.hbm [shape: bf16[512,512], index: 4, kind: input, shape index: {}]   ;;  %s12428_s5 = inlined_call_operand.hbm [shape: bf16[512,512], index: 5, kind: input, shape index: {}]   ;;  %s12429_s6 = inlined_call_operand.hbm [shape: bf16[512,512], index: 6, kind: input, shape index: {}]   ;;  %s12430_s7 = inlined_call_operand.hbm [shape: f32[1,1536], index: 7, kind: input, shape index: {}]   ;;  %s12431_s8 = inlined_call_operand.hbm [shape: f32[4,512], index: 8, kind: input, shape index: {}]   ;;  %s12432_s9 = inlined_call_operand.hbm [shape: f32[2,4,512], index: 9, kind: output, shape index: {}]  }
   0x1   :  { %12437 = sst [smem:[#allocation28_spill]] %s12424_s1 }
   0x2   :  { %12438 = sst [smem:[#allocation29_spill]] %s12426_s3 }
   0x3   :  { %12439 = sst [smem:[#allocation30_spill]] %s12432_s9 }
   0x4   :  { %14 = vsyncpa [#allocation7], 0 }
   0x5   :  { %16 = vsyncpa [#allocation7 + $0x1], 0 }
   0x6   :  { %17 = vsyncpa [#allocation10], 0 }
   0x7   :  { %18 = vsyncpa [#allocation13], 0 }
   0x8   :  { %19 = vsyncpa [#allocation16], 0 }
   0x9   :  { %20 = vsyncpa [#allocation19], 0 }
   0xa   :  { %21 = vsyncpa [#allocation8], 0 }
   0xb   :  { %23 = vsyncpa [#allocation8 + $0x1], 0  ;;  %s11566_s30 = smov 0   ;;  %s11568_s10 = smov 0  }
   0xc   :  { %s11570_s11 = smov 0   ;;  %s11572_s12 = smov 0  }
   0xd LB: > { %s11494_s13 = smov [#allocation9]   ;;  %s11587_s15 = sadd.s32 4294967295, %s11492_s12   ;;  %s11492_s12 = sphi %s11572_s12, %s12468_s12   ;;  %s11488_s11 = sphi %s11570_s11, %s12467_s11   ;;  %s11484_s10 = sphi %s11568_s10, %s12466_s10   ;;  %s11480_s30 = sphi %s11566_s30, %s12465_s30  }
   0xe   : > { %s267_s14 = sshll.u32 %s11494_s13, 4  ;;  %p8501_p0 = scmp.ge.s32.totalorder %s11492_s12, 1  ;;  %s268_s14 = int_to_ptr.vmem [resolvable:$true] %s267_s14 }
   0xf   : > { %p12433_p1 = scmp.eq.s32.totalorder %s11587_s15, 0  ;;  %p254_p2 = scmp.lt.s32.totalorder %s11492_s12, 3 }
  0x10   : > { %s11495_s17 = smov [#allocation12]   ;;  %s11496_s20 = smov [#allocation15]  }
  0x11   : > { %p11592_p3 = pnand %p8501_p0, %p254_p2  ;;  %s290_s18 = sshll.u32 %s11495_s17, 4  ;;  %s11599_s18 = int_to_ptr.vmem [resolvable:$true] %s290_s18 }
  0x12   : > { %s11607_s21 = sshll.u32 %s11496_s20, 4  ;;  %s12442_s1 = sld [smem:[#allocation28_spill]]  ;;  %s317_s21 = int_to_ptr.vmem [resolvable:$true] %s11607_s21 }
  0x13   : > { %s12440_s16 = scalar_select %p11592_p3, 1, 0 }
  0x14   : > { %p9670_p5 = pneg %p11592_p3 }
  0x16   : > { %p11603_p6 = pnand %p9670_p5, %p12433_p1 }
  0x18   : > { %s11156_s24 = scalar_lea.hbm %s12442_s1, 128  ;;  %p11617_p8 = pneg %p11603_p6 }
  0x19   : > { %p11157_p7 = scmp.ne.s32.totalorder %s12442_s1, %s11156_s24  ;;  %p11163_p11 = scmp.lt.u32.totalorder %s11156_s24, %s12442_s1 }
  0x1b   : > { %p11159_p9 = pnand %p11617_p8, %p11157_p7 }
  0x1d   : > { %p11160_p10 = pneg %p11159_p9 }
  0x1f   : > { %p11165_p12 = pnand %p11163_p11, %p11160_p10 }
  0x21   : > { %11168 = shalt.err (!%p11165_p12)
}
  0x22   : > { %s11169_s13 = scalar_lea.vmem %s268_s14, 128  ;;  %p11177_p5 = scmp.lt.s32.totalorder %s268_s14, %s268_s14 }
  0x23   : > { %p11170_p13 = scmp.ne.s32.totalorder %s268_s14, %s11169_s13  ;;  %p11178_p4 = scmp.lt.s32.totalorder %s11169_s13, %s11169_s13 }
  0x25   : > { %p11172_p0 = pnand %p11170_p13, %p11617_p8  ;;  %p11179_p1 = por %p11178_p4, %p11177_p5 }
  0x27   : > { %p11173_p2 = pneg %p11172_p0 }
  0x29   : > { %p11180_p3 = pnand %p11179_p1, %p11173_p2 }
  0x2b   : > { %11183 = shalt.err (!%p11180_p3)
}
  0x2c   : > { %9673 = dma.hbm_to_vmem [thread:$0]  (!%p11603_p6), %s12442_s1, 128, %s268_s14, [#allocation10]  }
  0x2d   : > { %s12444_s3 = sld [smem:[#allocation29_spill]] }
  0x33   : > { %s11184_s24 = scalar_lea.hbm %s12444_s3, 49152 }
  0x34   : > { %p11185_p7 = scmp.ne.s32.totalorder %s12444_s3, %s11184_s24  ;;  %p11191_p1 = scmp.lt.u32.totalorder %s11184_s24, %s12444_s3 }
  0x36   : > { %p11187_p9 = pnand %p11185_p7, %p11617_p8 }
  0x38   : > { %p11188_p4 = pneg %p11187_p9 }
  0x3a   : > { %p11193_p3 = pnand %p11191_p1, %p11188_p4 }
  0x3c   : > { %11196 = shalt.err (!%p11193_p3)
}
  0x3d   : > { %s11197_s14 = scalar_lea.vmem %s11599_s18, 49152  ;;  %p11205_p13 = scmp.lt.s32.totalorder %s11599_s18, %s11599_s18 }
  0x3e   : > { %p11198_p10 = scmp.ne.s32.totalorder %s11599_s18, %s11197_s14  ;;  %p11206_p0 = scmp.lt.s32.totalorder %s11197_s14, %s11197_s14 }
  0x40   : > { %p11200_p11 = pnand %p11198_p10, %p11617_p8  ;;  %p11207_p2 = por %p11206_p0, %p11205_p13 }
  0x42   : > { %p11201_p12 = pneg %p11200_p11 }
  0x44   : > { %p11208_p5 = pnand %p11207_p2, %p11201_p12 }
  0x46   : > { %11211 = shalt.err (!%p11208_p5)
}
  0x47   : > { %s11497_s13 = smov 768   ;;  %s11498_s17 = smov 48  }
  0x48   : > { %9679 = dma.hbm_to_vmem [thread:$0]  (!%p11603_p6), %s12444_s3, 49152, %s11599_s18, [#allocation13], %s11497_s13, %s11497_s13, %s11498_s17  }
  0x49   : > { %s11212_s25 = scalar_lea.hbm %s12428_s5, 16384 }
  0x4a   : > { %p11213_p7 = scmp.ne.s32.totalorder %s12428_s5, %s11212_s25  ;;  %p11219_p1 = scmp.lt.u32.totalorder %s11212_s25, %s12428_s5 }
  0x4c   : > { %p11215_p9 = pnand %p11213_p7, %p11617_p8 }
  0x4e   : > { %p11216_p4 = pneg %p11215_p9 }
  0x50   : > { %p11221_p3 = pnand %p11219_p1, %p11216_p4 }
  0x52   : > { %11224 = shalt.err (!%p11221_p3)
}
  0x53   : > { %s11225_s20 = scalar_lea.vmem %s317_s21, 16384  ;;  %p11233_p13 = scmp.lt.s32.totalorder %s317_s21, %s317_s21 }
  0x54   : > { %p11226_p10 = scmp.ne.s32.totalorder %s317_s21, %s11225_s20  ;;  %p11234_p0 = scmp.lt.s32.totalorder %s11225_s20, %s11225_s20 }
  0x56   : > { %p11228_p11 = pnand %p11226_p10, %p11617_p8  ;;  %p11235_p2 = por %p11234_p0, %p11233_p13 }
  0x58   : > { %p11229_p12 = pneg %p11228_p11 }
  0x5a   : > { %p11236_p5 = pnand %p11235_p2, %p11229_p12 }
  0x5c   : > { %11239 = shalt.err (!%p11236_p5)
}
  0x5d   : > { %s11499_s18 = smov 256   ;;  %s11500_s13 = smov 16  }
  0x5e   : > { %9685 = dma.hbm_to_vmem [thread:$0]  (!%p11603_p6), %s12428_s5, 16384, %s317_s21, [#allocation16], %s11499_s18, %s11499_s18, %s11500_s13  }
  0x5f   : > { %s11501_s23 = smov [#allocation18]   ;;  %s11502_s25 = smov [#allocation11]  }
  0x60   : > { %s343_s24 = sshll.u32 %s11501_s23, 4  ;;  %s277_s26 = sshll.u32 %s11502_s25, 4  ;;  %s344_s24 = int_to_ptr.vmem [resolvable:$true] %s343_s24  ;;  %s278_s26 = int_to_ptr.vmem [resolvable:$true] %s277_s26 }
  0x61   : > { %s11240_s14 = scalar_lea.hbm %s12430_s7, 192 }
  0x62   : > { %p11241_p7 = scmp.ne.s32.totalorder %s12430_s7, %s11240_s14  ;;  %p11247_p1 = scmp.lt.u32.totalorder %s11240_s14, %s12430_s7 }
  0x64   : > { %p11243_p9 = pnand %p11241_p7, %p11617_p8 }
  0x66   : > { %p11244_p4 = pneg %p11243_p9 }
  0x68   : > { %p11249_p3 = pnand %p11247_p1, %p11244_p4 }
  0x6a   : > { %11252 = shalt.err (!%p11249_p3)
}
  0x6b   : > { %s11253_s21 = scalar_lea.vmem %s344_s24, 192  ;;  %p11261_p13 = scmp.lt.s32.totalorder %s344_s24, %s344_s24 }
  0x6c   : > { %p11254_p10 = scmp.ne.s32.totalorder %s344_s24, %s11253_s21  ;;  %p11262_p0 = scmp.lt.s32.totalorder %s11253_s21, %s11253_s21 }
  0x6e   : > { %p11256_p11 = pnand %p11254_p10, %p11617_p8  ;;  %p11263_p2 = por %p11262_p0, %p11261_p13 }
  0x70   : > { %p11257_p12 = pneg %p11256_p11 }
  0x72   : > { %p11264_p5 = pnand %p11263_p2, %p11257_p12 }
  0x74   : > { %11267 = shalt.err (!%p11264_p5)
}
  0x75   : > { %9691 = dma.hbm_to_vmem [thread:$0]  (!%p11603_p6), %s12430_s7, 192, %s344_s24, [#allocation19]  }
  0x76   : > { %s11268_s22 = scalar_lea.hbm %s12425_s2, 12288 }
  0x77   : > { %p11269_p7 = scmp.ne.s32.totalorder %s12425_s2, %s11268_s22  ;;  %p11275_p1 = scmp.lt.u32.totalorder %s11268_s22, %s12425_s2 }
  0x79   : > { %p11271_p9 = pnand %p11269_p7, %p11617_p8 }
  0x7b   : > { %p11272_p4 = pneg %p11271_p9 }
  0x7d   : > { %p11277_p3 = pnand %p11275_p1, %p11272_p4 }
  0x7f   : > { %11280 = shalt.err (!%p11277_p3)
}
  0x80   : > { %s11281_s14 = scalar_lea.vmem %s278_s26, 12288  ;;  %p11289_p13 = scmp.lt.s32.totalorder %s278_s26, %s278_s26 }
  0x81   : > { %p11282_p10 = scmp.ne.s32.totalorder %s278_s26, %s11281_s14  ;;  %p11290_p0 = scmp.lt.s32.totalorder %s11281_s14, %s11281_s14 }
  0x83   : > { %p11284_p11 = pnand %p11282_p10, %p11617_p8  ;;  %p11291_p2 = por %p11290_p0, %p11289_p13 }
  0x85   : > { %p11285_p12 = pneg %p11284_p11 }
  0x87   : > { %p11292_p5 = pnand %p11291_p2, %p11285_p12 }
  0x89   : > { %11295 = shalt.err (!%p11292_p5)
}
  0x8a   : > { %9676 = dma.hbm_to_vmem [thread:$0]  (!%p11603_p6), %s12425_s2, 12288, %s278_s26, [#allocation10], %s11499_s18, %s11499_s18, %s11500_s13  }
  0x8b   : > { %s11503_s21 = smov [#allocation14]   ;;  %s11504_s17 = smov [#allocation17]  }
  0x8c   : > { %s303_s1 = sshll.u32 %s11503_s21, 4  ;;  %s329_s3 = sshll.u32 %s11504_s17, 4  ;;  %s304_s1 = int_to_ptr.vmem [resolvable:$true] %s303_s1  ;;  %s330_s3 = int_to_ptr.vmem [resolvable:$true] %s329_s3 }
  0x8d   : > { %s11296_s23 = scalar_lea.hbm %s12427_s4, 16384 }
  0x8e   : > { %p11297_p7 = scmp.ne.s32.totalorder %s12427_s4, %s11296_s23  ;;  %p11303_p1 = scmp.lt.u32.totalorder %s11296_s23, %s12427_s4 }
  0x90   : > { %p11299_p9 = pnand %p11297_p7, %p11617_p8 }
  0x92   : > { %p11300_p4 = pneg %p11299_p9 }
  0x94   : > { %p11305_p3 = pnand %p11303_p1, %p11300_p4 }
  0x96   : > { %11308 = shalt.err (!%p11305_p3)
}
  0x97   : > { %s11309_s26 = scalar_lea.vmem %s304_s1, 16384  ;;  %p11317_p13 = scmp.lt.s32.totalorder %s304_s1, %s304_s1 }
  0x98   : > { %p11310_p10 = scmp.ne.s32.totalorder %s304_s1, %s11309_s26  ;;  %p11318_p0 = scmp.lt.s32.totalorder %s11309_s26, %s11309_s26 }
  0x9a   : > { %p11312_p11 = pnand %p11310_p10, %p11617_p8  ;;  %p11319_p2 = por %p11318_p0, %p11317_p13 }
  0x9c   : > { %p11313_p12 = pneg %p11312_p11 }
  0x9e   : > { %p11320_p5 = pnand %p11319_p2, %p11313_p12 }
  0xa0   : > { %11323 = shalt.err (!%p11320_p5)
}
  0xa1   : > { %9682 = dma.hbm_to_vmem [thread:$0]  (!%p11603_p6), %s12427_s4, 16384, %s304_s1, [#allocation13], %s11499_s18, %s11499_s18, %s11500_s13  }
  0xa2   : > { %s11324_s9 = scalar_lea.hbm %s12429_s6, 16384 }
  0xa3   : > { %p11325_p7 = scmp.ne.s32.totalorder %s12429_s6, %s11324_s9  ;;  %p11331_p1 = scmp.lt.u32.totalorder %s11324_s9, %s12429_s6 }
  0xa5   : > { %p11327_p9 = pnand %p11325_p7, %p11617_p8 }
  0xa7   : > { %p11328_p4 = pneg %p11327_p9 }
  0xa9   : > { %p11333_p3 = pnand %p11331_p1, %p11328_p4 }
  0xab   : > { %11336 = shalt.err (!%p11333_p3)
}
  0xac   : > { %s11337_s29 = scalar_lea.vmem %s330_s3, 16384  ;;  %p11345_p13 = scmp.lt.s32.totalorder %s330_s3, %s330_s3 }
  0xad   : > { %p11338_p10 = scmp.ne.s32.totalorder %s330_s3, %s11337_s29  ;;  %p11346_p0 = scmp.lt.s32.totalorder %s11337_s29, %s11337_s29 }
  0xaf   : > { %p11340_p11 = pnand %p11338_p10, %p11617_p8  ;;  %p11347_p2 = por %p11346_p0, %p11345_p13 }
  0xb1   : > { %p11341_p12 = pneg %p11340_p11 }
  0xb3   : > { %p11348_p5 = pnand %p11347_p2, %p11341_p12 }
  0xb5   : > { %11351 = shalt.err (!%p11348_p5)
}
  0xb6   : > { %9688 = dma.hbm_to_vmem [thread:$0]  (!%p11603_p6), %s12429_s6, 16384, %s330_s3, [#allocation16], %s11499_s18, %s11499_s18, %s11500_s13  }
  0xb7   : > { %s11505_s26 = smov [#allocation20]   ;;  %s11352_s17 = scalar_lea.hbm %s12431_s8, 256 }
  0xb8   : > { %s354_s24 = sshll.u32 %s11505_s26, 4  ;;  %p11353_p7 = scmp.ne.s32.totalorder %s12431_s8, %s11352_s17  ;;  %s355_s24 = int_to_ptr.vmem [resolvable:$true] %s354_s24 }
  0xb9   : > { %p11359_p1 = scmp.lt.u32.totalorder %s11352_s17, %s12431_s8 }
  0xba   : > { %p11355_p9 = pnand %p11353_p7, %p11617_p8 }
  0xbc   : > { %p11356_p4 = pneg %p11355_p9 }
  0xbe   : > { %p11361_p3 = pnand %p11359_p1, %p11356_p4 }
  0xc0   : > { %11364 = shalt.err (!%p11361_p3)
}
  0xc1   : > { %s11365_s18 = scalar_lea.vmem %s355_s24, 256  ;;  %p11373_p13 = scmp.lt.s32.totalorder %s355_s24, %s355_s24 }
  0xc2   : > { %p11366_p10 = scmp.ne.s32.totalorder %s355_s24, %s11365_s18  ;;  %p11374_p0 = scmp.lt.s32.totalorder %s11365_s18, %s11365_s18 }
  0xc4   : > { %p11368_p11 = pnand %p11366_p10, %p11617_p8  ;;  %p11375_p2 = por %p11374_p0, %p11373_p13 }
  0xc6   : > { %p11369_p12 = pneg %p11368_p11 }
  0xc8   : > { %p11376_p5 = pnand %p11375_p2, %p11369_p12 }
  0xca   : > { %11379 = shalt.err (!%p11376_p5)
}
  0xcb   : > { %9694 = dma.hbm_to_vmem [thread:$0]  (!%p11603_p6), %s12431_s8, 256, %s355_s24, [#allocation19]  }
  0xcc   : > { %s8500_s27 = sadd.s32 4294967294, %s11492_s12   ;;  %s11779_s19 = sadd.s32 1, %s11492_s12  }
  0xcd   : > { %s33_s28 = ssub.s32 %s11492_s12, %s11779_s19  ;;  %s36_s29 = sadd.s32 1, %s11488_s11 }
  0xce   : > { %p34_p8 = scmp.eq.s32.totalorder %s33_s28, 0  ;;  %p43_p7 = scmp.ne.s32.totalorder %s11488_s11, %s11484_s10 }
  0xcf   : > { %p44_p9 = scmp.eq.s32.totalorder %s11492_s12, 0  ;;  %p49_p4 = scmp.ne.s32.totalorder %s11484_s10, %s11480_s30 }
  0xd0   : > { %s11790_s1 = scalar_select %p34_p8, %s11488_s11, %s36_s29  }
  0xd1   : > { %p45_p1 = por %p44_p9, %p43_p7  ;;  %p12445_p3 = scmp.eq.s32.totalorder %s11587_s15, 0 }
  0xd2   : > { %p241_p6 = scmp.eq.s32.totalorder %s11587_s15, 1  ;;  %p247_p11 = scmp.eq.s32.totalorder %s8500_s27, 1 }
  0xd3   : > { %p11794_p10 = por %p12445_p3, %p49_p4  ;;  %p9711_p12 = scmp.lt.s32.totalorder %s11492_s12, 2 }
  0xd4   : > { %s365_s26 = sand.u32 1, %s11488_s11   ;;  %p11801_p13 = por %p241_p6, %p43_p7 }
  0xd5   : > { %p11805_p0 = por %p247_p11, %p49_p4  ;;  %s9631_s21 = smul.u32 24, %s365_s26 }
  0xd6   : > { %s12447_s24 = scalar_select %p11801_p13, 1, 0 }
  0xd7   : > { %s12448_s20 = scalar_select %p11805_p0, 1, 0 }
  0xd8   : > { %s9632_s17 = smul.u32 384, %s11492_s12  ;;  %p11810_p2 = pnand %p9711_p12, %p45_p1 }
  0xd9   : > { %s369_s18 = scalar_lea.vmem [#allocation6], %s9631_s21  ;;  %s11821_s3 = scalar_lea.sflag [#allocation7], %s365_s26 }
  0xda   : > { %s11817_s25 = scalar_lea.hbm %s12423_s0, %s9632_s17  ;;  %s376_s13 = sshll.u32 %s369_s18, 4  ;;  %s11819_s13 = int_to_ptr.vmem [resolvable:$true] %s376_s13 }
  0xdb   : > { %s11380_s27 = scalar_lea.hbm %s11817_s25, 384  ;;  %p11382_p8 = pneg %p11810_p2 }
  0xdc   : > { %p11381_p5 = scmp.ne.s32.totalorder %s11817_s25, %s11380_s27  ;;  %s11385_s17 = scalar_lea.hbm %s12423_s0, 768 }
  0xdd   : > { %p11386_p4 = scmp.lt.u32.totalorder %s11817_s25, %s12423_s0  ;;  %p11387_p1 = scmp.lt.u32.totalorder %s11385_s17, %s11380_s27 }
  0xde   : > { %p11383_p7 = pnand %p11382_p8, %p11381_p5  ;;  %p11389_p6 = scmp.lt.u32.totalorder %s11380_s27, %s11817_s25 }
  0xdf   : > { %p11388_p3 = por %p11387_p1, %p11386_p4 }
  0xe0   : > { %p11384_p9 = pneg %p11383_p7 }
  0xe1   : > { %p11390_p11 = por %p11389_p6, %p11388_p3 }
  0xe3   : > { %p11391_p12 = pnand %p11390_p11, %p11384_p9 }
  0xe5   : > { %11394 = shalt.err (!%p11391_p12)
}
  0xe6   : > { %s11395_s26 = scalar_lea.vmem %s11819_s13, 384  ;;  %s11506_s21 = smov [#allocation6]  }
  0xe7   : > { %p11396_p5 = scmp.ne.s32.totalorder %s11819_s13, %s11395_s26  ;;  %s11400_s18 = sshll.u32 %s11506_s21, 4  ;;  %s11401_s18 = int_to_ptr.vmem [resolvable:$false] %s11400_s18 }
  0xe8   : > { %s11402_s28 = scalar_lea.vmem %s11401_s18, 768  ;;  %p11403_p13 = scmp.lt.s32.totalorder %s11819_s13, %s11401_s18 }
  0xe9   : > { %p11398_p7 = pnand %p11396_p5, %p11382_p8  ;;  %p11404_p4 = scmp.lt.s32.totalorder %s11402_s28, %s11395_s26 }
  0xeb   : > { %p11399_p0 = pneg %p11398_p7  ;;  %p11405_p1 = por %p11404_p4, %p11403_p13 }
  0xed   : > { %p11406_p3 = pnand %p11405_p1, %p11399_p0 }
  0xef   : > { %11409 = shalt.err (!%p11406_p3)
}
  0xf0   : > { %s11507_s27 = smov 192   ;;  %s11508_s29 = smov 12  }
  0xf1   : > { %9698 = dma.hbm_to_vmem [thread:$0]  (!%p11810_p2), %s11817_s25, 384, %s11819_s13, %s11821_s3, %s11507_s27, %s11507_s27, %s11508_s29  }
  0xf2   : > { %p12450_p8 = scmp.ne.s32.totalorder %s12440_s16, 0 }
  0xf3   : > { %s11852_s17 = sand.u32 (!%p12450_p8), 1, %s11484_s10  }
  0xf4   : > { %388 = sbr.rel (%p12450_p8) target bundleno = 2774 (0xad6), region = 56  ;;  %s391_s23 = scalar_lea.sflag (!%p12450_p8), [#allocation7], %s11852_s17 }
  0xf5   : > { %s9633_s22 = smul.u32 (!%p12450_p8), 24, %s11852_s17 }
  0xf7   : > { %s11856_s26 = scalar_lea.vmem (!%p12450_p8), [#allocation6], %s9633_s22 }
  0xfb   : > { %11455 = dma.done.wait (%p11794_p10), %s391_s23, 384  }
  0xfc   : > { %11457 = vsyncadd (%p11794_p10), %s391_s23, 4294966912  ;;  %p12451_p13 = scmp.eq.s32.totalorder %s11587_s15, 0 }
  0xfe   : > { %11459 = dma.done.wait (%p12451_p13), [#allocation10], 12416   ;;  %p12452_p0 = pmov %p12451_p13 }
 0x100   : > { %11461 = vsyncadd (%p12452_p0), [#allocation10], 4294954880  ;;  %p12453_p2 = pmov %p12452_p0 }
 0x101   : > { %p12454_p9 = pmov %p12452_p0 }
 0x102   : > { %11463 = dma.done.wait (%p12453_p2), [#allocation13], 65536  }
 0x103   : > { %11465 = vsyncadd (%p12454_p9), [#allocation13], 4294901760  ;;  %p12455_p6 = pmov %p12452_p0 }
 0x104   : > { %p12456_p11 = pmov %p12452_p0 }
 0x105   : > { %11467 = dma.done.wait (%p12455_p6), [#allocation16], 32768  }
 0x106   : > { %11469 = vsyncadd (%p12456_p11), [#allocation16], 4294934528  ;;  %p12457_p10 = pmov %p12452_p0 }
 0x107   : > { %p12458_p12 = pmov %p12452_p0 }
 0x108   : > { %11471 = dma.done.wait (%p12457_p10), [#allocation19], 448  }
 0x109   : > { %11473 = vsyncadd (%p12458_p12), [#allocation19], 4294966848  ;;  %v9773_v0 = vld [vmem:[#allocation11 + $0x4] ss:$16 sps:$4 sm:$0xff]   ;;  %v9775_v1 = vld [vmem:[#allocation11] ss:$16 sps:$4 sm:$0xff]  }
 0x10a   : > { %1098 = vmatprep.subr.bf16.mxu0 %v9773_v0  ;;  %v9776_v2 = vld [vmem:[#allocation11 + $0x24] ss:$16 sps:$4 sm:$0xff]   ;;  %v9778_v3 = vld [vmem:[#allocation11 + $0x20] ss:$16 sps:$4 sm:$0xff]   ;;  %v9793_v7 = vld [vmem:[#allocation11 + $0xc] ss:$16 sps:$4 sm:$0xff]  }
 0x10b   : > { %1099 = vmatpush1.bf16.msra.mxu0 %v9775_v1  ;;  %v9779_v4 = vld [vmem:[#allocation11 + $0x44] ss:$16 sps:$4 sm:$0xff]   ;;  %v9781_v5 = vld [vmem:[#allocation11 + $0x40] ss:$16 sps:$4 sm:$0xff]   ;;  %v9796_v8 = vld [vmem:[#allocation11 + $0x8] ss:$16 sps:$4 sm:$0xff]   ;;  %1184 = vmatprep.subr.bf16.mxu1 %v9793_v7 }
 0x10c   : > { %1100 = vmatprep.subr.bf16.mxu0 %v9776_v2  ;;  %v9782_v6 = vld [vmem:[#allocation11 + $0x64] ss:$16 sps:$4 sm:$0xff]   ;;  %v9784_v9 = vld [vmem:[#allocation11 + $0x60] ss:$16 sps:$4 sm:$0xff]   ;;  %1185 = vmatpush1.bf16.msra.mxu1 %v9796_v8  ;;  %v9799_v11 = vld [vmem:[#allocation11 + $0x2c] ss:$16 sps:$4 sm:$0xff]  }
 0x10d   : > { %v9785_v10 = vld [vmem:[#allocation11 + $0x84] ss:$16 sps:$4 sm:$0xff]   ;;  %v9802_v12 = vld [vmem:[#allocation11 + $0x28] ss:$16 sps:$4 sm:$0xff]   ;;  %1186 = vmatprep.subr.bf16.mxu1 %v9799_v11  ;;  %v9787_v13 = vld [vmem:[#allocation11 + $0x80] ss:$16 sps:$4 sm:$0xff]  }
 0x10e   : > { %v9788_v14 = vld [vmem:[#allocation11 + $0xa4] ss:$16 sps:$4 sm:$0xff]   ;;  %v9805_v15 = vld [vmem:[#allocation11 + $0x4c] ss:$16 sps:$4 sm:$0xff]   ;;  %v9808_v16 = vld [vmem:[#allocation11 + $0x48] ss:$16 sps:$4 sm:$0xff]  }
 0x10f   : > { %1101 = vmatpush1.bf16.msra.mxu0 %v9778_v3  ;;  %v9811_v17 = vld [vmem:[#allocation11 + $0x6c] ss:$16 sps:$4 sm:$0xff]   ;;  %v9790_v18 = vld [vmem:[#allocation11 + $0xa0] ss:$16 sps:$4 sm:$0xff]   ;;  %v9791_v19 = vld [vmem:[#allocation11 + $0xc4] ss:$16 sps:$4 sm:$0xff]  }
 0x110   : > { %1102 = vmatprep.subr.bf16.mxu0 %v9779_v4  ;;  %1187 = vmatpush1.bf16.msra.mxu1 %v9802_v12  ;;  %v9814_v20 = vld [vmem:[#allocation11 + $0x68] ss:$16 sps:$4 sm:$0xff]   ;;  %v9817_v21 = vld [vmem:[#allocation11 + $0x8c] ss:$16 sps:$4 sm:$0xff]   ;;  %v9795_v22 = vld [vmem:[#allocation11 + $0xc0] ss:$16 sps:$4 sm:$0xff]  }
 0x111   : > { %1188 = vmatprep.subr.bf16.mxu1 %v9805_v15  ;;  %v9797_v23 = vld [vmem:[#allocation11 + $0xe4] ss:$16 sps:$4 sm:$0xff]   ;;  %v9820_v24 = vld [vmem:[#allocation11 + $0x88] ss:$16 sps:$4 sm:$0xff]   ;;  %v9823_v25 = vld [vmem:[#allocation11 + $0xac] ss:$16 sps:$4 sm:$0xff]  }
 0x112   : > { %v9801_v26 = vld [vmem:[#allocation11 + $0xe0] ss:$16 sps:$4 sm:$0xff]   ;;  %v9803_v27 = vld [vmem:[#allocation11 + $0x104] ss:$16 sps:$4 sm:$0xff]   ;;  %v9826_v28 = vld [vmem:[#allocation11 + $0xa8] ss:$16 sps:$4 sm:$0xff]  }
 0x113   : > { %1103 = vmatpush1.bf16.msra.mxu0 %v9781_v5  ;;  %v9829_v29 = vld [vmem:[#allocation11 + $0xcc] ss:$16 sps:$4 sm:$0xff]   ;;  %v9807_v30 = vld [vmem:[#allocation11 + $0x100] ss:$16 sps:$4 sm:$0xff]   ;;  %v9809_v31 = vld [vmem:[#allocation11 + $0x124] ss:$16 sps:$4 sm:$0xff]  }
 0x114   : > { %1104 = vmatprep.subr.bf16.mxu0 %v9782_v6  ;;  %1189 = vmatpush1.bf16.msra.mxu1 %v9808_v16  ;;  %v9832_v32 = vld [vmem:[#allocation11 + $0xc8] ss:$16 sps:$4 sm:$0xff]   ;;  %v9835_v33 = vld [vmem:[#allocation11 + $0xec] ss:$16 sps:$4 sm:$0xff]   ;;  %v9813_v34 = vld [vmem:[#allocation11 + $0x120] ss:$16 sps:$4 sm:$0xff]  }
 0x115   : > { %1190 = vmatprep.subr.bf16.mxu1 %v9811_v17  ;;  %v9815_v35 = vld [vmem:[#allocation11 + $0x144] ss:$16 sps:$4 sm:$0xff]   ;;  %v9838_v37 = vld [vmem:[#allocation11 + $0xe8] ss:$16 sps:$4 sm:$0xff]   ;;  %v9841_v38 = vld [vmem:[#allocation11 + $0x10c] ss:$16 sps:$4 sm:$0xff]  }
 0x116   : > { %v9853_v36 = vld [vmem:[%s11856_s26 + $0x4] ss:$12 sps:$4 sm:$0xff]   ;;  %v9851_v63 = vld [vmem:[%s11856_s26] ss:$12 sps:$4 sm:$0xff]   ;;  %v11509_v5 = vmov 0   ;;  %vm11511_vm0 = vmmov 0  }
 0x117   : > { %1105 = vmatpush1.bf16.msra.mxu0 %v9784_v9  ;;  %1130 = vmatprep.mubr.bf16.mxu0 %v9853_v36  ;;  %v9819_v39 = vld [vmem:[#allocation11 + $0x140] ss:$16 sps:$4 sm:$0xff]   ;;  %v9821_v40 = vld [vmem:[#allocation11 + $0x164] ss:$16 sps:$4 sm:$0xff]   ;;  %v9844_v41 = vld [vmem:[#allocation11 + $0x108] ss:$16 sps:$4 sm:$0xff]  }
 0x118   : > { %1106 = vmatprep.subr.bf16.mxu0 %v9785_v10  ;;  %1191 = vmatpush1.bf16.msra.mxu1 %v9814_v20  ;;  %v9847_v42 = vld [vmem:[#allocation11 + $0x12c] ss:$16 sps:$4 sm:$0xff]   ;;  %v9825_v43 = vld [vmem:[#allocation11 + $0x160] ss:$16 sps:$4 sm:$0xff]   ;;  %v9827_v44 = vld [vmem:[#allocation11 + $0x184] ss:$16 sps:$4 sm:$0xff]  }
 0x119   : > { %1192 = vmatprep.subr.bf16.mxu1 %v9817_v21  ;;  %1216 = vmatprep.mubr.bf16.mxu1 %v9853_v36  ;;  %v9850_v45 = vld [vmem:[#allocation11 + $0x128] ss:$16 sps:$4 sm:$0xff]   ;;  %v9857_v46 = vld [vmem:[#allocation11 + $0x14c] ss:$16 sps:$4 sm:$0xff]   ;;  %v9831_v47 = vld [vmem:[#allocation11 + $0x180] ss:$16 sps:$4 sm:$0xff]  }
 0x11a   : > { %v9833_v48 = vld [vmem:[#allocation11 + $0x1a4] ss:$16 sps:$4 sm:$0xff]   ;;  %v9859_v49 = vld [vmem:[#allocation11 + $0x148] ss:$16 sps:$4 sm:$0xff]   ;;  %v9863_v50 = vld [vmem:[#allocation11 + $0x16c] ss:$16 sps:$4 sm:$0xff]  }
 0x11b   : > { %1107 = vmatpush1.bf16.msra.mxu0 %v9787_v13  ;;  %v9837_v51 = vld [vmem:[#allocation11 + $0x1a0] ss:$16 sps:$4 sm:$0xff]   ;;  %v9839_v52 = vld [vmem:[#allocation11 + $0x1c4] ss:$16 sps:$4 sm:$0xff]   ;;  %v9865_v53 = vld [vmem:[#allocation11 + $0x168] ss:$16 sps:$4 sm:$0xff]  }
 0x11c   : > { %1108 = vmatprep.subr.bf16.mxu0 %v9788_v14  ;;  %1193 = vmatpush1.bf16.msra.mxu1 %v9820_v24  ;;  %v9869_v54 = vld [vmem:[#allocation11 + $0x18c] ss:$16 sps:$4 sm:$0xff]   ;;  %v9843_v55 = vld [vmem:[#allocation11 + $0x1c0] ss:$16 sps:$4 sm:$0xff]   ;;  %v9845_v56 = vld [vmem:[#allocation11 + $0x1e4] ss:$16 sps:$4 sm:$0xff]  }
 0x11d   : > { %1194 = vmatprep.subr.bf16.mxu1 %v9823_v25  ;;  %v9871_v57 = vld [vmem:[#allocation11 + $0x188] ss:$16 sps:$4 sm:$0xff]   ;;  %v9875_v58 = vld [vmem:[#allocation11 + $0x1ac] ss:$16 sps:$4 sm:$0xff]   ;;  %v9849_v59 = vld [vmem:[#allocation11 + $0x1e0] ss:$16 sps:$4 sm:$0xff]  }
 0x11e   : > { %v9856_v60 = vld [vmem:[#allocation11 + $0x204] ss:$16 sps:$4 sm:$0xff]   ;;  %v9877_v61 = vld [vmem:[#allocation11 + $0x1a8] ss:$16 sps:$4 sm:$0xff]   ;;  %v9881_v62 = vld [vmem:[#allocation11 + $0x1cc] ss:$16 sps:$4 sm:$0xff]  }
 0x11f   : > { %1109 = vmatpush1.bf16.msra.mxu0 %v9790_v18  ;;  %v9854_v0 = vld [vmem:[#allocation11 + $0x200] ss:$16 sps:$4 sm:$0xff]   ;;  %v9862_v1 = vld [vmem:[#allocation11 + $0x224] ss:$16 sps:$4 sm:$0xff]   ;;  %v9883_v2 = vld [vmem:[#allocation11 + $0x1c8] ss:$16 sps:$4 sm:$0xff]  }
 0x120   : > { %1110 = vmatprep.subr.bf16.mxu0 %v9791_v19  ;;  %1195 = vmatpush1.bf16.msra.mxu1 %v9826_v28  ;;  %v9887_v3 = vld [vmem:[#allocation11 + $0x1ec] ss:$16 sps:$4 sm:$0xff]   ;;  %v9860_v4 = vld [vmem:[#allocation11 + $0x220] ss:$16 sps:$4 sm:$0xff]   ;;  %v9868_v6 = vld [vmem:[#allocation11 + $0x244] ss:$16 sps:$4 sm:$0xff]  }
 0x121   : > { %1196 = vmatprep.subr.bf16.mxu1 %v9829_v29  ;;  %v9889_v7 = vld [vmem:[#allocation11 + $0x1e8] ss:$16 sps:$4 sm:$0xff]   ;;  %v9895_v8 = vld [vmem:[#allocation11 + $0x20c] ss:$16 sps:$4 sm:$0xff]   ;;  %v9866_v9 = vld [vmem:[#allocation11 + $0x240] ss:$16 sps:$4 sm:$0xff]  }
 0x122   : > { %v9874_v10 = vld [vmem:[#allocation11 + $0x264] ss:$16 sps:$4 sm:$0xff]   ;;  %v9893_v11 = vld [vmem:[#allocation11 + $0x208] ss:$16 sps:$4 sm:$0xff]   ;;  %v9901_v12 = vld [vmem:[#allocation11 + $0x22c] ss:$16 sps:$4 sm:$0xff]  }
 0x123   : > { %1111 = vmatpush1.bf16.msra.mxu0 %v9795_v22  ;;  %v9872_v13 = vld [vmem:[#allocation11 + $0x260] ss:$16 sps:$4 sm:$0xff]   ;;  %v9880_v14 = vld [vmem:[#allocation11 + $0x284] ss:$16 sps:$4 sm:$0xff]   ;;  %v9899_v15 = vld [vmem:[#allocation11 + $0x228] ss:$16 sps:$4 sm:$0xff]  }
 0x124   : > { %1112 = vmatprep.subr.bf16.mxu0 %v9797_v23  ;;  %1197 = vmatpush1.bf16.msra.mxu1 %v9832_v32  ;;  %v9905_v16 = vld [vmem:[#allocation11 + $0x24c] ss:$16 sps:$4 sm:$0xff]   ;;  %v9878_v17 = vld [vmem:[#allocation11 + $0x280] ss:$16 sps:$4 sm:$0xff]   ;;  %v9886_v18 = vld [vmem:[#allocation11 + $0x2a4] ss:$16 sps:$4 sm:$0xff]  }
 0x125   : > { %1198 = vmatprep.subr.bf16.mxu1 %v9835_v33  ;;  %v9903_v19 = vld [vmem:[#allocation11 + $0x248] ss:$16 sps:$4 sm:$0xff]   ;;  %v9908_v20 = vld [vmem:[#allocation11 + $0x26c] ss:$16 sps:$4 sm:$0xff]   ;;  %v9884_v21 = vld [vmem:[#allocation11 + $0x2a0] ss:$16 sps:$4 sm:$0xff]  }
 0x126   : > { %v9892_v22 = vld [vmem:[#allocation11 + $0x2c4] ss:$16 sps:$4 sm:$0xff]   ;;  %v9906_v23 = vld [vmem:[#allocation11 + $0x268] ss:$16 sps:$4 sm:$0xff]   ;;  %v9911_v24 = vld [vmem:[#allocation11 + $0x28c] ss:$16 sps:$4 sm:$0xff]  }
 0x127   : > { %1113 = vmatpush1.bf16.msra.mxu0 %v9801_v26  ;;  %v9890_v25 = vld [vmem:[#allocation11 + $0x2c0] ss:$16 sps:$4 sm:$0xff]   ;;  %v9898_v26 = vld [vmem:[#allocation11 + $0x2e4] ss:$16 sps:$4 sm:$0xff]   ;;  %v9914_v28 = vld [vmem:[#allocation11 + $0x2ac] ss:$16 sps:$4 sm:$0xff]  }
 0x128   : > { %1114 = vmatprep.subr.bf16.mxu0 %v9803_v27  ;;  %1199 = vmatpush1.bf16.msra.mxu1 %v9838_v37  ;;  %v9909_v27 = vld [vmem:[#allocation11 + $0x288] ss:$16 sps:$4 sm:$0xff]   ;;  %v9896_v29 = vld [vmem:[#allocation11 + $0x2e0] ss:$16 sps:$4 sm:$0xff]   ;;  %v9917_v32 = vld [vmem:[#allocation11 + $0x2cc] ss:$16 sps:$4 sm:$0xff]  }
 0x129   : > { %1200 = vmatprep.subr.bf16.mxu1 %v9841_v38  ;;  %v9902_v33 = vld [vmem:[%s11856_s26 + $0x8] ss:$12 sps:$4 sm:$0xff]   ;;  %vm4217_vm1 = vcmask 523264   ;;  %s11512_s16 = smov 64   ;;  %vm4265_vm2 = vcmask 130048   ;;  %s8521_s14 = sshll.u32 %s11852_s17, 4 }
 0x12a   : > { %v9929_v36 = vld [vmem:[#allocation12 + $0x64] ss:$48 sps:$4 sm:$0xff]   ;;  %v9920_v37 = vld [vmem:[#allocation11 + $0x2ec] ss:$16 sps:$4 sm:$0xff]   ;;  %v9927_v38 = vld [vmem:[#allocation12 + $0x60] ss:$48 sps:$4 sm:$0xff]  }
 0x12b   : > { %1115 = vmatpush1.bf16.msra.mxu0 %v9807_v30  ;;  %v9912_v30 = vld [vmem:[#allocation11 + $0x2a8] ss:$16 sps:$4 sm:$0xff]   ;;  %s9414_s9 = sshll.u32 %s11587_s15, 8  ;;  %s460_s25 = scalar_lea.vmem [#allocation21], %s8521_s14 }
 0x12c   : > { %1116 = vmatprep.subr.bf16.mxu0 %v9809_v31  ;;  %1201 = vmatpush1.bf16.msra.mxu1 %v9844_v41  ;;  %v9923_v31 = vld [vmem:[#allocation12 + $0x4] ss:$48 sps:$4 sm:$0xff]   ;;  %v9926_v41 = vld [vmem:[#allocation12 + $0xc] ss:$48 sps:$4 sm:$0xff]   ;;  %s8354_s13 = sshll.u32 %s460_s25, 4  ;;  %s12461_s18 = sld [smem:[#allocation30_spill]]  ;;  %s12381_s13 = int_to_ptr.vmem [resolvable:$true] %s8354_s13 }
 0x12d   : > { %1202 = vmatprep.subr.bf16.mxu1 %v9847_v42  ;;  %v9924_v42 = vld [vmem:[#allocation12 + $0x8] ss:$48 sps:$4 sm:$0xff]   ;;  %s8340_s27 = scalar_lea.sflag [#allocation8], %s11852_s17  ;;  %s11410_s29 = scalar_lea.vmem %s12381_s13, 256 }
 0x12e   : > { %p11411_p5 = scmp.ne.s32.totalorder %s12381_s13, %s11410_s29  ;;  %p12462_p7 = scmp.ne.s32.totalorder %s12447_s24, 0 }
 0x12f   : > { %1117 = vmatpush1.bf16.msra.mxu0 %v9813_v34  ;;  %v9921_v34 = vld [vmem:[#allocation12] ss:$48 sps:$4 sm:$0xff]   ;;  %s11515_s15 = smov [#allocation21]  }
 0x130   : > { %1118 = vmatprep.subr.bf16.mxu0 %v9815_v35  ;;  %1203 = vmatpush1.bf16.msra.mxu1 %v9850_v45  ;;  %v9915_v35 = vld [vmem:[#allocation11 + $0x2c8] ss:$16 sps:$4 sm:$0xff]   ;;  %v9941_v45 = vld [vmem:[#allocation12 + $0x124] ss:$48 sps:$4 sm:$0xff]   ;;  %p11412_p4 = pnand %p11411_p5, %p12462_p7  ;;  %s11414_s22 = sshll.u32 %s11515_s15, 4  ;;  %s11415_s22 = int_to_ptr.vmem [resolvable:$false] %s11414_s22 }
 0x131   : > { %1204 = vmatprep.subr.bf16.mxu1 %v9857_v46  ;;  %v9939_v46 = vld [vmem:[#allocation12 + $0x120] ss:$48 sps:$4 sm:$0xff]   ;;  %s11416_s23 = scalar_lea.vmem %s11415_s22, 512  ;;  %p11417_p3 = scmp.lt.s32.totalorder %s12381_s13, %s11415_s22 }
 0x132   : > { %s12379_s28 = scalar_lea.hbm %s12461_s18, %s9414_s9  ;;  %p11413_p1 = pneg %p11412_p4 }
 0x133   : > { %1119 = vmatpush1.bf16.msra.mxu0 %v9819_v39  ;;  %v9918_v39 = vld [vmem:[#allocation11 + $0x2e8] ss:$16 sps:$4 sm:$0xff]   ;;  %p11418_p8 = scmp.lt.s32.totalorder %s11416_s23, %s11410_s29 }
 0x134   : > { %1120 = vmatprep.subr.bf16.mxu0 %v9821_v40  ;;  %1205 = vmatpush1.bf16.msra.mxu1 %v9859_v49  ;;  %v9935_v40 = vld [vmem:[#allocation12 + $0xc4] ss:$48 sps:$4 sm:$0xff]   ;;  %v9938_v49 = vld [vmem:[#allocation12 + $0xcc] ss:$48 sps:$4 sm:$0xff]  }
 0x135   : > { %1206 = vmatprep.subr.bf16.mxu1 %v9863_v50  ;;  %v9945_v50 = vld [vmem:[#allocation12 + $0x180] ss:$48 sps:$4 sm:$0xff]   ;;  %p11419_p13 = por %p11418_p8, %p11417_p3 }
 0x137   : > { %1121 = vmatpush1.bf16.msra.mxu0 %v9825_v43  ;;  %v9932_v43 = vld [vmem:[#allocation12 + $0x6c] ss:$48 sps:$4 sm:$0xff]   ;;  %p11420_p0 = pnand %p11419_p13, %p11413_p1 }
 0x138   : > { %1122 = vmatprep.subr.bf16.mxu0 %v9827_v44  ;;  %1207 = vmatpush1.bf16.msra.mxu1 %v9865_v53  ;;  %v9933_v44 = vld [vmem:[#allocation12 + $0xc0] ss:$48 sps:$4 sm:$0xff]   ;;  %v9944_v53 = vld [vmem:[#allocation12 + $0x12c] ss:$48 sps:$4 sm:$0xff]  }
 0x139   : > { %1208 = vmatprep.subr.bf16.mxu1 %v9869_v54  ;;  %v9951_v54 = vld [vmem:[#allocation12 + $0x1e0] ss:$48 sps:$4 sm:$0xff]  }
 0x13b   : > { %1123 = vmatpush1.bf16.msra.mxu0 %v9831_v47  ;;  %v9930_v47 = vld [vmem:[#allocation12 + $0x68] ss:$48 sps:$4 sm:$0xff]  }
 0x13c   : > { %1124 = vmatprep.subr.bf16.mxu0 %v9833_v48  ;;  %1209 = vmatpush1.bf16.msra.mxu1 %v9871_v57  ;;  %v9947_v48 = vld [vmem:[#allocation12 + $0x184] ss:$48 sps:$4 sm:$0xff]   ;;  %v9950_v57 = vld [vmem:[#allocation12 + $0x18c] ss:$48 sps:$4 sm:$0xff]  }
 0x13d   : > { %1210 = vmatprep.subr.bf16.mxu1 %v9875_v58  ;;  %v9957_v58 = vld [vmem:[#allocation12 + $0x240] ss:$48 sps:$4 sm:$0xff]  }
 0x13f   : > { %1125 = vmatpush1.bf16.msra.mxu0 %v9837_v51  ;;  %v9936_v51 = vld [vmem:[#allocation12 + $0xc8] ss:$48 sps:$4 sm:$0xff]  }
 0x140   : > { %1126 = vmatprep.subr.bf16.mxu0 %v9839_v52  ;;  %1211 = vmatpush1.bf16.msra.mxu1 %v9877_v61  ;;  %v9953_v52 = vld [vmem:[#allocation12 + $0x1e4] ss:$48 sps:$4 sm:$0xff]   ;;  %v9956_v61 = vld [vmem:[#allocation12 + $0x1ec] ss:$48 sps:$4 sm:$0xff]  }
 0x141   : > { %1212 = vmatprep.subr.bf16.mxu1 %v9881_v62  ;;  %v9963_v62 = vld [vmem:[#allocation12 + $0x2a0] ss:$48 sps:$4 sm:$0xff]  }
 0x143   : > { %1127 = vmatpush1.bf16.msra.mxu0 %v9843_v55  ;;  %v9942_v55 = vld [vmem:[#allocation12 + $0x128] ss:$48 sps:$4 sm:$0xff]  }
 0x144   : > { %1128 = vmatprep.subr.bf16.mxu0 %v9845_v56  ;;  %1213 = vmatpush1.bf16.msra.mxu1 %v9883_v2  ;;  %v9959_v56 = vld [vmem:[#allocation12 + $0x244] ss:$48 sps:$4 sm:$0xff]   ;;  %v9969_v2 = vld [vmem:[#allocation12 + $0x300] ss:$48 sps:$4 sm:$0xff]  }
 0x145   : > { %1214 = vmatprep.subr.bf16.mxu1 %v9887_v3  ;;  %v9960_v3 = vld [vmem:[#allocation12 + $0x248] ss:$48 sps:$4 sm:$0xff]  }
 0x147   : > { %1129 = vmatpush1.bf16.msra.mxu0 %v9849_v59  ;;  %v9948_v59 = vld [vmem:[#allocation12 + $0x188] ss:$48 sps:$4 sm:$0xff]  }
 0x148   : > { %1141 = vmatprep.subr.bf16.mxu0 %v9856_v60  ;;  %1215 = vmatpush1.bf16.msra.mxu1 %v9889_v7  ;;  %v9965_v60 = vld [vmem:[#allocation12 + $0x2a4] ss:$48 sps:$4 sm:$0xff]   ;;  %v9966_v7 = vld [vmem:[#allocation12 + $0x2a8] ss:$48 sps:$4 sm:$0xff]  }
 0x149   : > { %1227 = vmatprep.subr.bf16.mxu1 %v9895_v8  ;;  %v9983_v8 = vld [vmem:[#allocation12 + $0x3c4] ss:$48 sps:$4 sm:$0xff]  }
 0x14a   : > { %1131 = vmatmul.mubr.bf16.vlgmr.msra.gmra.mrb[0].mxu0 %v9851_v63 }
 0x14b   : > { %1142 = vmatpush1.bf16.msra.mxu0 %v9854_v0  ;;  %1173 = vmatprep.mubr.bf16.mxu0 %v11509_v5  ;;  %v9971_v0 = vld [vmem:[#allocation12 + $0x304] ss:$48 sps:$4 sm:$0xff]  }
 0x14c   : > { %1143 = vmatprep.subr.bf16.mxu0 %v9862_v1  ;;  %1217 = vmatmul.mubr.bf16.vlgmr.msra.gmra.mrb[0].mxu1 %v9851_v63  ;;  %v9954_v63 = vld [vmem:[#allocation12 + $0x1e8] ss:$48 sps:$4 sm:$0xff]   ;;  %v9962_v1 = vld [vmem:[#allocation12 + $0x24c] ss:$48 sps:$4 sm:$0xff]  }
 0x14d   : > { %1228 = vmatpush1.bf16.msra.mxu1 %v9893_v11  ;;  %1259 = vmatprep.mubr.bf16.mxu1 %v11509_v5  ;;  %v9968_v5 = vld [vmem:[#allocation12 + $0x2ac] ss:$48 sps:$4 sm:$0xff]   ;;  %v9972_v11 = vld [vmem:[#allocation12 + $0x308] ss:$48 sps:$4 sm:$0xff]  }
 0x14e   : > { %1229 = vmatprep.subr.bf16.mxu1 %v9901_v12  ;;  %v9989_v12 = vld [vmem:[#allocation12 + $0x424] ss:$48 sps:$4 sm:$0xff]  }
 0x14f   : > { %1144 = vmatpush1.bf16.msra.mxu0 %v9860_v4  ;;  %v9977_v4 = vld [vmem:[#allocation12 + $0x364] ss:$48 sps:$4 sm:$0xff]  }
 0x150   : > { %1145 = vmatprep.subr.bf16.mxu0 %v9868_v6  ;;  %v9975_v6 = vld [vmem:[#allocation12 + $0x360] ss:$48 sps:$4 sm:$0xff]  }
 0x151   : > { %1230 = vmatpush1.bf16.msra.mxu1 %v9899_v15  ;;  %v9978_v15 = vld [vmem:[#allocation12 + $0x368] ss:$48 sps:$4 sm:$0xff]  }
 0x152   : > { %1231 = vmatprep.subr.bf16.mxu1 %v9905_v16  ;;  %v9995_v16 = vld [vmem:[#allocation12 + $0x484] ss:$48 sps:$4 sm:$0xff]  }
 0x153   : > { %1146 = vmatpush1.bf16.msra.mxu0 %v9866_v9  ;;  %v9974_v9 = vld [vmem:[#allocation12 + $0x30c] ss:$48 sps:$4 sm:$0xff]  }
 0x154   : > { %1147 = vmatprep.subr.bf16.mxu0 %v9874_v10  ;;  %v9981_v10 = vld [vmem:[#allocation12 + $0x3c0] ss:$48 sps:$4 sm:$0xff]  }
 0x155   : > { %1232 = vmatpush1.bf16.msra.mxu1 %v9903_v19  ;;  %v9984_v19 = vld [vmem:[#allocation12 + $0x3c8] ss:$48 sps:$4 sm:$0xff]  }
 0x156   : > { %1233 = vmatprep.subr.bf16.mxu1 %v9908_v20  ;;  %v10001_v20 = vld [vmem:[#allocation12 + $0x4e4] ss:$48 sps:$4 sm:$0xff]  }
 0x157   : > { %1148 = vmatpush1.bf16.msra.mxu0 %v9872_v13  ;;  %v9980_v13 = vld [vmem:[#allocation12 + $0x36c] ss:$48 sps:$4 sm:$0xff]  }
 0x158   : > { %1149 = vmatprep.subr.bf16.mxu0 %v9880_v14  ;;  %v9987_v14 = vld [vmem:[#allocation12 + $0x420] ss:$48 sps:$4 sm:$0xff]  }
 0x159   : > { %1234 = vmatpush1.bf16.msra.mxu1 %v9906_v23  ;;  %v9990_v23 = vld [vmem:[#allocation12 + $0x428] ss:$48 sps:$4 sm:$0xff]  }
 0x15a   : > { %1235 = vmatprep.subr.bf16.mxu1 %v9911_v24  ;;  %v9998_v24 = vld [vmem:[#allocation12 + $0x48c] ss:$48 sps:$4 sm:$0xff]  }
 0x15b   : > { %1150 = vmatpush1.bf16.msra.mxu0 %v9878_v17  ;;  %v9986_v17 = vld [vmem:[#allocation12 + $0x3cc] ss:$48 sps:$4 sm:$0xff]  }
 0x15c   : > { %1151 = vmatprep.subr.bf16.mxu0 %v9886_v18  ;;  %v9993_v18 = vld [vmem:[#allocation12 + $0x480] ss:$48 sps:$4 sm:$0xff]  }
 0x15d   : > { %1236 = vmatpush1.bf16.msra.mxu1 %v9909_v27  ;;  %v10002_v27 = vld [vmem:[#allocation12 + $0x4e8] ss:$48 sps:$4 sm:$0xff]  }
 0x15e   : > { %1237 = vmatprep.subr.bf16.mxu1 %v9914_v28  ;;  %v10007_v28 = vld [vmem:[#allocation12 + $0x544] ss:$48 sps:$4 sm:$0xff]  }
 0x15f   : > { %1152 = vmatpush1.bf16.msra.mxu0 %v9884_v21  ;;  %v9992_v21 = vld [vmem:[#allocation12 + $0x42c] ss:$48 sps:$4 sm:$0xff]  }
 0x160   : > { %1153 = vmatprep.subr.bf16.mxu0 %v9892_v22  ;;  %v9999_v22 = vld [vmem:[#allocation12 + $0x4e0] ss:$48 sps:$4 sm:$0xff]  }
 0x161   : > { %1238 = vmatpush1.bf16.msra.mxu1 %v9912_v30  ;;  %v10005_v30 = vld [vmem:[#allocation12 + $0x540] ss:$48 sps:$4 sm:$0xff]  }
 0x162   : > { %1239 = vmatprep.subr.bf16.mxu1 %v9917_v32  ;;  %v10013_v32 = vld [vmem:[#allocation12 + $0x5a4] ss:$48 sps:$4 sm:$0xff]  }
 0x163   : > { %1154 = vmatpush1.bf16.msra.mxu0 %v9890_v25  ;;  %v9996_v25 = vld [vmem:[#allocation12 + $0x488] ss:$48 sps:$4 sm:$0xff]  }
 0x164   : > { %1155 = vmatprep.subr.bf16.mxu0 %v9898_v26  ;;  %v10004_v26 = vld [vmem:[#allocation12 + $0x4ec] ss:$48 sps:$4 sm:$0xff]  }
 0x165   : > { %1240 = vmatpush1.bf16.msra.mxu1 %v9915_v35  ;;  %v10014_v35 = vld [vmem:[#allocation12 + $0x5a8] ss:$48 sps:$4 sm:$0xff]  }
 0x166   : > { %1241 = vmatprep.subr.bf16.mxu1 %v9920_v37  ;;  %v10022_v37 = vld [vmem:[#allocation12 + $0x60c] ss:$48 sps:$4 sm:$0xff]  }
 0x167   : > { %1156 = vmatpush1.bf16.msra.mxu0 %v9896_v29  ;;  %v10010_v29 = vld [vmem:[#allocation12 + $0x54c] ss:$48 sps:$4 sm:$0xff]  }
 0x168   : > { %3675 = vmatprep.subr.bf16.mxu0 %v9923_v31  ;;  %v10008_v31 = vld [vmem:[#allocation12 + $0x548] ss:$48 sps:$4 sm:$0xff]  }
 0x169   : > { %1242 = vmatpush1.bf16.msra.mxu1 %v9918_v39 }
 0x16a   : > { %1174 = vmatmul.mubr.bf16.vlgmr.msra.gmra.mrb[0].mxu0 %v9902_v33  ;;  %3761 = vmatprep.subr.bf16.mxu1 %v9926_v41  ;;  %v462_v41 = vld [vmem:[#allocation20] sm:$0xff] }
 0x16b   : > { %3676 = vmatpush1.bf16.msra.mxu0 %v9921_v34  ;;  %v10011_v34 = vld [vmem:[#allocation12 + $0x5a0] ss:$48 sps:$4 sm:$0xff]  }
 0x16c   : > { %3677 = vmatprep.subr.bf16.mxu0 %v9929_v36  ;;  %1260 = vmatmul.mubr.bf16.vlgmr.msra.gmra.mrb[0].mxu1 %v9902_v33  ;;  %v10016_v33 = vld [vmem:[#allocation12 + $0x5ac] ss:$48 sps:$4 sm:$0xff]   ;;  %v10019_v36 = vld [vmem:[#allocation12 + $0x604] ss:$48 sps:$4 sm:$0xff]  }
 0x16d   : > { %3762 = vmatpush1.bf16.msra.mxu1 %v9924_v42 }
 0x16e   : > { %3763 = vmatprep.subr.bf16.mxu1 %v9932_v43 }
 0x16f   : > { %3678 = vmatpush1.bf16.msra.mxu0 %v9927_v38  ;;  %v566_v38 = vlaneseq }
 0x170   : > { %3679 = vmatprep.subr.bf16.mxu0 %v9935_v40 }
 0x171   : > { %3764 = vmatpush1.bf16.msra.mxu1 %v9930_v47  ;;  %v11882_v39 = vshrl.u32 %v566_v38, 7  ;;  %vm12267_vm3 = vcmp.lt.s32.totalorder %v566_v38, 64  ;;  %vm4502_vm4 = vcmp.ge.s32.totalorder %v566_v38, 64  ;;  %vm4503_vm5 = vcmp.lt.s32.totalorder %v566_v38, 128 }
 0x172   : > { %3765 = vmatprep.subr.bf16.mxu1 %v9938_v49  ;;  %vm4504_vm6 = vmand %vm4502_vm4, %vm4503_vm5 }
 0x173   : > { %3680 = vmatpush1.bf16.msra.mxu0 %v9933_v44  ;;  %v11885_v40 = vsub.s32 0, %v11882_v39  ;;  %v11888_v42 = vsub.s32 4, %v11882_v39 }
 0x174   : > { %3681 = vmatprep.subr.bf16.mxu0 %v9941_v45 }
 0x175   : > { %3766 = vmatpush1.bf16.msra.mxu1 %v9936_v51  ;;  %v569_v43 = vrot.slane %v462_v41, %v11885_v40  ;;  %v573_v44 = vrot.slane %v462_v41, %v11888_v42  ;;  %v10061_v41 = vld [vmem:[#allocation12 + $0x8a4] ss:$48 sps:$4 sm:$0xff]  }
 0x176   : > { %3767 = vmatprep.subr.bf16.mxu1 %v9944_v53 }
 0x177   : > { %3682 = vmatpush1.bf16.msra.mxu0 %v9939_v46  ;;  %v589_v45 = vrot.slane %v569_v43, %v11885_v40  ;;  %v463_v46 = vld [vmem:[#allocation20 + $0x8] sm:$0xff]  ;;  %v10064_v43 = vld [vmem:[#allocation12 + $0x8ac] ss:$48 sps:$4 sm:$0xff]  }
 0x178   : > { %3683 = vmatprep.subr.bf16.mxu0 %v9947_v48  ;;  %v593_v48 = vrot.slane %v573_v44, %v11885_v40  ;;  %v577_v51 = vrot.slane %v463_v46, %v11885_v40  ;;  %v10059_v44 = vld [vmem:[#allocation12 + $0x8a0] ss:$48 sps:$4 sm:$0xff]  }
 0x179   : > { %3768 = vmatpush1.bf16.msra.mxu1 %v9942_v55  ;;  %v581_v55 = vrot.slane %v463_v46, %v11888_v42  ;;  %v10067_v46 = vld [vmem:[#allocation12 + $0x904] ss:$48 sps:$4 sm:$0xff]  }
 0x17a   : > { %3769 = vmatprep.subr.bf16.mxu1 %v9950_v57 }
 0x17b   : > { %3684 = vmatpush1.bf16.msra.mxu0 %v9945_v50 }
 0x17c   : > { %3685 = vmatprep.subr.bf16.mxu0 %v9953_v52 }
 0x17d   : > { %3770 = vmatpush1.bf16.msra.mxu1 %v9948_v59  ;;  %v10020_v59 = vld [vmem:[#allocation12 + $0x608] ss:$48 sps:$4 sm:$0xff]  }
 0x17e   : > { %3771 = vmatprep.subr.bf16.mxu1 %v9956_v61 }
 0x17f   : > { %3686 = vmatpush1.bf16.msra.mxu0 %v9951_v54 }
 0x180   : > { %3687 = vmatprep.subr.bf16.mxu0 %v9959_v56 }
 0x181   : > { %3772 = vmatpush1.bf16.msra.mxu1 %v9954_v63  ;;  %v10028_v63 = vld [vmem:[#allocation12 + $0x66c] ss:$48 sps:$4 sm:$0xff]  }
 0x182   : > { %3773 = vmatprep.subr.bf16.mxu1 %v9962_v1 }
 0x183   : > { %3688 = vmatpush1.bf16.msra.mxu0 %v9957_v58  ;;  %v10017_v58 = vld [vmem:[#allocation12 + $0x600] ss:$48 sps:$4 sm:$0xff]  }
 0x184   : > { %3689 = vmatprep.subr.bf16.mxu0 %v9965_v60 }
 0x185   : > { %3774 = vmatpush1.bf16.msra.mxu1 %v9960_v3  ;;  %v601_v3 = vrot.slane %v581_v55, %v11885_v40  ;;  %v10082_v55 = vld [vmem:[#allocation12 + $0x9cc] ss:$48 sps:$4 sm:$0xff]  }
 0x186   : > { %3775 = vmatprep.subr.bf16.mxu1 %v9968_v5  ;;  %v10026_v5 = vld [vmem:[#allocation12 + $0x668] ss:$48 sps:$4 sm:$0xff]  }
 0x187   : > { %3690 = vmatpush1.bf16.msra.mxu0 %v9963_v62  ;;  %v10025_v62 = vld [vmem:[#allocation12 + $0x664] ss:$48 sps:$4 sm:$0xff]  }
 0x188   : > { %3691 = vmatprep.subr.bf16.mxu0 %v9971_v0 }
 0x189   : > { %3776 = vmatpush1.bf16.msra.mxu1 %v9966_v7  ;;  %v10034_v7 = vld [vmem:[#allocation12 + $0x6cc] ss:$48 sps:$4 sm:$0xff]  }
 0x18a   : > { %3777 = vmatprep.subr.bf16.mxu1 %v9974_v9 }
 0x18b   : > { %3692 = vmatpush1.bf16.msra.mxu0 %v9969_v2  ;;  %v597_v2 = vrot.slane %v577_v51, %v11885_v40  ;;  %v10076_v51 = vld [vmem:[#allocation12 + $0x96c] ss:$48 sps:$4 sm:$0xff]  }
 0x18c   : > { %3693 = vmatprep.subr.bf16.mxu0 %v9977_v4  ;;  %v10023_v4 = vld [vmem:[#allocation12 + $0x660] ss:$48 sps:$4 sm:$0xff]  }
 0x18d   : > { %3778 = vmatpush1.bf16.msra.mxu1 %v9972_v11 }
 0x18e   : > { %3779 = vmatprep.subr.bf16.mxu1 %v9980_v13 }
 0x18f   : > { %3694 = vmatpush1.bf16.msra.mxu0 %v9975_v6  ;;  %v10031_v6 = vld [vmem:[#allocation12 + $0x6c4] ss:$48 sps:$4 sm:$0xff]  }
 0x190   : > { %3695 = vmatprep.subr.bf16.mxu0 %v9983_v8 }
 0x191   : > { %3780 = vmatpush1.bf16.msra.mxu1 %v9978_v15  ;;  %v10029_v15 = vld [vmem:[#allocation12 + $0x6c0] ss:$48 sps:$4 sm:$0xff]  }
 0x192   : > { %3781 = vmatprep.subr.bf16.mxu1 %v9986_v17 }
 0x193   : > { %3696 = vmatpush1.bf16.msra.mxu0 %v9981_v10 }
 0x194   : > { %3697 = vmatprep.subr.bf16.mxu0 %v9989_v12 }
 0x195   : > { %3782 = vmatpush1.bf16.msra.mxu1 %v9984_v19 }
 0x196   : > { %3783 = vmatprep.subr.bf16.mxu1 %v9992_v21  ;;  %v10040_v21 = vld [vmem:[#allocation12 + $0x72c] ss:$48 sps:$4 sm:$0xff]  }
 0x197   : > { %3698 = vmatpush1.bf16.msra.mxu0 %v9987_v14 }
 0x198   : > { %3699 = vmatprep.subr.bf16.mxu0 %v9995_v16  ;;  %v10032_v16 = vld [vmem:[#allocation12 + $0x6c8] ss:$48 sps:$4 sm:$0xff]  }
 0x199   : > { %3784 = vmatpush1.bf16.msra.mxu1 %v9990_v23 }
 0x19a   : > { %3785 = vmatprep.subr.bf16.mxu1 %v9998_v24  ;;  %v10035_v24 = vld [vmem:[#allocation12 + $0x720] ss:$48 sps:$4 sm:$0xff]  }
 0x19b   : > { %3700 = vmatpush1.bf16.msra.mxu0 %v9993_v18 }
 0x19c   : > { %3701 = vmatprep.subr.bf16.mxu0 %v10001_v20  ;;  %v10037_v20 = vld [vmem:[#allocation12 + $0x724] ss:$48 sps:$4 sm:$0xff]  }
 0x19d   : > { %3786 = vmatpush1.bf16.msra.mxu1 %v9996_v25  ;;  %v10038_v25 = vld [vmem:[#allocation12 + $0x728] ss:$48 sps:$4 sm:$0xff]  }
 0x19e   : > { %3787 = vmatprep.subr.bf16.mxu1 %v10004_v26  ;;  %v10043_v26 = vld [vmem:[#allocation12 + $0x784] ss:$48 sps:$4 sm:$0xff]  }
 0x19f   : > { %3702 = vmatpush1.bf16.msra.mxu0 %v9999_v22 }
 0x1a0   : > { %3703 = vmatprep.subr.bf16.mxu0 %v10007_v28  ;;  %v10041_v28 = vld [vmem:[#allocation12 + $0x780] ss:$48 sps:$4 sm:$0xff]  }
 0x1a1   : > { %3788 = vmatpush1.bf16.msra.mxu1 %v10002_v27  ;;  %v10046_v27 = vld [vmem:[#allocation12 + $0x78c] ss:$48 sps:$4 sm:$0xff]  }
 0x1a2   : > { %3789 = vmatprep.subr.bf16.mxu1 %v10010_v29  ;;  %v10044_v29 = vld [vmem:[#allocation12 + $0x788] ss:$48 sps:$4 sm:$0xff]  }
 0x1a3   : > { %3704 = vmatpush1.bf16.msra.mxu0 %v10005_v30  ;;  %v10049_v30 = vld [vmem:[#allocation12 + $0x7e4] ss:$48 sps:$4 sm:$0xff]  }
 0x1a4   : > { %3705 = vmatprep.subr.bf16.mxu0 %v10013_v32  ;;  %v10047_v32 = vld [vmem:[#allocation12 + $0x7e0] ss:$48 sps:$4 sm:$0xff]  }
 0x1a5   : > { %3790 = vmatpush1.bf16.msra.mxu1 %v10008_v31  ;;  %v10052_v31 = vld [vmem:[#allocation12 + $0x7ec] ss:$48 sps:$4 sm:$0xff]  }
 0x1a6   : > { %3791 = vmatprep.subr.bf16.mxu1 %v10016_v33  ;;  %v10050_v33 = vld [vmem:[#allocation12 + $0x7e8] ss:$48 sps:$4 sm:$0xff]  }
 0x1a7   : > { %3706 = vmatpush1.bf16.msra.mxu0 %v10011_v34  ;;  %v10055_v34 = vld [vmem:[#allocation12 + $0x844] ss:$48 sps:$4 sm:$0xff]  }
 0x1a8   : > { %3718 = vmatprep.subr.bf16.mxu0 %v10019_v36  ;;  %v10053_v36 = vld [vmem:[#allocation12 + $0x840] ss:$48 sps:$4 sm:$0xff]  }
 0x1a9   : > { %3792 = vmatpush1.bf16.msra.mxu1 %v10014_v35  ;;  %v10058_v35 = vld [vmem:[#allocation12 + $0x84c] ss:$48 sps:$4 sm:$0xff]  }
 0x1aa   : > { %3804 = vmatprep.subr.bf16.mxu1 %v10022_v37  ;;  %v10056_v37 = vld [vmem:[#allocation12 + $0x848] ss:$48 sps:$4 sm:$0xff]  }
 0x23d   : > { %v1175_v47 = vpop.f32.mrb[0].mxu0 }
 0x23e   : > { %v1177_v49 = vpop.f32.mrb[1].mxu0  ;;  %v9543_v52 = vadd.f32 %v1175_v47, %v589_v45  ;;  %v10070_v47 = vld [vmem:[#allocation12 + $0x90c] ss:$48 sps:$4 sm:$0xff]  }
 0x23f   : > { %v1179_v50 = vpop.f32.mrb[2].mxu0  ;;  %v9544_v56 = vadd.f32 %v1177_v49, %v593_v48  ;;  %v1261_v8 = vpop.f32.mrb[0].mxu1  ;;  %v10068_v49 = vld [vmem:[#allocation12 + $0x908] ss:$48 sps:$4 sm:$0xff]  }
 0x240   : > { %v9545_v53 = vadd.f32 %v1179_v50, %v589_v45  ;;  %v1181_v54 = vpop.f32.mrb[3].mxu0  ;;  %v9547_v9 = vadd.f32 %v1261_v8, %v597_v2  ;;  %v1263_v10 = vpop.f32.mrb[1].mxu1  ;;  %v10062_v45 = vld [vmem:[#allocation12 + $0x8a8] ss:$48 sps:$4 sm:$0xff]   ;;  %v10073_v50 = vld [vmem:[#allocation12 + $0x964] ss:$48 sps:$4 sm:$0xff]  }
 0x241   : > { %v9546_v57 = vadd.f32 %v1181_v54, %v593_v48  ;;  %v9548_v11 = vadd.f32 %v1263_v10, %v601_v3  ;;  %v1265_v12 = vpop.f32.mrb[2].mxu1  ;;  %v10065_v48 = vld [vmem:[#allocation12 + $0x900] ss:$48 sps:$4 sm:$0xff]   ;;  %v10079_v54 = vld [vmem:[#allocation12 + $0x9c4] ss:$48 sps:$4 sm:$0xff]  }
 0x242   : > { %v11896_v60 = vadd.f32 %v9545_v53, %v9543_v52  ;;  %v11898_v61 = vpack.c.bf16 %v9545_v53, %v9543_v52  ;;  %v9549_v13 = vadd.f32 %v1265_v12, %v597_v2  ;;  %v1267_v14 = vpop.f32.mrb[3].mxu1  ;;  %v10071_v52 = vld [vmem:[#allocation12 + $0x960] ss:$48 sps:$4 sm:$0xff]   ;;  %v10074_v53 = vld [vmem:[#allocation12 + $0x968] ss:$48 sps:$4 sm:$0xff]  }
 0x243   : > { %v11900_v0 = vadd.f32 %v9546_v57, %v9544_v56  ;;  %v11902_v1 = vpack.c.bf16 %v9546_v57, %v9544_v56  ;;  %v9550_v17 = vadd.f32 %v1267_v14, %v601_v3  ;;  %v10077_v56 = vld [vmem:[#allocation12 + $0x9c0] ss:$48 sps:$4 sm:$0xff]   ;;  %v10080_v57 = vld [vmem:[#allocation12 + $0x9c8] ss:$48 sps:$4 sm:$0xff]   ;;  %v10091_v2 = vld [vmem:[#allocation12 + $0xa84] ss:$48 sps:$4 sm:$0xff]  }
 0x244   : > { %v11910_v18 = vadd.f32 %v9549_v13, %v9547_v9  ;;  %v11912_v19 = vpack.c.bf16 %v9549_v13, %v9547_v9  ;;  %v10094_v3 = vld [vmem:[#allocation12 + $0xa8c] ss:$48 sps:$4 sm:$0xff]   ;;  %v10095_v8 = vld [vmem:[#allocation12 + $0xae0] ss:$48 sps:$4 sm:$0xff]   ;;  %v10098_v9 = vld [vmem:[#allocation12 + $0xae8] ss:$48 sps:$4 sm:$0xff]  }
 0x245   : > { %3707 = vmatprep.mubr.bf16.mxu0 %v11902_v1  ;;  %3793 = vmatprep.mubr.bf16.mxu1 %v11902_v1  ;;  %v11914_v22 = vadd.f32 %v9550_v17, %v9548_v11  ;;  %v11916_v23 = vpack.c.bf16 %v9550_v17, %v9548_v11  ;;  %v10103_v10 = vld [vmem:[#allocation12 + $0xb44] ss:$48 sps:$4 sm:$0xff]   ;;  %v10106_v11 = vld [vmem:[#allocation12 + $0xb4c] ss:$48 sps:$4 sm:$0xff]   ;;  %v10101_v12 = vld [vmem:[#allocation12 + $0xb40] ss:$48 sps:$4 sm:$0xff]  }
 0x246   : > { %3708 = vmatmul.mubr.bf16.vlgmr.msra.gmra.mrb[4].mxu0 %v11898_v61  ;;  %3794 = vmatmul.mubr.bf16.vlgmr.msra.gmra.mrb[4].mxu1 %v11898_v61  ;;  %v10104_v13 = vld [vmem:[#allocation12 + $0xb48] ss:$48 sps:$4 sm:$0xff]   ;;  %v10109_v14 = vld [vmem:[#allocation12 + $0xba4] ss:$48 sps:$4 sm:$0xff]  }
 0x247   : > { %3719 = vmatpush1.bf16.msra.mxu0 %v10017_v58  ;;  %3805 = vmatpush1.bf16.msra.mxu1 %v10020_v59  ;;  %v10085_v58 = vld [vmem:[#allocation12 + $0xa24] ss:$48 sps:$4 sm:$0xff]   ;;  %v10088_v59 = vld [vmem:[#allocation12 + $0xa2c] ss:$48 sps:$4 sm:$0xff]   ;;  %v10110_v17 = vld [vmem:[#allocation12 + $0xba8] ss:$48 sps:$4 sm:$0xff]  }
 0x248   : > { %3720 = vmatprep.subr.bf16.mxu0 %v10025_v62  ;;  %3806 = vmatprep.subr.bf16.mxu1 %v10028_v63  ;;  %v10083_v62 = vld [vmem:[#allocation12 + $0xa20] ss:$48 sps:$4 sm:$0xff]   ;;  %v10086_v63 = vld [vmem:[#allocation12 + $0xa28] ss:$48 sps:$4 sm:$0xff]  }
 0x249   : > { %3750 = vmatprep.mubr.bf16.mxu0 %v11916_v23  ;;  %3836 = vmatprep.mubr.bf16.mxu1 %v11916_v23 }
 0x24b   : > { %3721 = vmatpush1.bf16.msra.mxu0 %v10023_v4  ;;  %3807 = vmatpush1.bf16.msra.mxu1 %v10026_v5  ;;  %v10089_v4 = vld [vmem:[#allocation12 + $0xa80] ss:$48 sps:$4 sm:$0xff]   ;;  %v10092_v5 = vld [vmem:[#allocation12 + $0xa88] ss:$48 sps:$4 sm:$0xff]  }
 0x24c   : > { %3722 = vmatprep.subr.bf16.mxu0 %v10031_v6  ;;  %3808 = vmatprep.subr.bf16.mxu1 %v10034_v7  ;;  %v10097_v6 = vld [vmem:[#allocation12 + $0xae4] ss:$48 sps:$4 sm:$0xff]   ;;  %v10100_v7 = vld [vmem:[#allocation12 + $0xaec] ss:$48 sps:$4 sm:$0xff]  }
 0x24f   : > { %3723 = vmatpush1.bf16.msra.mxu0 %v10029_v15  ;;  %3809 = vmatpush1.bf16.msra.mxu1 %v10032_v16  ;;  %v10112_v15 = vld [vmem:[#allocation12 + $0xbac] ss:$48 sps:$4 sm:$0xff]   ;;  %v10107_v16 = vld [vmem:[#allocation12 + $0xba0] ss:$48 sps:$4 sm:$0xff]  }
 0x250   : > { %3724 = vmatprep.subr.bf16.mxu0 %v10037_v20  ;;  %3810 = vmatprep.subr.bf16.mxu1 %v10040_v21  ;;  %v10115_v20 = vld [vmem:[#allocation12 + $0x14] ss:$48 sps:$4 sm:$0xff]   ;;  %v10118_v21 = vld [vmem:[#allocation12 + $0x1c] ss:$48 sps:$4 sm:$0xff]  }
 0x253   : > { %3725 = vmatpush1.bf16.msra.mxu0 %v10035_v24  ;;  %3811 = vmatpush1.bf16.msra.mxu1 %v10038_v25  ;;  %v10113_v24 = vld [vmem:[#allocation12 + $0x10] ss:$48 sps:$4 sm:$0xff]   ;;  %v10116_v25 = vld [vmem:[#allocation12 + $0x18] ss:$48 sps:$4 sm:$0xff]  }
 0x254   : > { %3726 = vmatprep.subr.bf16.mxu0 %v10043_v26  ;;  %3812 = vmatprep.subr.bf16.mxu1 %v10046_v27  ;;  %v10121_v26 = vld [vmem:[#allocation12 + $0x74] ss:$48 sps:$4 sm:$0xff]   ;;  %v10124_v27 = vld [vmem:[#allocation12 + $0x7c] ss:$48 sps:$4 sm:$0xff]  }
 0x257   : > { %3727 = vmatpush1.bf16.msra.mxu0 %v10041_v28  ;;  %3813 = vmatpush1.bf16.msra.mxu1 %v10044_v29  ;;  %v10119_v28 = vld [vmem:[#allocation12 + $0x70] ss:$48 sps:$4 sm:$0xff]   ;;  %v10122_v29 = vld [vmem:[#allocation12 + $0x78] ss:$48 sps:$4 sm:$0xff]  }
 0x258   : > { %3728 = vmatprep.subr.bf16.mxu0 %v10049_v30  ;;  %3814 = vmatprep.subr.bf16.mxu1 %v10052_v31  ;;  %v10127_v30 = vld [vmem:[#allocation12 + $0xd4] ss:$48 sps:$4 sm:$0xff]   ;;  %v10130_v31 = vld [vmem:[#allocation12 + $0xdc] ss:$48 sps:$4 sm:$0xff]  }
 0x25b   : > { %3729 = vmatpush1.bf16.msra.mxu0 %v10047_v32  ;;  %3815 = vmatpush1.bf16.msra.mxu1 %v10050_v33  ;;  %v10125_v32 = vld [vmem:[#allocation12 + $0xd0] ss:$48 sps:$4 sm:$0xff]   ;;  %v10128_v33 = vld [vmem:[#allocation12 + $0xd8] ss:$48 sps:$4 sm:$0xff]  }
 0x25c   : > { %3730 = vmatprep.subr.bf16.mxu0 %v10055_v34  ;;  %3816 = vmatprep.subr.bf16.mxu1 %v10058_v35  ;;  %v10133_v34 = vld [vmem:[#allocation12 + $0x134] ss:$48 sps:$4 sm:$0xff]   ;;  %v10131_v35 = vld [vmem:[#allocation12 + $0x130] ss:$48 sps:$4 sm:$0xff]  }
 0x25f   : > { %3731 = vmatpush1.bf16.msra.mxu0 %v10053_v36  ;;  %3817 = vmatpush1.bf16.msra.mxu1 %v10056_v37  ;;  %v10136_v36 = vld [vmem:[#allocation12 + $0x13c] ss:$48 sps:$4 sm:$0xff]   ;;  %v10134_v37 = vld [vmem:[#allocation12 + $0x138] ss:$48 sps:$4 sm:$0xff]  }
 0x260   : > { %3732 = vmatprep.subr.bf16.mxu0 %v10061_v41  ;;  %3818 = vmatprep.subr.bf16.mxu1 %v10064_v43  ;;  %v10139_v41 = vld [vmem:[#allocation12 + $0x194] ss:$48 sps:$4 sm:$0xff]   ;;  %v10137_v43 = vld [vmem:[#allocation12 + $0x190] ss:$48 sps:$4 sm:$0xff]  }
 0x263   : > { %3733 = vmatpush1.bf16.msra.mxu0 %v10059_v44  ;;  %3819 = vmatpush1.bf16.msra.mxu1 %v10062_v45  ;;  %v10142_v44 = vld [vmem:[#allocation12 + $0x19c] ss:$48 sps:$4 sm:$0xff]   ;;  %v10140_v45 = vld [vmem:[#allocation12 + $0x198] ss:$48 sps:$4 sm:$0xff]  }
 0x264   : > { %3734 = vmatprep.subr.bf16.mxu0 %v10067_v46  ;;  %3820 = vmatprep.subr.bf16.mxu1 %v10070_v47  ;;  %v10145_v46 = vld [vmem:[#allocation12 + $0x1f4] ss:$48 sps:$4 sm:$0xff]   ;;  %v10143_v47 = vld [vmem:[#allocation12 + $0x1f0] ss:$48 sps:$4 sm:$0xff]  }
 0x267   : > { %3735 = vmatpush1.bf16.msra.mxu0 %v10065_v48  ;;  %3821 = vmatpush1.bf16.msra.mxu1 %v10068_v49  ;;  %v10148_v48 = vld [vmem:[#allocation12 + $0x1fc] ss:$48 sps:$4 sm:$0xff]   ;;  %v10146_v49 = vld [vmem:[#allocation12 + $0x1f8] ss:$48 sps:$4 sm:$0xff]  }
 0x268   : > { %3736 = vmatprep.subr.bf16.mxu0 %v10073_v50  ;;  %3822 = vmatprep.subr.bf16.mxu1 %v10076_v51  ;;  %v10151_v50 = vld [vmem:[#allocation12 + $0x254] ss:$48 sps:$4 sm:$0xff]   ;;  %v10149_v51 = vld [vmem:[#allocation12 + $0x250] ss:$48 sps:$4 sm:$0xff]  }
 0x26b   : > { %3737 = vmatpush1.bf16.msra.mxu0 %v10071_v52  ;;  %3823 = vmatpush1.bf16.msra.mxu1 %v10074_v53  ;;  %v10154_v52 = vld [vmem:[#allocation12 + $0x25c] ss:$48 sps:$4 sm:$0xff]   ;;  %v10152_v53 = vld [vmem:[#allocation12 + $0x258] ss:$48 sps:$4 sm:$0xff]  }
 0x26c   : > { %3738 = vmatprep.subr.bf16.mxu0 %v10079_v54  ;;  %3824 = vmatprep.subr.bf16.mxu1 %v10082_v55  ;;  %v10157_v54 = vld [vmem:[#allocation12 + $0x2b4] ss:$48 sps:$4 sm:$0xff]   ;;  %v10155_v55 = vld [vmem:[#allocation12 + $0x2b0] ss:$48 sps:$4 sm:$0xff]  }
 0x26f   : > { %3739 = vmatpush1.bf16.msra.mxu0 %v10077_v56  ;;  %3825 = vmatpush1.bf16.msra.mxu1 %v10080_v57  ;;  %v10160_v56 = vld [vmem:[#allocation12 + $0x2bc] ss:$48 sps:$4 sm:$0xff]   ;;  %v10158_v57 = vld [vmem:[#allocation12 + $0x2b8] ss:$48 sps:$4 sm:$0xff]  }
 0x270   : > { %3740 = vmatprep.subr.bf16.mxu0 %v10085_v58  ;;  %3826 = vmatprep.subr.bf16.mxu1 %v10088_v59  ;;  %v10163_v58 = vld [vmem:[#allocation12 + $0x314] ss:$48 sps:$4 sm:$0xff]   ;;  %v10161_v59 = vld [vmem:[#allocation12 + $0x310] ss:$48 sps:$4 sm:$0xff]  }
 0x273   : > { %3741 = vmatpush1.bf16.msra.mxu0 %v10083_v62  ;;  %3827 = vmatpush1.bf16.msra.mxu1 %v10086_v63  ;;  %v10166_v62 = vld [vmem:[#allocation12 + $0x31c] ss:$48 sps:$4 sm:$0xff]   ;;  %v10164_v63 = vld [vmem:[#allocation12 + $0x318] ss:$48 sps:$4 sm:$0xff]  }
 0x274   : > { %3742 = vmatprep.subr.bf16.mxu0 %v10091_v2  ;;  %3828 = vmatprep.subr.bf16.mxu1 %v10094_v3  ;;  %v10169_v2 = vld [vmem:[#allocation12 + $0x374] ss:$48 sps:$4 sm:$0xff]   ;;  %v10167_v3 = vld [vmem:[#allocation12 + $0x370] ss:$48 sps:$4 sm:$0xff]  }
 0x277   : > { %3743 = vmatpush1.bf16.msra.mxu0 %v10089_v4  ;;  %3829 = vmatpush1.bf16.msra.mxu1 %v10092_v5  ;;  %v10172_v4 = vld [vmem:[#allocation12 + $0x37c] ss:$48 sps:$4 sm:$0xff]   ;;  %v10170_v5 = vld [vmem:[#allocation12 + $0x378] ss:$48 sps:$4 sm:$0xff]  }
 0x278   : > { %3744 = vmatprep.subr.bf16.mxu0 %v10097_v6  ;;  %3830 = vmatprep.subr.bf16.mxu1 %v10100_v7  ;;  %v10175_v6 = vld [vmem:[#allocation12 + $0x3d4] ss:$48 sps:$4 sm:$0xff]   ;;  %v10173_v7 = vld [vmem:[#allocation12 + $0x3d0] ss:$48 sps:$4 sm:$0xff]  }
 0x27b   : > { %3745 = vmatpush1.bf16.msra.mxu0 %v10095_v8  ;;  %3831 = vmatpush1.bf16.msra.mxu1 %v10098_v9  ;;  %v10178_v8 = vld [vmem:[#allocation12 + $0x3dc] ss:$48 sps:$4 sm:$0xff]   ;;  %v10176_v9 = vld [vmem:[#allocation12 + $0x3d8] ss:$48 sps:$4 sm:$0xff]  }
 0x27c   : > { %3746 = vmatprep.subr.bf16.mxu0 %v10103_v10  ;;  %3832 = vmatprep.subr.bf16.mxu1 %v10106_v11  ;;  %v10181_v10 = vld [vmem:[#allocation12 + $0x434] ss:$48 sps:$4 sm:$0xff]   ;;  %v10179_v11 = vld [vmem:[#allocation12 + $0x430] ss:$48 sps:$4 sm:$0xff]  }
 0x27f   : > { %3747 = vmatpush1.bf16.msra.mxu0 %v10101_v12  ;;  %3833 = vmatpush1.bf16.msra.mxu1 %v10104_v13  ;;  %v10184_v12 = vld [vmem:[#allocation12 + $0x43c] ss:$48 sps:$4 sm:$0xff]   ;;  %v10182_v13 = vld [vmem:[#allocation12 + $0x438] ss:$48 sps:$4 sm:$0xff]  }
 0x280   : > { %3748 = vmatprep.subr.bf16.mxu0 %v10109_v14  ;;  %3834 = vmatprep.subr.bf16.mxu1 %v10112_v15  ;;  %v10187_v14 = vld [vmem:[#allocation12 + $0x494] ss:$48 sps:$4 sm:$0xff]   ;;  %v10190_v15 = vld [vmem:[#allocation12 + $0x49c] ss:$48 sps:$4 sm:$0xff]  }
 0x283   : > { %3749 = vmatpush1.bf16.msra.mxu0 %v10107_v16  ;;  %3835 = vmatpush1.bf16.msra.mxu1 %v10110_v17  ;;  %v10185_v16 = vld [vmem:[#allocation12 + $0x490] ss:$48 sps:$4 sm:$0xff]   ;;  %v10188_v17 = vld [vmem:[#allocation12 + $0x498] ss:$48 sps:$4 sm:$0xff]  }
 0x284   : > { %3847 = vmatprep.subr.bf16.mxu0 %v10115_v20  ;;  %3933 = vmatprep.subr.bf16.mxu1 %v10118_v21  ;;  %v10193_v20 = vld [vmem:[#allocation12 + $0x4f4] ss:$48 sps:$4 sm:$0xff]   ;;  %v10196_v21 = vld [vmem:[#allocation12 + $0x4fc] ss:$48 sps:$4 sm:$0xff]  }
 0x286   : > { %3751 = vmatmul.mubr.bf16.vlgmr.msra.gmra.mrb[4].mxu0 %v11912_v19  ;;  %3837 = vmatmul.mubr.bf16.vlgmr.msra.gmra.mrb[4].mxu1 %v11912_v19 }
 0x287   : > { %3848 = vmatpush1.bf16.msra.mxu0 %v10113_v24  ;;  %3879 = vmatprep.mubr.bf16.mxu0 %v11902_v1  ;;  %v10191_v24 = vld [vmem:[#allocation12 + $0x4f0] ss:$48 sps:$4 sm:$0xff]  }
 0x288   : > { %3934 = vmatpush1.bf16.msra.mxu1 %v10116_v25  ;;  %3965 = vmatprep.mubr.bf16.mxu1 %v11902_v1  ;;  %v10194_v25 = vld [vmem:[#allocation12 + $0x4f8] ss:$48 sps:$4 sm:$0xff]  }
 0x289   : > { %3849 = vmatprep.subr.bf16.mxu0 %v10121_v26  ;;  %3935 = vmatprep.subr.bf16.mxu1 %v10124_v27  ;;  %v10199_v26 = vld [vmem:[#allocation12 + $0x554] ss:$48 sps:$4 sm:$0xff]   ;;  %v10202_v27 = vld [vmem:[#allocation12 + $0x55c] ss:$48 sps:$4 sm:$0xff]  }
 0x28b   : > { %3850 = vmatpush1.bf16.msra.mxu0 %v10119_v28  ;;  %v10197_v28 = vld [vmem:[#allocation12 + $0x550] ss:$48 sps:$4 sm:$0xff]  }
 0x28c   : > { %3936 = vmatpush1.bf16.msra.mxu1 %v10122_v29  ;;  %3851 = vmatprep.subr.bf16.mxu0 %v10127_v30  ;;  %v10200_v29 = vld [vmem:[#allocation12 + $0x558] ss:$48 sps:$4 sm:$0xff]   ;;  %v10205_v30 = vld [vmem:[#allocation12 + $0x5b4] ss:$48 sps:$4 sm:$0xff]  }
 0x28d   : > { %3937 = vmatprep.subr.bf16.mxu1 %v10130_v31  ;;  %v10208_v31 = vld [vmem:[#allocation12 + $0x5bc] ss:$48 sps:$4 sm:$0xff]  }
 0x28f   : > { %3852 = vmatpush1.bf16.msra.mxu0 %v10125_v32  ;;  %v10203_v32 = vld [vmem:[#allocation12 + $0x5b0] ss:$48 sps:$4 sm:$0xff]  }
 0x290   : > { %3938 = vmatpush1.bf16.msra.mxu1 %v10128_v33  ;;  %3853 = vmatprep.subr.bf16.mxu0 %v10133_v34  ;;  %v10206_v33 = vld [vmem:[#allocation12 + $0x5b8] ss:$48 sps:$4 sm:$0xff]   ;;  %v10211_v34 = vld [vmem:[#allocation12 + $0x614] ss:$48 sps:$4 sm:$0xff]  }
 0x291   : > { %3939 = vmatprep.subr.bf16.mxu1 %v10136_v36  ;;  %v10209_v36 = vld [vmem:[#allocation12 + $0x610] ss:$48 sps:$4 sm:$0xff]  }
 0x293   : > { %3854 = vmatpush1.bf16.msra.mxu0 %v10131_v35  ;;  %v10214_v35 = vld [vmem:[#allocation12 + $0x61c] ss:$48 sps:$4 sm:$0xff]  }
 0x294   : > { %3940 = vmatpush1.bf16.msra.mxu1 %v10134_v37  ;;  %3855 = vmatprep.subr.bf16.mxu0 %v10139_v41  ;;  %v10212_v37 = vld [vmem:[#allocation12 + $0x618] ss:$48 sps:$4 sm:$0xff]   ;;  %v10217_v41 = vld [vmem:[#allocation12 + $0x674] ss:$48 sps:$4 sm:$0xff]  }
 0x295   : > { %3941 = vmatprep.subr.bf16.mxu1 %v10142_v44  ;;  %v10215_v44 = vld [vmem:[#allocation12 + $0x670] ss:$48 sps:$4 sm:$0xff]  }
 0x297   : > { %3856 = vmatpush1.bf16.msra.mxu0 %v10137_v43  ;;  %v10220_v43 = vld [vmem:[#allocation12 + $0x67c] ss:$48 sps:$4 sm:$0xff]  }
 0x298   : > { %3942 = vmatpush1.bf16.msra.mxu1 %v10140_v45  ;;  %3857 = vmatprep.subr.bf16.mxu0 %v10145_v46  ;;  %v10218_v45 = vld [vmem:[#allocation12 + $0x678] ss:$48 sps:$4 sm:$0xff]   ;;  %v10223_v46 = vld [vmem:[#allocation12 + $0x6d4] ss:$48 sps:$4 sm:$0xff]  }
 0x299   : > { %3943 = vmatprep.subr.bf16.mxu1 %v10148_v48  ;;  %v10221_v48 = vld [vmem:[#allocation12 + $0x6d0] ss:$48 sps:$4 sm:$0xff]  }
 0x29b   : > { %3858 = vmatpush1.bf16.msra.mxu0 %v10143_v47  ;;  %v10226_v47 = vld [vmem:[#allocation12 + $0x6dc] ss:$48 sps:$4 sm:$0xff]  }
 0x29c   : > { %3944 = vmatpush1.bf16.msra.mxu1 %v10146_v49  ;;  %3859 = vmatprep.subr.bf16.mxu0 %v10151_v50  ;;  %v10224_v49 = vld [vmem:[#allocation12 + $0x6d8] ss:$48 sps:$4 sm:$0xff]   ;;  %v10229_v50 = vld [vmem:[#allocation12 + $0x734] ss:$48 sps:$4 sm:$0xff]  }
 0x29d   : > { %3945 = vmatprep.subr.bf16.mxu1 %v10154_v52  ;;  %v10227_v52 = vld [vmem:[#allocation12 + $0x730] ss:$48 sps:$4 sm:$0xff]  }
 0x29f   : > { %3860 = vmatpush1.bf16.msra.mxu0 %v10149_v51  ;;  %v10232_v51 = vld [vmem:[#allocation12 + $0x73c] ss:$48 sps:$4 sm:$0xff]  }
 0x2a0   : > { %3946 = vmatpush1.bf16.msra.mxu1 %v10152_v53  ;;  %3861 = vmatprep.subr.bf16.mxu0 %v10157_v54  ;;  %v10230_v53 = vld [vmem:[#allocation12 + $0x738] ss:$48 sps:$4 sm:$0xff]   ;;  %v10235_v54 = vld [vmem:[#allocation12 + $0x794] ss:$48 sps:$4 sm:$0xff]  }
 0x2a1   : > { %3947 = vmatprep.subr.bf16.mxu1 %v10160_v56  ;;  %v10233_v56 = vld [vmem:[#allocation12 + $0x790] ss:$48 sps:$4 sm:$0xff]  }
 0x2a3   : > { %3862 = vmatpush1.bf16.msra.mxu0 %v10155_v55  ;;  %v10238_v55 = vld [vmem:[#allocation12 + $0x79c] ss:$48 sps:$4 sm:$0xff]  }
 0x2a4   : > { %3948 = vmatpush1.bf16.msra.mxu1 %v10158_v57  ;;  %3863 = vmatprep.subr.bf16.mxu0 %v10163_v58  ;;  %v10236_v57 = vld [vmem:[#allocation12 + $0x798] ss:$48 sps:$4 sm:$0xff]   ;;  %v10241_v58 = vld [vmem:[#allocation12 + $0x7f4] ss:$48 sps:$4 sm:$0xff]  }
 0x2a5   : > { %3949 = vmatprep.subr.bf16.mxu1 %v10166_v62  ;;  %v10239_v62 = vld [vmem:[#allocation12 + $0x7f0] ss:$48 sps:$4 sm:$0xff]  }
 0x2a7   : > { %3864 = vmatpush1.bf16.msra.mxu0 %v10161_v59  ;;  %v10244_v59 = vld [vmem:[#allocation12 + $0x7fc] ss:$48 sps:$4 sm:$0xff]  }
 0x2a8   : > { %3950 = vmatpush1.bf16.msra.mxu1 %v10164_v63  ;;  %3865 = vmatprep.subr.bf16.mxu0 %v10169_v2  ;;  %v10242_v63 = vld [vmem:[#allocation12 + $0x7f8] ss:$48 sps:$4 sm:$0xff]   ;;  %v10247_v2 = vld [vmem:[#allocation12 + $0x854] ss:$48 sps:$4 sm:$0xff]  }
 0x2a9   : > { %3951 = vmatprep.subr.bf16.mxu1 %v10172_v4  ;;  %v10245_v4 = vld [vmem:[#allocation12 + $0x850] ss:$48 sps:$4 sm:$0xff]  }
 0x2ab   : > { %3866 = vmatpush1.bf16.msra.mxu0 %v10167_v3  ;;  %v10250_v3 = vld [vmem:[#allocation12 + $0x85c] ss:$48 sps:$4 sm:$0xff]  }
 0x2ac   : > { %3952 = vmatpush1.bf16.msra.mxu1 %v10170_v5  ;;  %3867 = vmatprep.subr.bf16.mxu0 %v10175_v6  ;;  %v10248_v5 = vld [vmem:[#allocation12 + $0x858] ss:$48 sps:$4 sm:$0xff]   ;;  %v10253_v6 = vld [vmem:[#allocation12 + $0x8b4] ss:$48 sps:$4 sm:$0xff]  }
 0x2ad   : > { %3953 = vmatprep.subr.bf16.mxu1 %v10178_v8  ;;  %v10251_v8 = vld [vmem:[#allocation12 + $0x8b0] ss:$48 sps:$4 sm:$0xff]  }
 0x2af   : > { %3868 = vmatpush1.bf16.msra.mxu0 %v10173_v7  ;;  %v10256_v7 = vld [vmem:[#allocation12 + $0x8bc] ss:$48 sps:$4 sm:$0xff]  }
 0x2b0   : > { %3954 = vmatpush1.bf16.msra.mxu1 %v10176_v9  ;;  %3869 = vmatprep.subr.bf16.mxu0 %v10181_v10  ;;  %v10254_v9 = vld [vmem:[#allocation12 + $0x8b8] ss:$48 sps:$4 sm:$0xff]   ;;  %v10259_v10 = vld [vmem:[#allocation12 + $0x914] ss:$48 sps:$4 sm:$0xff]  }
 0x2b1   : > { %3955 = vmatprep.subr.bf16.mxu1 %v10184_v12  ;;  %v10257_v12 = vld [vmem:[#allocation12 + $0x910] ss:$48 sps:$4 sm:$0xff]  }
 0x2b3   : > { %3870 = vmatpush1.bf16.msra.mxu0 %v10179_v11  ;;  %v10262_v11 = vld [vmem:[#allocation12 + $0x91c] ss:$48 sps:$4 sm:$0xff]  }
 0x2b4   : > { %3956 = vmatpush1.bf16.msra.mxu1 %v10182_v13  ;;  %3871 = vmatprep.subr.bf16.mxu0 %v10187_v14  ;;  %v10260_v13 = vld [vmem:[#allocation12 + $0x918] ss:$48 sps:$4 sm:$0xff]   ;;  %v10265_v14 = vld [vmem:[#allocation12 + $0x974] ss:$48 sps:$4 sm:$0xff]  }
 0x2b5   : > { %3957 = vmatprep.subr.bf16.mxu1 %v10190_v15  ;;  %v10268_v15 = vld [vmem:[#allocation12 + $0x97c] ss:$48 sps:$4 sm:$0xff]  }
 0x2b7   : > { %3872 = vmatpush1.bf16.msra.mxu0 %v10185_v16  ;;  %v10263_v16 = vld [vmem:[#allocation12 + $0x970] ss:$48 sps:$4 sm:$0xff]  }
 0x2b8   : > { %3958 = vmatpush1.bf16.msra.mxu1 %v10188_v17  ;;  %3873 = vmatprep.subr.bf16.mxu0 %v10193_v20  ;;  %v10266_v17 = vld [vmem:[#allocation12 + $0x978] ss:$48 sps:$4 sm:$0xff]   ;;  %v10271_v20 = vld [vmem:[#allocation12 + $0x9d4] ss:$48 sps:$4 sm:$0xff]  }
 0x2b9   : > { %3959 = vmatprep.subr.bf16.mxu1 %v10196_v21  ;;  %v10274_v21 = vld [vmem:[#allocation12 + $0x9dc] ss:$48 sps:$4 sm:$0xff]  }
 0x2bb   : > { %3874 = vmatpush1.bf16.msra.mxu0 %v10191_v24  ;;  %v10269_v24 = vld [vmem:[#allocation12 + $0x9d0] ss:$48 sps:$4 sm:$0xff]  }
 0x2bc   : > { %3960 = vmatpush1.bf16.msra.mxu1 %v10194_v25  ;;  %3875 = vmatprep.subr.bf16.mxu0 %v10199_v26  ;;  %v10272_v25 = vld [vmem:[#allocation12 + $0x9d8] ss:$48 sps:$4 sm:$0xff]   ;;  %v10277_v26 = vld [vmem:[#allocation12 + $0xa34] ss:$48 sps:$4 sm:$0xff]  }
 0x2bd   : > { %3961 = vmatprep.subr.bf16.mxu1 %v10202_v27  ;;  %v10280_v27 = vld [vmem:[#allocation12 + $0xa3c] ss:$48 sps:$4 sm:$0xff]  }
 0x2bf   : > { %3876 = vmatpush1.bf16.msra.mxu0 %v10197_v28  ;;  %v10275_v28 = vld [vmem:[#allocation12 + $0xa30] ss:$48 sps:$4 sm:$0xff]  }
 0x2c0   : > { %3962 = vmatpush1.bf16.msra.mxu1 %v10200_v29  ;;  %3877 = vmatprep.subr.bf16.mxu0 %v10205_v30  ;;  %v10278_v29 = vld [vmem:[#allocation12 + $0xa38] ss:$48 sps:$4 sm:$0xff]   ;;  %v10283_v30 = vld [vmem:[#allocation12 + $0xa94] ss:$48 sps:$4 sm:$0xff]  }
 0x2c1   : > { %3963 = vmatprep.subr.bf16.mxu1 %v10208_v31  ;;  %v10286_v31 = vld [vmem:[#allocation12 + $0xa9c] ss:$48 sps:$4 sm:$0xff]  }
 0x2c3   : > { %3878 = vmatpush1.bf16.msra.mxu0 %v10203_v32  ;;  %v10281_v32 = vld [vmem:[#allocation12 + $0xa90] ss:$48 sps:$4 sm:$0xff]  }
 0x2c4   : > { %3964 = vmatpush1.bf16.msra.mxu1 %v10206_v33  ;;  %3890 = vmatprep.subr.bf16.mxu0 %v10211_v34  ;;  %v10284_v33 = vld [vmem:[#allocation12 + $0xa98] ss:$48 sps:$4 sm:$0xff]   ;;  %v10289_v34 = vld [vmem:[#allocation12 + $0xaf4] ss:$48 sps:$4 sm:$0xff]  }
 0x2c5   : > { %3976 = vmatprep.subr.bf16.mxu1 %v10214_v35  ;;  %v10292_v35 = vld [vmem:[#allocation12 + $0xafc] ss:$48 sps:$4 sm:$0xff]  }
 0x2c6   : > { %3880 = vmatmul.mubr.bf16.vlgmr.msra.gmra.mrb[8].mxu0 %v11898_v61 }
 0x2c7   : > { %3966 = vmatmul.mubr.bf16.vlgmr.msra.gmra.mrb[8].mxu1 %v11898_v61  ;;  %3891 = vmatpush1.bf16.msra.mxu0 %v10209_v36  ;;  %v10287_v36 = vld [vmem:[#allocation12 + $0xaf0] ss:$48 sps:$4 sm:$0xff]  }
 0x2c8   : > { %3922 = vmatprep.mubr.bf16.mxu0 %v11916_v23  ;;  %3977 = vmatpush1.bf16.msra.mxu1 %v10212_v37  ;;  %v10290_v37 = vld [vmem:[#allocation12 + $0xaf8] ss:$48 sps:$4 sm:$0xff]  }
 0x2c9   : > { %4008 = vmatprep.mubr.bf16.mxu1 %v11916_v23  ;;  %3892 = vmatprep.subr.bf16.mxu0 %v10217_v41  ;;  %v10295_v41 = vld [vmem:[#allocation12 + $0xb54] ss:$48 sps:$4 sm:$0xff]  }
 0x2ca   : > { %3978 = vmatprep.subr.bf16.mxu1 %v10220_v43  ;;  %v10298_v43 = vld [vmem:[#allocation12 + $0xb5c] ss:$48 sps:$4 sm:$0xff]  }
 0x2cb   : > { %3893 = vmatpush1.bf16.msra.mxu0 %v10215_v44  ;;  %v10293_v44 = vld [vmem:[#allocation12 + $0xb50] ss:$48 sps:$4 sm:$0xff]  }
 0x2cc   : > { %3979 = vmatpush1.bf16.msra.mxu1 %v10218_v45  ;;  %3894 = vmatprep.subr.bf16.mxu0 %v10223_v46  ;;  %v10296_v45 = vld [vmem:[#allocation12 + $0xb58] ss:$48 sps:$4 sm:$0xff]   ;;  %v10301_v46 = vld [vmem:[#allocation12 + $0xbb4] ss:$48 sps:$4 sm:$0xff]  }
 0x2cd   : > { %3980 = vmatprep.subr.bf16.mxu1 %v10226_v47  ;;  %v10304_v47 = vld [vmem:[#allocation12 + $0xbbc] ss:$48 sps:$4 sm:$0xff]  }
 0x2cf   : > { %3895 = vmatpush1.bf16.msra.mxu0 %v10221_v48  ;;  %v10299_v48 = vld [vmem:[#allocation12 + $0xbb0] ss:$48 sps:$4 sm:$0xff]  }
 0x2d0   : > { %3981 = vmatpush1.bf16.msra.mxu1 %v10224_v49  ;;  %3896 = vmatprep.subr.bf16.mxu0 %v10229_v50  ;;  %v10302_v49 = vld [vmem:[#allocation12 + $0xbb8] ss:$48 sps:$4 sm:$0xff]   ;;  %v10307_v50 = vld [vmem:[#allocation12 + $0x24] ss:$48 sps:$4 sm:$0xff]  }
 0x2d1   : > { %3982 = vmatprep.subr.bf16.mxu1 %v10232_v51  ;;  %v10310_v51 = vld [vmem:[#allocation12 + $0x2c] ss:$48 sps:$4 sm:$0xff]  }
 0x2d3   : > { %3897 = vmatpush1.bf16.msra.mxu0 %v10227_v52  ;;  %v10305_v52 = vld [vmem:[#allocation12 + $0x20] ss:$48 sps:$4 sm:$0xff]  }
 0x2d4   : > { %3983 = vmatpush1.bf16.msra.mxu1 %v10230_v53  ;;  %3898 = vmatprep.subr.bf16.mxu0 %v10235_v54  ;;  %v10308_v53 = vld [vmem:[#allocation12 + $0x28] ss:$48 sps:$4 sm:$0xff]   ;;  %v10313_v54 = vld [vmem:[#allocation12 + $0x84] ss:$48 sps:$4 sm:$0xff]  }
 0x2d5   : > { %3984 = vmatprep.subr.bf16.mxu1 %v10238_v55  ;;  %v10316_v55 = vld [vmem:[#allocation12 + $0x8c] ss:$48 sps:$4 sm:$0xff]  }
 0x2d7   : > { %3899 = vmatpush1.bf16.msra.mxu0 %v10233_v56  ;;  %v10311_v56 = vld [vmem:[#allocation12 + $0x80] ss:$48 sps:$4 sm:$0xff]  }
 0x2d8   : > { %3985 = vmatpush1.bf16.msra.mxu1 %v10236_v57  ;;  %3900 = vmatprep.subr.bf16.mxu0 %v10241_v58  ;;  %v10314_v57 = vld [vmem:[#allocation12 + $0x88] ss:$48 sps:$4 sm:$0xff]   ;;  %v10319_v58 = vld [vmem:[#allocation12 + $0xe4] ss:$48 sps:$4 sm:$0xff]  }
 0x2d9   : > { %3986 = vmatprep.subr.bf16.mxu1 %v10244_v59  ;;  %v10322_v59 = vld [vmem:[#allocation12 + $0xec] ss:$48 sps:$4 sm:$0xff]  }
 0x2db   : > { %3901 = vmatpush1.bf16.msra.mxu0 %v10239_v62  ;;  %v10317_v62 = vld [vmem:[#allocation12 + $0xe0] ss:$48 sps:$4 sm:$0xff]  }
 0x2dc   : > { %3987 = vmatpush1.bf16.msra.mxu1 %v10242_v63  ;;  %3902 = vmatprep.subr.bf16.mxu0 %v10247_v2  ;;  %v10320_v63 = vld [vmem:[#allocation12 + $0xe8] ss:$48 sps:$4 sm:$0xff]   ;;  %v10325_v2 = vld [vmem:[#allocation12 + $0x144] ss:$48 sps:$4 sm:$0xff]  }
 0x2dd   : > { %3988 = vmatprep.subr.bf16.mxu1 %v10250_v3  ;;  %v10328_v3 = vld [vmem:[#allocation12 + $0x14c] ss:$48 sps:$4 sm:$0xff]  }
 0x2df   : > { %3903 = vmatpush1.bf16.msra.mxu0 %v10245_v4  ;;  %v10323_v4 = vld [vmem:[#allocation12 + $0x140] ss:$48 sps:$4 sm:$0xff]  }
 0x2e0   : > { %3989 = vmatpush1.bf16.msra.mxu1 %v10248_v5  ;;  %3904 = vmatprep.subr.bf16.mxu0 %v10253_v6  ;;  %v10326_v5 = vld [vmem:[#allocation12 + $0x148] ss:$48 sps:$4 sm:$0xff]   ;;  %v10331_v6 = vld [vmem:[#allocation12 + $0x1a4] ss:$48 sps:$4 sm:$0xff]  }
 0x2e1   : > { %3990 = vmatprep.subr.bf16.mxu1 %v10256_v7  ;;  %v10334_v7 = vld [vmem:[#allocation12 + $0x1ac] ss:$48 sps:$4 sm:$0xff]  }
 0x2e3   : > { %3905 = vmatpush1.bf16.msra.mxu0 %v10251_v8  ;;  %v10332_v8 = vld [vmem:[#allocation12 + $0x1a8] ss:$48 sps:$4 sm:$0xff]  }
 0x2e4   : > { %3991 = vmatpush1.bf16.msra.mxu1 %v10254_v9  ;;  %3906 = vmatprep.subr.bf16.mxu0 %v10259_v10  ;;  %v10337_v9 = vld [vmem:[#allocation12 + $0x204] ss:$48 sps:$4 sm:$0xff]   ;;  %v10340_v10 = vld [vmem:[#allocation12 + $0x20c] ss:$48 sps:$4 sm:$0xff]  }
 0x2e5   : > { %3992 = vmatprep.subr.bf16.mxu1 %v10262_v11  ;;  %v10335_v11 = vld [vmem:[#allocation12 + $0x200] ss:$48 sps:$4 sm:$0xff]  }
 0x2e7   : > { %3907 = vmatpush1.bf16.msra.mxu0 %v10257_v12  ;;  %v10338_v12 = vld [vmem:[#allocation12 + $0x208] ss:$48 sps:$4 sm:$0xff]  }
 0x2e8   : > { %3993 = vmatpush1.bf16.msra.mxu1 %v10260_v13  ;;  %3908 = vmatprep.subr.bf16.mxu0 %v10265_v14  ;;  %v10343_v13 = vld [vmem:[#allocation12 + $0x264] ss:$48 sps:$4 sm:$0xff]   ;;  %v10346_v14 = vld [vmem:[#allocation12 + $0x26c] ss:$48 sps:$4 sm:$0xff]  }
 0x2e9   : > { %3994 = vmatprep.subr.bf16.mxu1 %v10268_v15  ;;  %v10341_v15 = vld [vmem:[#allocation12 + $0x260] ss:$48 sps:$4 sm:$0xff]  }
 0x2eb   : > { %3909 = vmatpush1.bf16.msra.mxu0 %v10263_v16  ;;  %v10344_v16 = vld [vmem:[#allocation12 + $0x268] ss:$48 sps:$4 sm:$0xff]  }
 0x2ec   : > { %3995 = vmatpush1.bf16.msra.mxu1 %v10266_v17  ;;  %3910 = vmatprep.subr.bf16.mxu0 %v10271_v20  ;;  %v10349_v17 = vld [vmem:[#allocation12 + $0x2c4] ss:$48 sps:$4 sm:$0xff]   ;;  %v10352_v20 = vld [vmem:[#allocation12 + $0x2cc] ss:$48 sps:$4 sm:$0xff]  }
 0x2ed   : > { %3996 = vmatprep.subr.bf16.mxu1 %v10274_v21  ;;  %v10347_v21 = vld [vmem:[#allocation12 + $0x2c0] ss:$48 sps:$4 sm:$0xff]  }
 0x2ef   : > { %3911 = vmatpush1.bf16.msra.mxu0 %v10269_v24  ;;  %v10350_v24 = vld [vmem:[#allocation12 + $0x2c8] ss:$48 sps:$4 sm:$0xff]  }
 0x2f0   : > { %3997 = vmatpush1.bf16.msra.mxu1 %v10272_v25  ;;  %3912 = vmatprep.subr.bf16.mxu0 %v10277_v26  ;;  %v10355_v25 = vld [vmem:[#allocation12 + $0x324] ss:$48 sps:$4 sm:$0xff]   ;;  %v10358_v26 = vld [vmem:[#allocation12 + $0x32c] ss:$48 sps:$4 sm:$0xff]  }
 0x2f1   : > { %3998 = vmatprep.subr.bf16.mxu1 %v10280_v27  ;;  %v10353_v27 = vld [vmem:[#allocation12 + $0x320] ss:$48 sps:$4 sm:$0xff]  }
 0x2f3   : > { %3913 = vmatpush1.bf16.msra.mxu0 %v10275_v28  ;;  %v10356_v28 = vld [vmem:[#allocation12 + $0x328] ss:$48 sps:$4 sm:$0xff]  }
 0x2f4   : > { %3999 = vmatpush1.bf16.msra.mxu1 %v10278_v29  ;;  %3914 = vmatprep.subr.bf16.mxu0 %v10283_v30  ;;  %v10361_v29 = vld [vmem:[#allocation12 + $0x384] ss:$48 sps:$4 sm:$0xff]   ;;  %v10364_v30 = vld [vmem:[#allocation12 + $0x38c] ss:$48 sps:$4 sm:$0xff]  }
 0x2f5   : > { %4000 = vmatprep.subr.bf16.mxu1 %v10286_v31  ;;  %v10359_v31 = vld [vmem:[#allocation12 + $0x380] ss:$48 sps:$4 sm:$0xff]  }
 0x2f7   : > { %3915 = vmatpush1.bf16.msra.mxu0 %v10281_v32  ;;  %v10362_v32 = vld [vmem:[#allocation12 + $0x388] ss:$48 sps:$4 sm:$0xff]  }
 0x2f8   : > { %4001 = vmatpush1.bf16.msra.mxu1 %v10284_v33  ;;  %3916 = vmatprep.subr.bf16.mxu0 %v10289_v34  ;;  %v10367_v33 = vld [vmem:[#allocation12 + $0x3e4] ss:$48 sps:$4 sm:$0xff]   ;;  %v10370_v34 = vld [vmem:[#allocation12 + $0x3ec] ss:$48 sps:$4 sm:$0xff]  }
 0x2f9   : > { %4002 = vmatprep.subr.bf16.mxu1 %v10292_v35  ;;  %v10365_v35 = vld [vmem:[#allocation12 + $0x3e0] ss:$48 sps:$4 sm:$0xff]  }
 0x2fb   : > { %3917 = vmatpush1.bf16.msra.mxu0 %v10287_v36  ;;  %v10368_v36 = vld [vmem:[#allocation12 + $0x3e8] ss:$48 sps:$4 sm:$0xff]  }
 0x2fc   : > { %4003 = vmatpush1.bf16.msra.mxu1 %v10290_v37  ;;  %3918 = vmatprep.subr.bf16.mxu0 %v10295_v41  ;;  %v10373_v37 = vld [vmem:[#allocation12 + $0x444] ss:$48 sps:$4 sm:$0xff]   ;;  %v10376_v41 = vld [vmem:[#allocation12 + $0x44c] ss:$48 sps:$4 sm:$0xff]  }
 0x2fd   : > { %4004 = vmatprep.subr.bf16.mxu1 %v10298_v43  ;;  %v10371_v43 = vld [vmem:[#allocation12 + $0x440] ss:$48 sps:$4 sm:$0xff]  }
 0x2ff   : > { %3919 = vmatpush1.bf16.msra.mxu0 %v10293_v44  ;;  %v10374_v44 = vld [vmem:[#allocation12 + $0x448] ss:$48 sps:$4 sm:$0xff]  }
 0x300   : > { %4005 = vmatpush1.bf16.msra.mxu1 %v10296_v45  ;;  %3920 = vmatprep.subr.bf16.mxu0 %v10301_v46  ;;  %v10379_v45 = vld [vmem:[#allocation12 + $0x4a4] ss:$48 sps:$4 sm:$0xff]   ;;  %v10382_v46 = vld [vmem:[#allocation12 + $0x4ac] ss:$48 sps:$4 sm:$0xff]  }
 0x301   : > { %4006 = vmatprep.subr.bf16.mxu1 %v10304_v47  ;;  %v10377_v47 = vld [vmem:[#allocation12 + $0x4a0] ss:$48 sps:$4 sm:$0xff]  }
 0x303   : > { %3921 = vmatpush1.bf16.msra.mxu0 %v10299_v48  ;;  %v10380_v48 = vld [vmem:[#allocation12 + $0x4a8] ss:$48 sps:$4 sm:$0xff]  }
 0x304   : > { %4007 = vmatpush1.bf16.msra.mxu1 %v10302_v49  ;;  %4019 = vmatprep.subr.bf16.mxu0 %v10307_v50  ;;  %v10385_v49 = vld [vmem:[#allocation12 + $0x504] ss:$48 sps:$4 sm:$0xff]   ;;  %v10388_v50 = vld [vmem:[#allocation12 + $0x50c] ss:$48 sps:$4 sm:$0xff]  }
 0x305   : > { %4105 = vmatprep.subr.bf16.mxu1 %v10310_v51  ;;  %v10383_v51 = vld [vmem:[#allocation12 + $0x500] ss:$48 sps:$4 sm:$0xff]  }
 0x306   : > { %3923 = vmatmul.mubr.bf16.vlgmr.msra.gmra.mrb[8].mxu0 %v11912_v19 }
 0x307   : > { %4009 = vmatmul.mubr.bf16.vlgmr.msra.gmra.mrb[8].mxu1 %v11912_v19  ;;  %4020 = vmatpush1.bf16.msra.mxu0 %v10305_v52  ;;  %v10386_v52 = vld [vmem:[#allocation12 + $0x508] ss:$48 sps:$4 sm:$0xff]  }
 0x308   : > { %4051 = vmatprep.mubr.bf16.mxu0 %v11902_v1  ;;  %4106 = vmatpush1.bf16.msra.mxu1 %v10308_v53  ;;  %v10391_v53 = vld [vmem:[#allocation12 + $0x564] ss:$48 sps:$4 sm:$0xff]  }
 0x309   : > { %4137 = vmatprep.mubr.bf16.mxu1 %v11902_v1  ;;  %4021 = vmatprep.subr.bf16.mxu0 %v10313_v54  ;;  %v10329_v1 = vld [vmem:[#allocation12 + $0x1a0] ss:$48 sps:$4 sm:$0xff]   ;;  %v10394_v54 = vld [vmem:[#allocation12 + $0x56c] ss:$48 sps:$4 sm:$0xff]  }
 0x30a   : > { %4107 = vmatprep.subr.bf16.mxu1 %v10316_v55  ;;  %v10389_v55 = vld [vmem:[#allocation12 + $0x560] ss:$48 sps:$4 sm:$0xff]  }
 0x30b   : > { %4022 = vmatpush1.bf16.msra.mxu0 %v10311_v56  ;;  %v10392_v56 = vld [vmem:[#allocation12 + $0x568] ss:$48 sps:$4 sm:$0xff]  }
 0x30c   : > { %4108 = vmatpush1.bf16.msra.mxu1 %v10314_v57  ;;  %4023 = vmatprep.subr.bf16.mxu0 %v10319_v58  ;;  %v10397_v57 = vld [vmem:[#allocation12 + $0x5c4] ss:$48 sps:$4 sm:$0xff]   ;;  %v10400_v58 = vld [vmem:[#allocation12 + $0x5cc] ss:$48 sps:$4 sm:$0xff]  }
 0x30d   : > { %4109 = vmatprep.subr.bf16.mxu1 %v10322_v59  ;;  %v10395_v59 = vld [vmem:[#allocation12 + $0x5c0] ss:$48 sps:$4 sm:$0xff]  }
 0x30f   : > { %4024 = vmatpush1.bf16.msra.mxu0 %v10317_v62  ;;  %v10398_v62 = vld [vmem:[#allocation12 + $0x5c8] ss:$48 sps:$4 sm:$0xff]  }
 0x310   : > { %4110 = vmatpush1.bf16.msra.mxu1 %v10320_v63  ;;  %4025 = vmatprep.subr.bf16.mxu0 %v10325_v2  ;;  %v10403_v63 = vld [vmem:[#allocation12 + $0x624] ss:$48 sps:$4 sm:$0xff]   ;;  %v10406_v2 = vld [vmem:[#allocation12 + $0x62c] ss:$48 sps:$4 sm:$0xff]  }
 0x311   : > { %4111 = vmatprep.subr.bf16.mxu1 %v10328_v3  ;;  %v10401_v3 = vld [vmem:[#allocation12 + $0x620] ss:$48 sps:$4 sm:$0xff]  }
 0x313   : > { %4026 = vmatpush1.bf16.msra.mxu0 %v10323_v4  ;;  %v10404_v4 = vld [vmem:[#allocation12 + $0x628] ss:$48 sps:$4 sm:$0xff]  }
 0x314   : > { %4112 = vmatpush1.bf16.msra.mxu1 %v10326_v5  ;;  %4027 = vmatprep.subr.bf16.mxu0 %v10331_v6  ;;  %v10409_v5 = vld [vmem:[#allocation12 + $0x684] ss:$48 sps:$4 sm:$0xff]   ;;  %v10412_v6 = vld [vmem:[#allocation12 + $0x68c] ss:$48 sps:$4 sm:$0xff]  }
 0x315   : > { %4113 = vmatprep.subr.bf16.mxu1 %v10334_v7  ;;  %v10407_v7 = vld [vmem:[#allocation12 + $0x680] ss:$48 sps:$4 sm:$0xff]  }
 0x317   : > { %4028 = vmatpush1.bf16.msra.mxu0 %v10329_v1  ;;  %v10410_v1 = vld [vmem:[#allocation12 + $0x688] ss:$48 sps:$4 sm:$0xff]  }
 0x318   : > { %4114 = vmatpush1.bf16.msra.mxu1 %v10332_v8  ;;  %4029 = vmatprep.subr.bf16.mxu0 %v10337_v9  ;;  %v10415_v8 = vld [vmem:[#allocation12 + $0x6e4] ss:$48 sps:$4 sm:$0xff]   ;;  %v10418_v9 = vld [vmem:[#allocation12 + $0x6ec] ss:$48 sps:$4 sm:$0xff]  }
 0x319   : > { %4115 = vmatprep.subr.bf16.mxu1 %v10340_v10  ;;  %v10413_v10 = vld [vmem:[#allocation12 + $0x6e0] ss:$48 sps:$4 sm:$0xff]  }
 0x31b   : > { %4030 = vmatpush1.bf16.msra.mxu0 %v10335_v11  ;;  %v10416_v11 = vld [vmem:[#allocation12 + $0x6e8] ss:$48 sps:$4 sm:$0xff]  }
 0x31c   : > { %4116 = vmatpush1.bf16.msra.mxu1 %v10338_v12  ;;  %4031 = vmatprep.subr.bf16.mxu0 %v10343_v13  ;;  %v10421_v12 = vld [vmem:[#allocation12 + $0x744] ss:$48 sps:$4 sm:$0xff]   ;;  %v10419_v13 = vld [vmem:[#allocation12 + $0x740] ss:$48 sps:$4 sm:$0xff]  }
 0x31d   : > { %4117 = vmatprep.subr.bf16.mxu1 %v10346_v14  ;;  %v10422_v14 = vld [vmem:[#allocation12 + $0x748] ss:$48 sps:$4 sm:$0xff]  }
 0x31f   : > { %4032 = vmatpush1.bf16.msra.mxu0 %v10341_v15  ;;  %v10427_v15 = vld [vmem:[#allocation12 + $0x7a4] ss:$48 sps:$4 sm:$0xff]  }
 0x320   : > { %4118 = vmatpush1.bf16.msra.mxu1 %v10344_v16  ;;  %4033 = vmatprep.subr.bf16.mxu0 %v10349_v17  ;;  %v10430_v16 = vld [vmem:[#allocation12 + $0x7ac] ss:$48 sps:$4 sm:$0xff]   ;;  %v10428_v17 = vld [vmem:[#allocation12 + $0x7a8] ss:$48 sps:$4 sm:$0xff]  }
 0x321   : > { %4119 = vmatprep.subr.bf16.mxu1 %v10352_v20  ;;  %v11936_v20 = vld [vmem:[#allocation18] sm:$0xff] }
 0x323   : > { %4034 = vmatpush1.bf16.msra.mxu0 %v10347_v21  ;;  %v11939_v21 = vsub.s32 2, %v11882_v39 }
 0x324   : > { %4120 = vmatpush1.bf16.msra.mxu1 %v10350_v24  ;;  %4035 = vmatprep.subr.bf16.mxu0 %v10355_v25  ;;  %v10433_v24 = vld [vmem:[#allocation12 + $0x804] ss:$48 sps:$4 sm:$0xff]   ;;  %v11942_v25 = vsub.s32 1, %v11882_v39 }
 0x325   : > { %4121 = vmatprep.subr.bf16.mxu1 %v10358_v26  ;;  %v11945_v26 = vsub.s32 3, %v11882_v39 }
 0x327   : > { %4036 = vmatpush1.bf16.msra.mxu0 %v10353_v27  ;;  %v10436_v27 = vld [vmem:[#allocation12 + $0x80c] ss:$48 sps:$4 sm:$0xff]  }
 0x328   : > { %4122 = vmatpush1.bf16.msra.mxu1 %v10356_v28  ;;  %4037 = vmatprep.subr.bf16.mxu0 %v10361_v29  ;;  %v1698_v28 = vrot.slane %v11936_v20, %v11885_v40  ;;  %v10431_v29 = vld [vmem:[#allocation12 + $0x800] ss:$48 sps:$4 sm:$0xff]  }
 0x329   : > { %4123 = vmatprep.subr.bf16.mxu1 %v10364_v30  ;;  %v1706_v30 = vrot.slane %v11936_v20, %v11939_v21 }
 0x32b   : > { %4038 = vmatpush1.bf16.msra.mxu0 %v10359_v31  ;;  %v10434_v31 = vld [vmem:[#allocation12 + $0x808] ss:$48 sps:$4 sm:$0xff]  }
 0x32c   : > { %4124 = vmatpush1.bf16.msra.mxu1 %v10362_v32  ;;  %4039 = vmatprep.subr.bf16.mxu0 %v10367_v33  ;;  %v10439_v32 = vld [vmem:[#allocation12 + $0x864] ss:$48 sps:$4 sm:$0xff]  }
 0x32d   : > { %4125 = vmatprep.subr.bf16.mxu1 %v10370_v34 }
 0x32f   : > { %4040 = vmatpush1.bf16.msra.mxu0 %v10365_v35  ;;  %v1702_v35 = vrot.slane %v11936_v20, %v11942_v25 }
 0x330   : > { %4126 = vmatpush1.bf16.msra.mxu1 %v10368_v36  ;;  %4041 = vmatprep.subr.bf16.mxu0 %v10373_v37  ;;  %v1710_v36 = vrot.slane %v11936_v20, %v11945_v26  ;;  %v10442_v37 = vld [vmem:[#allocation12 + $0x86c] ss:$48 sps:$4 sm:$0xff]  }
 0x331   : > { %4127 = vmatprep.subr.bf16.mxu1 %v10376_v41 }
 0x333   : > { %4042 = vmatpush1.bf16.msra.mxu0 %v10371_v43 }
 0x334   : > { %4128 = vmatpush1.bf16.msra.mxu1 %v10374_v44  ;;  %4043 = vmatprep.subr.bf16.mxu0 %v10379_v45 }
 0x335   : > { %4129 = vmatprep.subr.bf16.mxu1 %v10382_v46 }
 0x337   : > { %4044 = vmatpush1.bf16.msra.mxu0 %v10377_v47  ;;  %v10437_v47 = vld [vmem:[#allocation12 + $0x860] ss:$48 sps:$4 sm:$0xff]  }
 0x338   : > { %4130 = vmatpush1.bf16.msra.mxu1 %v10380_v48  ;;  %4045 = vmatprep.subr.bf16.mxu0 %v10385_v49 }
 0x339   : > { %4131 = vmatprep.subr.bf16.mxu1 %v10388_v50 }
 0x33b   : > { %4046 = vmatpush1.bf16.msra.mxu0 %v10383_v51 }
 0x33c   : > { %4132 = vmatpush1.bf16.msra.mxu1 %v10386_v52  ;;  %4047 = vmatprep.subr.bf16.mxu0 %v10391_v53  ;;  %v10440_v53 = vld [vmem:[#allocation12 + $0x868] ss:$48 sps:$4 sm:$0xff]  }
 0x33d   : > { %4133 = vmatprep.subr.bf16.mxu1 %v10394_v54  ;;  %v10445_v54 = vld [vmem:[#allocation12 + $0x8c4] ss:$48 sps:$4 sm:$0xff]  }
 0x33f   : > { %4048 = vmatpush1.bf16.msra.mxu0 %v10389_v55 }
 0x340   : > { %4134 = vmatpush1.bf16.msra.mxu1 %v10392_v56  ;;  %4049 = vmatprep.subr.bf16.mxu0 %v10397_v57 }
 0x341   : > { %4135 = vmatprep.subr.bf16.mxu1 %v10400_v58 }
 0x343   : > { %4050 = vmatpush1.bf16.msra.mxu0 %v10395_v59  ;;  %v10448_v59 = vld [vmem:[#allocation12 + $0x8cc] ss:$48 sps:$4 sm:$0xff]  }
 0x344   : > { %4136 = vmatpush1.bf16.msra.mxu1 %v10398_v62  ;;  %4062 = vmatprep.subr.bf16.mxu0 %v10403_v63 }
 0x345   : > { %4148 = vmatprep.subr.bf16.mxu1 %v10406_v2 }
 0x346   : > { %4052 = vmatmul.mubr.bf16.vlgmr.msra.gmra.mrb[12].mxu0 %v11898_v61 }
 0x347   : > { %4138 = vmatmul.mubr.bf16.vlgmr.msra.gmra.mrb[12].mxu1 %v11898_v61  ;;  %4063 = vmatpush1.bf16.msra.mxu0 %v10401_v3  ;;  %v10424_v61 = vld [vmem:[#allocation12 + $0x74c] ss:$48 sps:$4 sm:$0xff]  }
 0x348   : > { %4094 = vmatprep.mubr.bf16.mxu0 %v11916_v23  ;;  %4149 = vmatpush1.bf16.msra.mxu1 %v10404_v4  ;;  %v10443_v4 = vld [vmem:[#allocation12 + $0x8c0] ss:$48 sps:$4 sm:$0xff]  }
 0x349   : > { %4180 = vmatprep.mubr.bf16.mxu1 %v11916_v23  ;;  %4064 = vmatprep.subr.bf16.mxu0 %v10409_v5  ;;  %v10425_v23 = vld [vmem:[#allocation12 + $0x7a0] ss:$48 sps:$4 sm:$0xff]   ;;  %v10446_v5 = vld [vmem:[#allocation12 + $0x8c8] ss:$48 sps:$4 sm:$0xff]  }
 0x34a   : > { %4150 = vmatprep.subr.bf16.mxu1 %v10412_v6  ;;  %v10451_v6 = vld [vmem:[#allocation12 + $0x924] ss:$48 sps:$4 sm:$0xff]  }
 0x34b   : > { %4065 = vmatpush1.bf16.msra.mxu0 %v10407_v7  ;;  %v10454_v7 = vld [vmem:[#allocation12 + $0x92c] ss:$48 sps:$4 sm:$0xff]  }
 0x34c   : > { %4151 = vmatpush1.bf16.msra.mxu1 %v10410_v1  ;;  %4066 = vmatprep.subr.bf16.mxu0 %v10415_v8  ;;  %v10449_v1 = vld [vmem:[#allocation12 + $0x920] ss:$48 sps:$4 sm:$0xff]   ;;  %v10452_v8 = vld [vmem:[#allocation12 + $0x928] ss:$48 sps:$4 sm:$0xff]  }
 0x34d   : > { %4152 = vmatprep.subr.bf16.mxu1 %v10418_v9  ;;  %v10457_v9 = vld [vmem:[#allocation12 + $0x984] ss:$48 sps:$4 sm:$0xff]  }
 0x34f   : > { %4067 = vmatpush1.bf16.msra.mxu0 %v10413_v10  ;;  %v10460_v10 = vld [vmem:[#allocation12 + $0x98c] ss:$48 sps:$4 sm:$0xff]  }
 0x350   : > { %4153 = vmatpush1.bf16.msra.mxu1 %v10416_v11  ;;  %4068 = vmatprep.subr.bf16.mxu0 %v10421_v12  ;;  %v10455_v11 = vld [vmem:[#allocation12 + $0x980] ss:$48 sps:$4 sm:$0xff]   ;;  %v10458_v12 = vld [vmem:[#allocation12 + $0x988] ss:$48 sps:$4 sm:$0xff]  }
 0x351   : > { %4154 = vmatprep.subr.bf16.mxu1 %v10424_v61  ;;  %v10463_v61 = vld [vmem:[#allocation12 + $0x9e4] ss:$48 sps:$4 sm:$0xff]  }
 0x353   : > { %4069 = vmatpush1.bf16.msra.mxu0 %v10419_v13  ;;  %v10466_v13 = vld [vmem:[#allocation12 + $0x9ec] ss:$48 sps:$4 sm:$0xff]  }
 0x354   : > { %4155 = vmatpush1.bf16.msra.mxu1 %v10422_v14  ;;  %4070 = vmatprep.subr.bf16.mxu0 %v10427_v15  ;;  %v10461_v14 = vld [vmem:[#allocation12 + $0x9e0] ss:$48 sps:$4 sm:$0xff]   ;;  %v10464_v15 = vld [vmem:[#allocation12 + $0x9e8] ss:$48 sps:$4 sm:$0xff]  }
 0x355   : > { %4156 = vmatprep.subr.bf16.mxu1 %v10430_v16  ;;  %v10469_v16 = vld [vmem:[#allocation12 + $0xa44] ss:$48 sps:$4 sm:$0xff]  }
 0x357   : > { %4071 = vmatpush1.bf16.msra.mxu0 %v10425_v23  ;;  %v10472_v23 = vld [vmem:[#allocation12 + $0xa4c] ss:$48 sps:$4 sm:$0xff]  }
 0x358   : > { %4157 = vmatpush1.bf16.msra.mxu1 %v10428_v17  ;;  %4072 = vmatprep.subr.bf16.mxu0 %v10433_v24  ;;  %v10467_v17 = vld [vmem:[#allocation12 + $0xa40] ss:$48 sps:$4 sm:$0xff]   ;;  %v10470_v24 = vld [vmem:[#allocation12 + $0xa48] ss:$48 sps:$4 sm:$0xff]  }
 0x359   : > { %v3752_v33 = vpop.f32.mrb[4].mxu0  ;;  %v3838_v34 = vpop.f32.mrb[4].mxu1  ;;  %4158 = vmatprep.subr.bf16.mxu1 %v10436_v27  ;;  %v10475_v27 = vld [vmem:[#allocation12 + $0xaa4] ss:$48 sps:$4 sm:$0xff]  }
 0x35a   : > { %v3754_v41 = vpop.f32.mrb[5].mxu0  ;;  %v3840_v43 = vpop.f32.mrb[5].mxu1  ;;  %v9551_v44 = vadd.f32 %v3752_v33, %v1698_v28  ;;  %v9555_v48 = vadd.f32 %v3838_v34, %v1706_v30  ;;  %v10479_v33 = vld [vmem:[#allocation12 + $0xb00] ss:$48 sps:$4 sm:$0xff]   ;;  %v10482_v34 = vld [vmem:[#allocation12 + $0xb08] ss:$48 sps:$4 sm:$0xff]  }
 0x35b   : > { %v3756_v45 = vpop.f32.mrb[6].mxu0  ;;  %v3842_v46 = vpop.f32.mrb[6].mxu1  ;;  %4073 = vmatpush1.bf16.msra.mxu0 %v10431_v29  ;;  %v9552_v55 = vadd.f32 %v3754_v41, %v1702_v35  ;;  %v9556_v56 = vadd.f32 %v3840_v43, %v1710_v36  ;;  %v10473_v29 = vld [vmem:[#allocation12 + $0xaa0] ss:$48 sps:$4 sm:$0xff]   ;;  %v10488_v41 = vld [vmem:[#allocation12 + $0xb68] ss:$48 sps:$4 sm:$0xff]  }
 0x35c   : > { %v9553_v49 = vadd.f32 %v3756_v45, %v1698_v28  ;;  %v9557_v50 = vadd.f32 %v3842_v46, %v1706_v30  ;;  %4159 = vmatpush1.bf16.msra.mxu1 %v10434_v31  ;;  %v3758_v51 = vpop.f32.mrb[7].mxu0  ;;  %v3844_v52 = vpop.f32.mrb[7].mxu1  ;;  %4074 = vmatprep.subr.bf16.mxu0 %v10439_v32  ;;  %v10478_v28 = vld [vmem:[#allocation12 + $0xaac] ss:$48 sps:$4 sm:$0xff]   ;;  %v10476_v30 = vld [vmem:[#allocation12 + $0xaa8] ss:$48 sps:$4 sm:$0xff]  }
 0x35d   : > { %v9554_v57 = vadd.f32 %v3758_v51, %v1702_v35  ;;  %v9558_v58 = vadd.f32 %v3844_v52, %v1710_v36  ;;  %4160 = vmatprep.subr.bf16.mxu1 %v10442_v37  ;;  %v10481_v31 = vld [vmem:[#allocation12 + $0xb04] ss:$48 sps:$4 sm:$0xff]   ;;  %v10484_v32 = vld [vmem:[#allocation12 + $0xb0c] ss:$48 sps:$4 sm:$0xff]   ;;  %v10485_v37 = vld [vmem:[#allocation12 + $0xb60] ss:$48 sps:$4 sm:$0xff]   ;;  %v1714_v51 = vrot.slane %v11936_v20, %v11888_v42 }
 0x35e   : > { %v11955_v62 = vpack.c.bf16 %v9553_v49, %v9551_v44  ;;  %v11957_v63 = vpack.c.bf16 %v9557_v50, %v9555_v48  ;;  %v10487_v35 = vld [vmem:[#allocation12 + $0xb64] ss:$48 sps:$4 sm:$0xff]   ;;  %v10490_v36 = vld [vmem:[#allocation12 + $0xb6c] ss:$48 sps:$4 sm:$0xff]   ;;  %v10491_v45 = vld [vmem:[#allocation12 + $0xbc0] ss:$48 sps:$4 sm:$0xff]  }
 0x35f   : > { %v11959_v2 = vpack.c.bf16 %v9554_v57, %v9552_v55  ;;  %v11961_v3 = vpack.c.bf16 %v9558_v58, %v9556_v56  ;;  %4075 = vmatpush1.bf16.msra.mxu0 %v10437_v47  ;;  %v10493_v43 = vld [vmem:[#allocation12 + $0xbc4] ss:$48 sps:$4 sm:$0xff]   ;;  %v10496_v44 = vld [vmem:[#allocation12 + $0xbcc] ss:$48 sps:$4 sm:$0xff]   ;;  %v10494_v46 = vld [vmem:[#allocation12 + $0xbc8] ss:$48 sps:$4 sm:$0xff]  }
 0x360   : > { %4161 = vmatpush1.bf16.msra.mxu1 %v10440_v53  ;;  %4076 = vmatprep.subr.bf16.mxu0 %v10445_v54  ;;  %v11510_v47 = vmov 0.0   ;;  %v11972_v48 = vsub.s32 6, %v11882_v39  ;;  %v11975_v49 = vsub.s32 5, %v11882_v39  ;;  %v11978_v50 = vsub.s32 7, %v11882_v39 }
 0x361   : > { %4162 = vmatprep.subr.bf16.mxu1 %v10448_v59 }
 0x362   : > { %v1722_v52 = vrot.slane %v11936_v20, %v11972_v48  ;;  %v1718_v53 = vrot.slane %v11936_v20, %v11975_v49  ;;  %v1726_v56 = vrot.slane %v11936_v20, %v11978_v50 }
 0x363   : > { %4077 = vmatpush1.bf16.msra.mxu0 %v10443_v4 }
 0x364   : > { %4163 = vmatpush1.bf16.msra.mxu1 %v10446_v5  ;;  %4078 = vmatprep.subr.bf16.mxu0 %v10451_v6 }
 0x365   : > { %4164 = vmatprep.subr.bf16.mxu1 %v10454_v7 }
 0x367   : > { %4079 = vmatpush1.bf16.msra.mxu0 %v10449_v1 }
 0x368   : > { %4165 = vmatpush1.bf16.msra.mxu1 %v10452_v8  ;;  %4080 = vmatprep.subr.bf16.mxu0 %v10457_v9 }
 0x369   : > { %4166 = vmatprep.subr.bf16.mxu1 %v10460_v10 }
 0x36b   : > { %4081 = vmatpush1.bf16.msra.mxu0 %v10455_v11 }
 0x36c   : > { %4167 = vmatpush1.bf16.msra.mxu1 %v10458_v12  ;;  %4082 = vmatprep.subr.bf16.mxu0 %v10463_v61 }
 0x36d   : > { %4168 = vmatprep.subr.bf16.mxu1 %v10466_v13 }
 0x36f   : > { %4083 = vmatpush1.bf16.msra.mxu0 %v10461_v14 }
 0x370   : > { %4169 = vmatpush1.bf16.msra.mxu1 %v10464_v15  ;;  %4084 = vmatprep.subr.bf16.mxu0 %v10469_v16 }
 0x371   : > { %4170 = vmatprep.subr.bf16.mxu1 %v10472_v23  ;;  %v1692_v23 = vld [vmem:[#allocation18 + $0x8] sm:$0xf] }
 0x373   : > { %4085 = vmatpush1.bf16.msra.mxu0 %v10467_v17  ;;  %v1734_v17 = vrot.slane %v1692_v23, %v11942_v25 }
 0x374   : > { %4171 = vmatpush1.bf16.msra.mxu1 %v10470_v24  ;;  %4086 = vmatprep.subr.bf16.mxu0 %v10475_v27  ;;  %v1742_v24 = vrot.slane %v1692_v23, %v11945_v26 }
 0x375   : > { %4172 = vmatprep.subr.bf16.mxu1 %v10478_v28  ;;  %v1730_v28 = vrot.slane %v1692_v23, %v11885_v40 }
 0x377   : > { %4087 = vmatpush1.bf16.msra.mxu0 %v10473_v29 }
 0x378   : > { %4173 = vmatpush1.bf16.msra.mxu1 %v10476_v30  ;;  %4088 = vmatprep.subr.bf16.mxu0 %v10481_v31 }
 0x379   : > { %4174 = vmatprep.subr.bf16.mxu1 %v10484_v32 }
 0x37b   : > { %4089 = vmatpush1.bf16.msra.mxu0 %v10479_v33 }
 0x37c   : > { %4175 = vmatpush1.bf16.msra.mxu1 %v10482_v34  ;;  %4090 = vmatprep.subr.bf16.mxu0 %v10487_v35 }
 0x37d   : > { %4176 = vmatprep.subr.bf16.mxu1 %v10490_v36 }
 0x37f   : > { %4091 = vmatpush1.bf16.msra.mxu0 %v10485_v37 }
 0x380   : > { %4177 = vmatpush1.bf16.msra.mxu1 %v10488_v41  ;;  %4092 = vmatprep.subr.bf16.mxu0 %v10493_v43 }
 0x381   : > { %4178 = vmatprep.subr.bf16.mxu1 %v10496_v44 }
 0x383   : > { %4093 = vmatpush1.bf16.msra.mxu0 %v10491_v45 }
 0x384   : > { %4179 = vmatpush1.bf16.msra.mxu1 %v10494_v46  ;;  %9447 = vmatprep.subr.bf16.mxu0 %v11510_v47 }
 0x385   : > { %9453 = vmatprep.subr.bf16.mxu1 %v11510_v47 }
 0x386   : > { %4095 = vmatmul.mubr.bf16.vlgmr.msra.gmra.mrb[12].mxu0 %v11912_v19 }
 0x387   : > { %4181 = vmatmul.mubr.bf16.vlgmr.msra.gmra.mrb[12].mxu1 %v11912_v19  ;;  %9449 = vmatprep.mubr.msk.bf16.mxu0 %vm11511_vm0, %v11510_v47 }
 0x388   : > { %9455 = vmatprep.mubr.msk.bf16.mxu1 %vm11511_vm0, %v11510_v47 }
 0x3d9   : > { %v3924_v19 = vpop.f32.mrb[8].mxu0 }
 0x3da   : > { %v4010_v54 = vpop.f32.mrb[8].mxu1  ;;  %v3926_v55 = vpop.f32.mrb[9].mxu0  ;;  %v9559_v59 = vadd.f32 %v3924_v19, %v1714_v51 }
 0x3db   : > { %v4012_v57 = vpop.f32.mrb[9].mxu1  ;;  %v3928_v58 = vpop.f32.mrb[10].mxu0  ;;  %v9563_v42 = vadd.f32 %v4010_v54, %v1722_v52  ;;  %v9560_v7 = vadd.f32 %v3926_v55, %v1718_v53 }
 0x3dc   : > { %v9561_v4 = vadd.f32 %v3928_v58, %v1714_v51  ;;  %v4014_v5 = vpop.f32.mrb[10].mxu1  ;;  %v3930_v6 = vpop.f32.mrb[11].mxu0  ;;  %v9564_v10 = vadd.f32 %v4012_v57, %v1726_v56 }
 0x3dd   : > { %v9565_v1 = vadd.f32 %v4014_v5, %v1722_v52  ;;  %v9562_v8 = vadd.f32 %v3930_v6, %v1718_v53  ;;  %v4016_v9 = vpop.f32.mrb[11].mxu1 }
 0x3de   : > { %v9566_v11 = vadd.f32 %v4016_v9, %v1726_v56  ;;  %v4195_v12 = vpack.c.bf16 %v9561_v4, %v9559_v59 }
 0x3df   : > { %v4197_v61 = vpack.c.bf16 %v9565_v1, %v9563_v42  ;;  %v4196_v13 = vpack.c.bf16 %v9562_v8, %v9560_v7 }
 0x3e0   : > { %v11988_v14 = vpack.c.bf16 %v9566_v11, %v9564_v10  ;;  %4354 = vrot.lane.b32.xlu0 %v4195_v12, %s11512_s16  ;;  %v4222_v20 = vsel %vm4217_vm1, %v4195_v12, 0 }
 0x3e1   : > { %4639 = vrot.lane.b32.xlu1 %v4196_v13, %s11512_s16  ;;  %9448 = vmatpush3.bf16.xpose.msra.mxu0 %v4222_v20  ;;  %v4512_v35 = vsel %vm4217_vm1, %v4196_v13, 0  ;;  %v4794_v4 = vsel %vm4217_vm1, %v4197_v61, 0 }
 0x3e2   : > { %9459 = vmatprep.subr.bf16.mxu0 %v11510_v47  ;;  %v5076_v42 = vsel %vm4217_vm1, %v11988_v14, 0 }
 0x3e4   : > { %4351 = vrot.lane.b32.xlu0 %v11955_v62, %s11512_s16 }
 0x3e5   : > { %4636 = vrot.lane.b32.xlu1 %v11959_v2, %s11512_s16 }
 0x3e8   : > { %4921 = vrot.lane.b32.xlu0 %v4197_v61, %s11512_s16  ;;  %9450 = vmatmul.mubr.msk.bf16.vlgmr.msra.gmra.mrb[16].mxu0 %vm4217_vm1, %v11955_v62  ;;  %v1738_v62 = vrot.slane %v1692_v23, %v11939_v21 }
 0x3e9   : > { %4918 = vrot.lane.b32.xlu1 %v11957_v63, %s11512_s16  ;;  %9461 = vmatprep.mubr.msk.bf16.mxu0 %vm11511_vm0, %v11510_v47 }
 0x3ec   : > { %5203 = vrot.lane.b32.xlu0 %v11988_v14, %s11512_s16 }
 0x3ed   : > { %5200 = vrot.lane.b32.xlu1 %v11961_v3, %s11512_s16 }
 0x452   : > { %v4355_v15 = vpop.permute.xlu0 %4354 }
 0x453   : > { %v4360_v16 = vsel %vm4217_vm1, %v4355_v15, 0  ;;  %v4640_v55 = vpop.permute.xlu1 %4639 }
 0x454   : > { %9460 = vmatpush3.bf16.xpose.msra.mxu0 %v4360_v16  ;;  %v4645_v58 = vsel %vm4217_vm1, %v4640_v55, 0 }
 0x455   : > { %9471 = vmatprep.subr.bf16.mxu0 %v11510_v47 }
 0x456   : > { %v4352_v27 = vpop.permute.xlu0 %4351 }
 0x457   : > { %v4637_v59 = vpop.permute.xlu1 %4636 }
 0x459   : > { %v4096_v29 = vpop.f32.mrb[12].mxu0 }
 0x45a   : > { %v4182_v30 = vpop.f32.mrb[12].mxu1  ;;  %v4098_v31 = vpop.f32.mrb[13].mxu0  ;;  %v9567_v43 = vadd.f32 %v4096_v29, %v1730_v28 }
 0x45b   : > { %v9571_v32 = vadd.f32 %v4182_v30, %v1738_v62  ;;  %v9568_v33 = vadd.f32 %v4098_v31, %v1734_v17  ;;  %v4184_v34 = vpop.f32.mrb[13].mxu1  ;;  %9462 = vmatmul.mubr.msk.bf16.vlgmr.msra.gmra.mrb[20].mxu0 %vm4217_vm1, %v4352_v27  ;;  %v4100_v37 = vpop.f32.mrb[14].mxu0 }
 0x45c   : > { %v9572_v36 = vadd.f32 %v4184_v34, %v1742_v24  ;;  %v4186_v41 = vpop.f32.mrb[14].mxu1  ;;  %9472 = vmatpush3.bf16.xpose.msra.mxu0 %v4512_v35  ;;  %9473 = vmatprep.mubr.msk.bf16.mxu0 %vm11511_vm0, %v11510_v47  ;;  %v9569_v44 = vadd.f32 %v4100_v37, %v1730_v28  ;;  %v4102_v46 = vpop.f32.mrb[15].mxu0 }
 0x45d   : > { %v9573_v45 = vadd.f32 %v4186_v41, %v1738_v62  ;;  %9483 = vmatprep.subr.bf16.mxu0 %v11510_v47  ;;  %v9570_v51 = vadd.f32 %v4102_v46, %v1734_v17  ;;  %v4188_v19 = vpop.f32.mrb[15].mxu1  ;;  %v4922_v5 = vpop.permute.xlu0 %4921 }
 0x45e   : > { %v12020_v52 = vpack.c.bf16 %v9569_v44, %v9567_v43  ;;  %v9574_v54 = vadd.f32 %v4188_v19, %v1742_v24  ;;  %v4919_v6 = vpop.permute.xlu1 %4918 }
 0x45f   : > { %v12022_v53 = vpack.c.bf16 %v9573_v45, %v9571_v32  ;;  %v12024_v56 = vpack.c.bf16 %v9570_v51, %v9568_v33 }
 0x460   : > { %v12026_v57 = vpack.c.bf16 %v9574_v54, %v9572_v36  ;;  %9454 = vmatpush3.bf16.msra.mxu1 %v12020_v52 }
 0x461   : > { %9465 = vmatprep.subr.bf16.mxu1 %v11510_v47  ;;  %v5204_v7 = vpop.permute.xlu0 %5203 }
 0x462   : > { %v5201_v1 = vpop.permute.xlu1 %5200 }
 0x463   : > { %9474 = vmatmul.mubr.msk.bf16.vlgmr.msra.gmra.mrb[24].mxu0 %vm4217_vm1, %v11959_v2  ;;  %v4927_v2 = vsel %vm4217_vm1, %v4922_v5, 0 }
 0x464   : > { %9484 = vmatpush3.bf16.xpose.msra.mxu0 %v4645_v58  ;;  %9485 = vmatprep.mubr.msk.bf16.mxu0 %vm11511_vm0, %v11510_v47 }
 0x465   : > { %9495 = vmatprep.subr.bf16.mxu0 %v11510_v47 }
 0x46b   : > { %9486 = vmatmul.mubr.msk.bf16.vlgmr.msra.gmra.mrb[28].mxu0 %vm4217_vm1, %v4637_v59 }
 0x46c   : > { %9496 = vmatpush3.bf16.xpose.msra.mxu0 %v4794_v4  ;;  %9497 = vmatprep.mubr.msk.bf16.mxu0 %vm11511_vm0, %v11510_v47 }
 0x46d   : > { %9507 = vmatprep.subr.bf16.mxu0 %v11510_v47 }
 0x473   : > { %9498 = vmatmul.mubr.msk.bf16.vlgmr.msra.gmra.mrb[32].mxu0 %vm4217_vm1, %v11957_v63  ;;  %v5209_v63 = vsel %vm4217_vm1, %v5204_v7, 0 }
 0x474   : > { %9508 = vmatpush3.bf16.xpose.msra.mxu0 %v4927_v2  ;;  %9509 = vmatprep.mubr.msk.bf16.mxu0 %vm11511_vm0, %v11510_v47 }
 0x475   : > { %9519 = vmatprep.subr.bf16.mxu0 %v11510_v47 }
 0x47b   : > { %9510 = vmatmul.mubr.msk.bf16.vlgmr.msra.gmra.mrb[36].mxu0 %vm4217_vm1, %v4919_v6 }
 0x47c   : > { %9520 = vmatpush3.bf16.xpose.msra.mxu0 %v5076_v42  ;;  %9521 = vmatprep.mubr.msk.bf16.mxu0 %vm11511_vm0, %v11510_v47 }
 0x47d   : > { %9531 = vmatprep.subr.bf16.mxu0 %v11510_v47 }
 0x483   : > { %9522 = vmatmul.mubr.msk.bf16.vlgmr.msra.gmra.mrb[40].mxu0 %vm4217_vm1, %v11961_v3 }
 0x484   : > { %9532 = vmatpush3.bf16.xpose.msra.mxu0 %v5209_v63  ;;  %9533 = vmatprep.mubr.msk.bf16.mxu0 %vm11511_vm0, %v11510_v47 }
 0x48b   : > { %9534 = vmatmul.mubr.msk.bf16.vlgmr.msra.gmra.mrb[44].mxu0 %vm4217_vm1, %v5201_v1 }
 0x4bb   : > { %v4258_v8 = vpop.f32.mrb[16].mxu0 }
 0x4bc   : > { %v9451_v9 = vpop.f32.mrb[17].mxu0  ;;  %v4266_v10 = vsel %vm4265_vm2, %v4258_v8, -inf }
 0x4bd   : > { %4267 = vmax.xlane.f32.xlu0 %v4266_v10  ;;  %v4261_v11 = vpop.f32.mrb[18].mxu0 }
 0x4be   : > { %v9452_v12 = vpop.f32.mrb[19].mxu0  ;;  %v4269_v61 = vsel %vm4265_vm2, %v4261_v11, -inf }
 0x4bf   : > { %4270 = vmax.xlane.f32.xlu1 %v4269_v61 }
 0x52e   : > { %v12061_v13 = vpop.f32.mrb[20].mxu0 }
 0x52f   : > { %v9463_v3 = vpop.f32.mrb[21].mxu0  ;;  %v4403_v14 = vsel %vm4265_vm2, %v12061_v13, -inf }
 0x530   : > { %4404 = vmax.xlane.f32.xlu0 %v4403_v14  ;;  %v12065_v20 = vpop.f32.mrb[22].mxu0 }
 0x531   : > { %v9464_v15 = vpop.f32.mrb[23].mxu0  ;;  %v4406_v16 = vsel %vm4265_vm2, %v12065_v20, -inf }
 0x534   : > { %4407 = vmax.xlane.f32.xlu0 %v4406_v16 }
 0x536   : > { %v12069_v23 = vpop.f32.mrb[24].mxu0 }
 0x537   : > { %v9475_v62 = vpop.f32.mrb[25].mxu0  ;;  %v4555_v17 = vsel %vm4265_vm2, %v12069_v23, -inf }
 0x538   : > { %4556 = vmax.xlane.f32.xlu1 %v4555_v17  ;;  %v12073_v24 = vpop.f32.mrb[26].mxu0 }
 0x539   : > { %v9476_v27 = vpop.f32.mrb[27].mxu0  ;;  %v4558_v28 = vsel %vm4265_vm2, %v12073_v24, -inf }
 0x53a   : > { %4559 = vmax.xlane.f32.xlu0 %v4558_v28 }
 0x53e   : > { %v12077_v29 = vpop.f32.mrb[28].mxu0 }
 0x53f   : > { %v9487_v30 = vpop.f32.mrb[29].mxu0  ;;  %v4688_v31 = vsel %vm4265_vm2, %v12077_v29, -inf }
 0x540   : > { %4689 = vmax.xlane.f32.xlu1 %v4688_v31  ;;  %v12081_v32 = vpop.f32.mrb[30].mxu0 }
 0x541   : > { %v9488_v33 = vpop.f32.mrb[31].mxu0  ;;  %v4691_v34 = vsel %vm4265_vm2, %v12081_v32, -inf }
 0x542   : > { %4692 = vmax.xlane.f32.xlu0 %v4691_v34 }
 0x546   : > { %v12085_v35 = vpop.f32.mrb[32].mxu0 }
 0x547   : > { %v9499_v36 = vpop.f32.mrb[33].mxu0  ;;  %v4837_v37 = vsel %vm4265_vm2, %v12085_v35, -inf }
 0x548   : > { %4838 = vmax.xlane.f32.xlu1 %v4837_v37  ;;  %v12089_v41 = vpop.f32.mrb[34].mxu0 }
 0x549   : > { %v9500_v43 = vpop.f32.mrb[35].mxu0  ;;  %v4840_v44 = vsel %vm4265_vm2, %v12089_v41, -inf }
 0x54a   : > { %4841 = vmax.xlane.f32.xlu0 %v4840_v44  ;;  %v4268_v45 = vpop.xlane.xlu0 %4267 }
 0x54b   : > { %v4272_v51 = vsub.f32 %v4258_v8, %v4268_v45 }
 0x54c   : > { %v4271_v46 = vpop.xlane.xlu1 %4270 }
 0x54d   : > { %v4273_v58 = vsub.f32 %v4261_v11, %v4271_v46  ;;  %v4274_v2 = vmul.f32 1.442695, %v4272_v51 }
 0x54e   : > { %v12093_v19 = vpop.f32.mrb[36].mxu0 }
 0x54f   : > { %v9511_v54 = vpop.f32.mrb[37].mxu0  ;;  %v4970_v55 = vsel %vm4265_vm2, %v12093_v19, -inf  ;;  %v4276_v6 = vmul.f32 1.442695, %v4273_v58  ;;  %11074 = vpow2.f32 %v4274_v2 }
 0x550   : > { %4971 = vmax.xlane.f32.xlu1 %v4970_v55  ;;  %v12097_v59 = vpop.f32.mrb[38].mxu0 }
 0x551   : > { %v9512_v4 = vpop.f32.mrb[39].mxu0  ;;  %v4973_v5 = vsel %vm4265_vm2, %v12097_v59, -inf  ;;  %11076 = vpow2.f32 %v4276_v6 }
 0x552   : > { %4974 = vmax.xlane.f32.xlu0 %v4973_v5 }
 0x556   : > { %v12101_v42 = vpop.f32.mrb[40].mxu0 }
 0x557   : > { %v9523_v7 = vpop.f32.mrb[41].mxu0  ;;  %v5119_v63 = vsel %vm4265_vm2, %v12101_v42, -inf }
 0x558   : > { %5120 = vmax.xlane.f32.xlu1 %v5119_v63  ;;  %v12105_v1 = vpop.f32.mrb[42].mxu0 }
 0x559   : > { %v9524_v8 = vpop.f32.mrb[43].mxu0  ;;  %v5122_v9 = vsel %vm4265_vm2, %v12105_v1, -inf  ;;  %v12113_v61 = vpop.eup %11074 }
 0x55a   : > { %5123 = vmax.xlane.f32.xlu0 %v5122_v9  ;;  %v4278_v62 = vsel %vm4265_vm2, %v12113_v61, 0.0 }
 0x55b   : > { %v12119_v16 = vpop.eup %11076 }
 0x55c   : > { %v4281_v17 = vsel %vm4265_vm2, %v12119_v16, 0.0 }
 0x55e   : > { %v12109_v10 = vpop.f32.mrb[44].mxu0 }
 0x55f   : > { %v9535_v11 = vpop.f32.mrb[45].mxu0  ;;  %v5252_v12 = vsel %vm4265_vm2, %v12109_v10, -inf }
 0x560   : > { %5253 = vmax.xlane.f32.xlu1 %v5252_v12  ;;  %v12115_v3 = vpop.f32.mrb[46].mxu0 }
 0x561   : > { %v9536_v14 = vpop.f32.mrb[47].mxu0  ;;  %v5255_v15 = vsel %vm4265_vm2, %v12115_v3, -inf }
 0x562   : > { %5256 = vmax.xlane.f32.xlu0 %v5255_v15 }
 0x564   : > { %4279 = vadd.xlane.f32.xlu1 %v4278_v62 }
 0x566   : > { %4282 = vadd.xlane.f32.xlu0 %v4281_v17 }
 0x5bd   : > { %v4405_v27 = vpop.xlane.xlu0 %4404 }
 0x5be   : > { %v4409_v28 = vsub.f32 %v12061_v13, %v4405_v27 }
 0x5c0   : > { %v4411_v30 = vmul.f32 1.442695, %v4409_v28 }
 0x5c1   : > { %v4408_v31 = vpop.xlane.xlu0 %4407 }
 0x5c2   : > { %11078 = vpow2.f32 %v4411_v30  ;;  %v4410_v33 = vsub.f32 %v12065_v20, %v4408_v31 }
 0x5c4   : > { %v4413_v34 = vmul.f32 1.442695, %v4410_v33 }
 0x5c5   : > { %v4557_v36 = vpop.xlane.xlu1 %4556 }
 0x5c6   : > { %11080 = vpow2.f32 %v4413_v34  ;;  %v4561_v37 = vsub.f32 %v12069_v23, %v4557_v36 }
 0x5c7   : > { %v4560_v43 = vpop.xlane.xlu0 %4559 }
 0x5c8   : > { %v4563_v44 = vmul.f32 1.442695, %v4561_v37  ;;  %v4562_v45 = vsub.f32 %v12073_v24, %v4560_v43 }
 0x5ca   : > { %11082 = vpow2.f32 %v4563_v44  ;;  %v4565_v46 = vmul.f32 1.442695, %v4562_v45 }
 0x5cc   : > { %v12129_v51 = vpop.eup %11078  ;;  %11084 = vpow2.f32 %v4565_v46 }
 0x5cd   : > { %v4690_v13 = vpop.xlane.xlu1 %4689  ;;  %v4415_v54 = vsel %vm4265_vm2, %v12129_v51, 0.0 }
 0x5ce   : > { %v4694_v20 = vsub.f32 %v12077_v29, %v4690_v13  ;;  %4416 = vadd.xlane.f32.xlu1 %v4415_v54 }
 0x5cf   : > { %v4693_v55 = vpop.xlane.xlu0 %4692 }
 0x5d0   : > { %v12134_v58 = vpop.eup %11080  ;;  %v4696_v23 = vmul.f32 1.442695, %v4694_v20  ;;  %v4695_v4 = vsub.f32 %v12081_v32, %v4693_v55 }
 0x5d1   : > { %v4418_v24 = vsel %vm4265_vm2, %v12134_v58, 0.0 }
 0x5d2   : > { %11086 = vpow2.f32 %v4696_v23  ;;  %v4698_v5 = vmul.f32 1.442695, %v4695_v4  ;;  %4419 = vadd.xlane.f32.xlu0 %v4418_v24 }
 0x5d4   : > { %v12139_v2 = vpop.eup %11082  ;;  %11088 = vpow2.f32 %v4698_v5 }
 0x5d5   : > { %v4839_v6 = vpop.xlane.xlu1 %4838  ;;  %v4567_v29 = vsel %vm4265_vm2, %v12139_v2, 0.0 }
 0x5d6   : > { %v12143_v7 = vpop.eup %11084  ;;  %v4843_v63 = vsub.f32 %v12085_v35, %v4839_v6  ;;  %4568 = vadd.xlane.f32.xlu1 %v4567_v29 }
 0x5d7   : > { %v4842_v8 = vpop.xlane.xlu0 %4841  ;;  %v4570_v32 = vsel %vm4265_vm2, %v12143_v7, 0.0 }
 0x5d8   : > { %v4845_v9 = vmul.f32 1.442695, %v4843_v63  ;;  %v4844_v11 = vsub.f32 %v12089_v41, %v4842_v8  ;;  %4571 = vadd.xlane.f32.xlu0 %v4570_v32 }
 0x5da   : > { %11090 = vpow2.f32 %v4845_v9  ;;  %v4847_v12 = vmul.f32 1.442695, %v4844_v11 }
 0x5dc   : > { %v12149_v14 = vpop.eup %11086  ;;  %11092 = vpow2.f32 %v4847_v12 }
 0x5dd   : > { %v4972_v15 = vpop.xlane.xlu1 %4971  ;;  %v4700_v62 = vsel %vm4265_vm2, %v12149_v14, 0.0 }
 0x5de   : > { %v12153_v17 = vpop.eup %11088  ;;  %v4976_v35 = vsub.f32 %v12093_v19, %v4972_v15  ;;  %4701 = vadd.xlane.f32.xlu1 %v4700_v62 }
 0x5df   : > { %v4975_v27 = vpop.xlane.xlu0 %4974  ;;  %v4703_v28 = vsel %vm4265_vm2, %v12153_v17, 0.0 }
 0x5e0   : > { %v4978_v41 = vmul.f32 1.442695, %v4976_v35  ;;  %v4977_v30 = vsub.f32 %v12097_v59, %v4975_v27  ;;  %4704 = vadd.xlane.f32.xlu0 %v4703_v28 }
 0x5e2   : > { %11094 = vpow2.f32 %v4978_v41  ;;  %v4980_v31 = vmul.f32 1.442695, %v4977_v30 }
 0x5e4   : > { %v12159_v33 = vpop.eup %11090  ;;  %11096 = vpow2.f32 %v4980_v31 }
 0x5e5   : > { %v4849_v34 = vsel %vm4265_vm2, %v12159_v33, 0.0  ;;  %v5121_v59 = vpop.xlane.xlu1 %5120 }
 0x5e6   : > { %v12163_v36 = vpop.eup %11092  ;;  %4850 = vadd.xlane.f32.xlu1 %v4849_v34  ;;  %v5125_v31 = vsub.f32 %v12101_v42, %v5121_v59 }
 0x5e7   : > { %v5124_v19 = vpop.xlane.xlu0 %5123  ;;  %v4852_v37 = vsel %vm4265_vm2, %v12163_v36, 0.0 }
 0x5e8   : > { %v5126_v43 = vsub.f32 %v12105_v1, %v5124_v19  ;;  %4853 = vadd.xlane.f32.xlu0 %v4852_v37 }
 0x5ea   : > { %v5129_v44 = vmul.f32 1.442695, %v5126_v43 }
 0x5ec   : > { %v12168_v45 = vpop.eup %11094  ;;  %11098 = vpow2.f32 %v5129_v44 }
 0x5ed   : > { %v5254_v46 = vpop.xlane.xlu1 %5253  ;;  %v4982_v13 = vsel %vm4265_vm2, %v12168_v45, 0.0 }
 0x5ee   : > { %v12172_v54 = vpop.eup %11096  ;;  %v5258_v20 = vsub.f32 %v12109_v10, %v5254_v46  ;;  %4983 = vadd.xlane.f32.xlu1 %v4982_v13 }
 0x5ef   : > { %v5257_v55 = vpop.xlane.xlu0 %5256  ;;  %v4985_v23 = vsel %vm4265_vm2, %v12172_v54, 0.0 }
 0x5f0   : > { %v5260_v1 = vmul.f32 1.442695, %v5258_v20  ;;  %v5259_v4 = vsub.f32 %v12115_v3, %v5257_v55  ;;  %4986 = vadd.xlane.f32.xlu0 %v4985_v23 }
 0x5f1   : > { %v4280_v24 = vpop.xlane.xlu1 %4279 }
 0x5f2   : > { %11100 = vpow2.f32 %v5260_v1  ;;  %v5262_v5 = vmul.f32 1.442695, %v5259_v4 }
 0x5f3   : > { %11102 = vrcp.f32 %v4280_v24  ;;  %v4283_v6 = vpop.xlane.xlu0 %4282 }
 0x5f4   : > { %11104 = vpow2.f32 %v5262_v5 }
 0x5f5   : > { %11106 = vrcp.f32 %v4283_v6 }
 0x5f6   : > { %v12178_v29 = vpop.eup %11098 }
 0x5f7   : > { %v5134_v10 = vsel %vm4265_vm2, %v12178_v29, 0.0 }
 0x5f8   : > { %5135 = vadd.xlane.f32.xlu0 %v5134_v10 }
 0x5fc   : > { %v12182_v63 = vpop.eup %11100 }
 0x5fd   : > { %v11103_v8 = vpop.eup %11102  ;;  %v5264_v3 = vsel %vm4265_vm2, %v12182_v63, 0.0 }
 0x5fe   : > { %v12186_v32 = vpop.eup %11104  ;;  %v4285_v9 = vmul.f32 %v11103_v8, %v12113_v61  ;;  %5265 = vadd.xlane.f32.xlu0 %v5264_v3 }
 0x5ff   : > { %v11107_v11 = vpop.eup %11106  ;;  %4438 = vrot.lane.b32.xlu1 %v12020_v52, %s11512_s16  ;;  %v5267_v15 = vsel %vm4265_vm2, %v12186_v32, 0.0  ;;  %v5127_v52 = vmul.f32 1.442695, %v5125_v31 }
 0x600   : > { %v4287_v12 = vmul.f32 %v11107_v11, %v12119_v16  ;;  %v4288_v62 = vsel %vm4265_vm2, %v4285_v9, 0.0 }
 0x601   : > { %11108 = vpow2.f32 %v5127_v52 }
 0x602   : > { %v4289_v35 = vsel %vm4265_vm2, %v4287_v12, 0.0  ;;  %5268 = vadd.xlane.f32.xlu0 %v5267_v15 }
 0x603   : > { %v4290_v27 = vadd.f32 %v4289_v35, %v4288_v62 }
 0x605   : > { %v4291_v28 = vrot.slane %v4290_v27, 4 }
 0x607   : > { %v4292_v41 = vadd.f32 %v4291_v28, %v4290_v27 }
 0x609   : > { %v4293_v30 = vrot.slane %v4292_v41, 2 }
 0x60b   : > { %v4294_v61 = vadd.f32 %v4293_v30, %v4292_v41  ;;  %v12202_v43 = vpop.eup %11108 }
 0x60c   : > { %v5131_v44 = vsel %vm4265_vm2, %v12202_v43, 0.0 }
 0x60d   : > { %v4295_v34 = vrot.slane %v4294_v61, 1 }
 0x60f   : > { %v4296_v19 = vadd.f32 %v4295_v34, %v4294_v61 }
 0x611   : > { %v4297_v37 = vmul.f32 0.0625, %v4296_v19 }
 0x613   : > { %v4298_v16 = vpack.c.bf16 %v4297_v37, %v4297_v37 }
 0x615   : > { %9456 = vmatmul.mubr.msk.bf16.vlgmr.msra.gmra.mrb[16].mxu1 %vm4265_vm2, %v4298_v16 }
 0x616   : > { %9467 = vmatprep.mubr.msk.bf16.mxu1 %vm11511_vm0, %v11510_v47 }
 0x618   : > { %4723 = vrot.lane.b32.xlu0 %v12024_v56, %s11512_s16 }
 0x623   : > { %5132 = vadd.xlane.f32.xlu1 %v5131_v44 }
 0x634   : > { %5005 = vrot.lane.b32.xlu1 %v12022_v53, %s11512_s16 }
 0x638   : > { %5287 = vrot.lane.b32.xlu1 %v12026_v57, %s11512_s16 }
 0x65b   : > { %v4417_v42 = vpop.xlane.xlu1 %4416 }
 0x65c   : > { %11110 = vrcp.f32 %v4417_v42 }
 0x65f   : > { %v4420_v59 = vpop.xlane.xlu0 %4419 }
 0x660   : > { %11112 = vrcp.f32 %v4420_v59 }
 0x663   : > { %v4569_v46 = vpop.xlane.xlu1 %4568 }
 0x664   : > { %11114 = vrcp.f32 %v4569_v46 }
 0x665   : > { %v4572_v13 = vpop.xlane.xlu0 %4571 }
 0x666   : > { %v11111_v20 = vpop.eup %11110  ;;  %11116 = vrcp.f32 %v4572_v13 }
 0x667   : > { %v4422_v55 = vmul.f32 %v11111_v20, %v12129_v51 }
 0x669   : > { %v4425_v24 = vsel %vm4265_vm2, %v4422_v55, 0.0 }
 0x66a   : > { %v11113_v23 = vpop.eup %11112 }
 0x66b   : > { %v4424_v1 = vmul.f32 %v11113_v23, %v12134_v58  ;;  %v4702_v4 = vpop.xlane.xlu1 %4701 }
 0x66c   : > { %11118 = vrcp.f32 %v4702_v4 }
 0x66d   : > { %v4426_v5 = vsel %vm4265_vm2, %v4424_v1, 0.0  ;;  %v4705_v6 = vpop.xlane.xlu0 %4704 }
 0x66e   : > { %v11115_v10 = vpop.eup %11114  ;;  %v4427_v8 = vadd.f32 %v4426_v5, %v4425_v24  ;;  %11120 = vrcp.f32 %v4705_v6 }
 0x66f   : > { %v4574_v3 = vmul.f32 %v11115_v10, %v12139_v2 }
 0x670   : > { %v11117_v9 = vpop.eup %11116  ;;  %v4428_v11 = vrot.slane %v4427_v8, 4 }
 0x671   : > { %v4576_v12 = vmul.f32 %v11117_v9, %v12143_v7  ;;  %v4577_v15 = vsel %vm4265_vm2, %v4574_v3, 0.0 }
 0x672   : > { %v4429_v51 = vadd.f32 %v4428_v11, %v4427_v8 }
 0x673   : > { %v4578_v58 = vsel %vm4265_vm2, %v4576_v12, 0.0  ;;  %v4851_v62 = vpop.xlane.xlu1 %4850 }
 0x674   : > { %v4579_v35 = vadd.f32 %v4578_v58, %v4577_v15  ;;  %11122 = vrcp.f32 %v4851_v62  ;;  %v4430_v27 = vrot.slane %v4429_v51, 2 }
 0x675   : > { %v4854_v28 = vpop.xlane.xlu0 %4853 }
 0x676   : > { %v11119_v41 = vpop.eup %11118  ;;  %v4580_v30 = vrot.slane %v4579_v35, 4  ;;  %11124 = vrcp.f32 %v4854_v28  ;;  %v4431_v61 = vadd.f32 %v4430_v27, %v4429_v51 }
 0x677   : > { %v4707_v2 = vmul.f32 %v11119_v41, %v12149_v14 }
 0x678   : > { %v11121_v31 = vpop.eup %11120  ;;  %v4581_v34 = vadd.f32 %v4580_v30, %v4579_v35  ;;  %v4432_v19 = vrot.slane %v4431_v61, 1 }
 0x679   : > { %v4709_v7 = vmul.f32 %v11121_v31, %v12153_v17  ;;  %v4710_v16 = vsel %vm4265_vm2, %v4707_v2, 0.0 }
 0x67a   : > { %v4433_v52 = vadd.f32 %v4432_v19, %v4431_v61  ;;  %v4582_v37 = vrot.slane %v4581_v34, 2 }
 0x67b   : > { %v4711_v44 = vsel %vm4265_vm2, %v4709_v7, 0.0  ;;  %v4984_v42 = vpop.xlane.xlu1 %4983 }
 0x67c   : > { %v4712_v59 = vadd.f32 %v4711_v44, %v4710_v16  ;;  %v4583_v46 = vadd.f32 %v4582_v37, %v4581_v34  ;;  %v4434_v13 = vmul.f32 0.0625, %v4433_v52 }
 0x67d   : > { %v4987_v1 = vpop.xlane.xlu0 %4986 }
 0x67e   : > { %v11123_v20 = vpop.eup %11122  ;;  %v4713_v55 = vrot.slane %v4712_v59, 4  ;;  %v4584_v23 = vrot.slane %v4583_v46, 1  ;;  %v4435_v6 = vpack.c.bf16 %v4434_v13, %v4434_v13  ;;  %11126 = vrcp.f32 %v4987_v1 }
 0x67f   : > { %v4856_v14 = vmul.f32 %v11123_v20, %v12159_v33  ;;  %v4439_v4 = vpop.permute.xlu1 %4438  ;;  %11128 = vrcp.f32 %v4984_v42 }
 0x680   : > { %v11125_v24 = vpop.eup %11124  ;;  %v4714_v5 = vadd.f32 %v4713_v55, %v4712_v59  ;;  %9466 = vmatpush3.bf16.msra.mxu1 %v4439_v4  ;;  %v4585_v10 = vadd.f32 %v4584_v23, %v4583_v46 }
 0x681   : > { %v4858_v17 = vmul.f32 %v11125_v24, %v12163_v36  ;;  %9477 = vmatprep.subr.bf16.mxu1 %v11510_v47  ;;  %v4859_v3 = vsel %vm4265_vm2, %v4856_v14, 0.0 }
 0x682   : > { %v4715_v8 = vrot.slane %v4714_v5, 2  ;;  %v4586_v36 = vmul.f32 0.0625, %v4585_v10 }
 0x683   : > { %v4860_v9 = vsel %vm4265_vm2, %v4858_v17, 0.0  ;;  %9468 = vmatmul.mubr.msk.bf16.vlgmr.msra.gmra.mrb[20].mxu1 %vm4265_vm2, %v4435_v6 }
 0x684   : > { %v4861_v33 = vadd.f32 %v4860_v9, %v4859_v3  ;;  %9478 = vmatpush3.bf16.msra.mxu1 %v12024_v56  ;;  %9479 = vmatprep.mubr.msk.bf16.mxu1 %vm11511_vm0, %v11510_v47  ;;  %v4716_v11 = vadd.f32 %v4715_v8, %v4714_v5  ;;  %v4587_v58 = vpack.c.bf16 %v4586_v36, %v4586_v36 }
 0x685   : > { %9489 = vmatprep.subr.bf16.mxu1 %v11510_v47  ;;  %v5136_v51 = vpop.xlane.xlu0 %5135 }
 0x686   : > { %v4862_v12 = vrot.slane %v4861_v33, 4  ;;  %v4717_v62 = vrot.slane %v4716_v11, 1 }
 0x688   : > { %v4863_v15 = vadd.f32 %v4862_v12, %v4861_v33  ;;  %v11127_v28 = vpop.eup %11126  ;;  %v4718_v56 = vadd.f32 %v4717_v62, %v4716_v11 }
 0x689   : > { %v11129_v30 = vpop.eup %11128  ;;  %v4991_v61 = vmul.f32 %v11127_v28, %v12172_v54 }
 0x68a   : > { %v4864_v35 = vrot.slane %v4863_v15, 2  ;;  %v4989_v31 = vmul.f32 %v11129_v30, %v12168_v45  ;;  %v4719_v34 = vmul.f32 0.0625, %v4718_v56 }
 0x68b   : > { %9480 = vmatmul.mubr.msk.bf16.vlgmr.msra.gmra.mrb[24].mxu1 %vm4265_vm2, %v4587_v58  ;;  %v5266_v27 = vpop.xlane.xlu0 %5265  ;;  %v4993_v7 = vsel %vm4265_vm2, %v4991_v61, 0.0 }
 0x68c   : > { %9491 = vmatprep.mubr.msk.bf16.mxu1 %vm11511_vm0, %v11510_v47  ;;  %v4865_v41 = vadd.f32 %v4864_v35, %v4863_v15  ;;  %v4992_v37 = vsel %vm4265_vm2, %v4989_v31, 0.0  ;;  %v4720_v16 = vpack.c.bf16 %v4719_v34, %v4719_v34 }
 0x68d   : > { %v4994_v42 = vadd.f32 %v4993_v7, %v4992_v37 }
 0x68e   : > { %v4866_v19 = vrot.slane %v4865_v41, 1 }
 0x68f   : > { %v5269_v2 = vpop.xlane.xlu0 %5268  ;;  %v4995_v54 = vrot.slane %v4994_v42, 4 }
 0x690   : > { %v4867_v44 = vadd.f32 %v4866_v19, %v4865_v41  ;;  %11130 = vrcp.f32 %v5269_v2  ;;  %v10587_v19 = vld [vmem:[#allocation14 + $0x1e0] ss:$16 sps:$4 sm:$0xff]  }
 0x691   : > { %v4996_v46 = vadd.f32 %v4995_v54, %v4994_v42  ;;  %11132 = vrcp.f32 %v5266_v27 }
 0x692   : > { %v4868_v45 = vmul.f32 0.0625, %v4867_v44  ;;  %11134 = vrcp.f32 %v5136_v51  ;;  %v11513_v44 = vmov 1966171168  }
 0x693   : > { %v4724_v52 = vpop.permute.xlu0 %4723  ;;  %v4997_v13 = vrot.slane %v4996_v46, 2  ;;  %v4486_v42 = vunpack.c.l.s4 %v11513_v44  ;;  %v10533_v44 = vld [vmem:[#allocation14 + $0xc0] ss:$16 sps:$4 sm:$0xff]  }
 0x694   : > { %9490 = vmatpush3.bf16.msra.mxu1 %v4724_v52  ;;  %v4869_v59 = vpack.c.bf16 %v4868_v45, %v4868_v45 }
 0x695   : > { %9501 = vmatprep.subr.bf16.mxu1 %v11510_v47  ;;  %v4998_v20 = vadd.f32 %v4997_v13, %v4996_v46  ;;  %v4487_v45 = vunpack.c.0.s8 %v4486_v42  ;;  %v10536_v42 = vld [vmem:[#allocation14 + $0x2c0] ss:$16 sps:$4 sm:$0xff]  }
 0x697   : > { %9492 = vmatmul.mubr.msk.bf16.vlgmr.msra.gmra.mrb[28].mxu1 %vm4265_vm2, %v4720_v16  ;;  %v4999_v55 = vrot.slane %v4998_v20, 1 }
 0x698   : > { %9502 = vmatpush3.bf16.msra.mxu1 %v12022_v53  ;;  %9503 = vmatprep.mubr.msk.bf16.mxu1 %vm11511_vm0, %v11510_v47 }
 0x699   : > { %9513 = vmatprep.subr.bf16.mxu1 %v11510_v47  ;;  %v5000_v23 = vadd.f32 %v4999_v55, %v4998_v20 }
 0x69a   : > { %v11131_v53 = vpop.eup %11130 }
 0x69b   : > { %v11133_v14 = vpop.eup %11132  ;;  %v5273_v1 = vmul.f32 %v11131_v53, %v12186_v32  ;;  %v5001_v5 = vmul.f32 0.0625, %v5000_v23 }
 0x69c   : > { %v5271_v24 = vmul.f32 %v11133_v14, %v12182_v63  ;;  %v11135_v3 = vpop.eup %11134 }
 0x69d   : > { %v5275_v17 = vsel %vm4265_vm2, %v5273_v1, 0.0  ;;  %v5002_v8 = vpack.c.bf16 %v5001_v5, %v5001_v5  ;;  %v5140_v63 = vmul.f32 %v11135_v3, %v12178_v29  ;;  %v10500_v5 = vld [vmem:[#allocation14 + $0x200] ss:$16 sps:$4 sm:$0xff]  }
 0x69e   : > { %v5274_v10 = vsel %vm4265_vm2, %v5271_v24, 0.0  ;;  %v10499_v24 = vld [vmem:[#allocation14 + $0x4] ss:$16 sps:$4 sm:$0xff]   ;;  %v10506_v3 = vld [vmem:[#allocation14 + $0x220] ss:$16 sps:$4 sm:$0xff]  }
 0x69f   : > { %9504 = vmatmul.mubr.msk.bf16.vlgmr.msra.gmra.mrb[32].mxu1 %vm4265_vm2, %v4869_v59  ;;  %v5276_v9 = vadd.f32 %v5275_v17, %v5274_v10  ;;  %v5142_v11 = vsel %vm4265_vm2, %v5140_v63, 0.0  ;;  %v10502_v17 = vld [vmem:[#allocation14 + $0x204] ss:$16 sps:$4 sm:$0xff]   ;;  %6166 = vmatprep.subr.bf16.mxu0 %v10499_v24  ;;  %v10545_v24 = vld [vmem:[#allocation14 + $0x100] ss:$16 sps:$4 sm:$0xff]  }
 0x6a0   : > { %9515 = vmatprep.mubr.msk.bf16.mxu1 %vm11511_vm0, %v11510_v47  ;;  %v10508_v10 = vld [vmem:[#allocation14 + $0x224] ss:$16 sps:$4 sm:$0xff]  }
 0x6a1   : > { %v5277_v33 = vrot.slane %v5276_v9, 4  ;;  %v10514_v63 = vld [vmem:[#allocation14 + $0x244] ss:$16 sps:$4 sm:$0xff]  }
 0x6a3   : > { %v5278_v51 = vadd.f32 %v5277_v33, %v5276_v9  ;;  %v10511_v9 = vld [vmem:[#allocation14 + $0x44] ss:$16 sps:$4 sm:$0xff]  }
 0x6b0   : > { %v5133_v4 = vpop.xlane.xlu1 %5132 }
 0x6b1   : > { %11136 = vrcp.f32 %v5133_v4  ;;  %v10497_v4 = vld [vmem:[#allocation14] ss:$16 sps:$4 sm:$0xff]  }
 0x6b2   : > { %6167 = vmatpush1.bf16.msra.mxu0 %v10497_v4 }
 0x6b4   : > { %v5006_v6 = vpop.permute.xlu1 %5005 }
 0x6b5   : > { %9514 = vmatpush3.bf16.msra.mxu1 %v5006_v6  ;;  %v10505_v6 = vld [vmem:[#allocation14 + $0x24] ss:$16 sps:$4 sm:$0xff]  }
 0x6b6   : > { %9525 = vmatprep.subr.bf16.mxu1 %v11510_v47  ;;  %6168 = vmatprep.subr.bf16.mxu0 %v10505_v6  ;;  %v10556_v6 = vld [vmem:[#allocation14 + $0x324] ss:$16 sps:$4 sm:$0xff]  }
 0x6b8   : > { %9516 = vmatmul.mubr.msk.bf16.vlgmr.msra.gmra.mrb[36].mxu1 %vm4265_vm2, %v5002_v8  ;;  %v5288_v31 = vpop.permute.xlu1 %5287  ;;  %v10503_v8 = vld [vmem:[#allocation14 + $0x20] ss:$16 sps:$4 sm:$0xff]  }
 0x6b9   : > { %9526 = vmatpush3.bf16.msra.mxu1 %v12026_v57  ;;  %9527 = vmatprep.mubr.msk.bf16.mxu1 %vm11511_vm0, %v11510_v47  ;;  %v5279_v57 = vrot.slane %v5278_v51, 2 }
 0x6ba   : > { %9537 = vmatprep.subr.bf16.mxu1 %v11510_v47  ;;  %6169 = vmatpush1.bf16.msra.mxu0 %v10503_v8  ;;  %v10554_v8 = vld [vmem:[#allocation14 + $0x320] ss:$16 sps:$4 sm:$0xff]  }
 0x6bb   : > { %v11137_v32 = vpop.eup %11136  ;;  %v5280_v28 = vadd.f32 %v5279_v57, %v5278_v51  ;;  %6170 = vmatprep.subr.bf16.mxu0 %v10511_v9  ;;  %v10562_v9 = vld [vmem:[#allocation14 + $0x344] ss:$16 sps:$4 sm:$0xff]  }
 0x6bc   : > { %v5138_v36 = vmul.f32 %v11137_v32, %v12202_v43  ;;  %v10509_v32 = vld [vmem:[#allocation14 + $0x40] ss:$16 sps:$4 sm:$0xff]  }
 0x6bd   : > { %v5281_v41 = vrot.slane %v5280_v28, 1 }
 0x6be   : > { %v5141_v12 = vsel %vm4265_vm2, %v5138_v36, 0.0  ;;  %v10512_v36 = vld [vmem:[#allocation14 + $0x240] ss:$16 sps:$4 sm:$0xff]   ;;  %6171 = vmatpush1.bf16.msra.mxu0 %v10509_v32 }
 0x6bf   : > { %v5143_v15 = vadd.f32 %v5142_v11, %v5141_v12  ;;  %v5282_v2 = vadd.f32 %v5281_v41, %v5280_v28  ;;  %v10517_v11 = vld [vmem:[#allocation14 + $0x64] ss:$16 sps:$4 sm:$0xff]   ;;  %v10560_v32 = vld [vmem:[#allocation14 + $0x340] ss:$16 sps:$4 sm:$0xff]  }
 0x6c0   : > { %6172 = vmatprep.subr.bf16.mxu0 %v10517_v11  ;;  %v10523_v28 = vld [vmem:[#allocation14 + $0x84] ss:$16 sps:$4 sm:$0xff]   ;;  %v10563_v11 = vld [vmem:[#allocation14 + $0x160] ss:$16 sps:$4 sm:$0xff]  }
 0x6c1   : > { %v5144_v58 = vrot.slane %v5143_v15, 4  ;;  %v5283_v43 = vmul.f32 0.0625, %v5282_v2 }
 0x6c3   : > { %v5145_v62 = vadd.f32 %v5144_v58, %v5143_v15  ;;  %v5284_v34 = vpack.c.bf16 %v5283_v43, %v5283_v43  ;;  %v10520_v15 = vld [vmem:[#allocation14 + $0x264] ss:$16 sps:$4 sm:$0xff]   ;;  %v10527_v43 = vld [vmem:[#allocation14 + $0xa0] ss:$16 sps:$4 sm:$0xff]  }
 0x6c5   : > { %v5146_v35 = vrot.slane %v5145_v62, 2 }
 0x6c7   : > { %v5147_v27 = vadd.f32 %v5146_v35, %v5145_v62  ;;  %v10515_v35 = vld [vmem:[#allocation14 + $0x60] ss:$16 sps:$4 sm:$0xff]  }
 0x6c8   : > { %6173 = vmatpush1.bf16.msra.mxu0 %v10515_v35  ;;  %v10575_v35 = vld [vmem:[#allocation14 + $0x1a0] ss:$16 sps:$4 sm:$0xff]  }
 0x6c9   : > { %v5148_v56 = vrot.slane %v5147_v27, 1  ;;  %6174 = vmatprep.subr.bf16.mxu0 %v10523_v28 }
 0x6cb   : > { %v5149_v29 = vadd.f32 %v5148_v56, %v5147_v27  ;;  %v10518_v27 = vld [vmem:[#allocation14 + $0x260] ss:$16 sps:$4 sm:$0xff]   ;;  %v10526_v56 = vld [vmem:[#allocation14 + $0x284] ss:$16 sps:$4 sm:$0xff]  }
 0x6cd   : > { %v5150_v30 = vmul.f32 0.0625, %v5149_v29  ;;  %v10521_v29 = vld [vmem:[#allocation14 + $0x80] ss:$16 sps:$4 sm:$0xff]  }
 0x6ce   : > { %6175 = vmatpush1.bf16.msra.mxu0 %v10521_v29  ;;  %v10580_v29 = vld [vmem:[#allocation14 + $0x3a4] ss:$16 sps:$4 sm:$0xff]  }
 0x6cf   : > { %v5151_v61 = vpack.c.bf16 %v5150_v30, %v5150_v30  ;;  %v10524_v30 = vld [vmem:[#allocation14 + $0x280] ss:$16 sps:$4 sm:$0xff]  }
 0x6d1   : > { %9528 = vmatmul.mubr.msk.bf16.vlgmr.msra.gmra.mrb[40].mxu1 %vm4265_vm2, %v5151_v61 }
 0x6d2   : > { %9538 = vmatpush3.bf16.msra.mxu1 %v5288_v31  ;;  %9539 = vmatprep.mubr.msk.bf16.mxu1 %vm11511_vm0, %v11510_v47  ;;  %v12274_v47 = vsub.s32 %v4487_v45, %v11882_v39  ;;  %v10541_v45 = vld [vmem:[#allocation14 + $0xe4] ss:$16 sps:$4 sm:$0xff]  }
 0x6d3   : > { %6207 = vmatprep.subr.bf16.mxu1 %v10502_v17  ;;  %v10553_v17 = vld [vmem:[#allocation14 + $0x124] ss:$16 sps:$4 sm:$0xff]  }
 0x6d9   : > { %9540 = vmatmul.mubr.msk.bf16.vlgmr.msra.gmra.mrb[44].mxu1 %vm4265_vm2, %v5284_v34  ;;  %v10529_v34 = vld [vmem:[#allocation14 + $0xa4] ss:$16 sps:$4 sm:$0xff]  }
 0x6da   : > { %6208 = vmatpush1.bf16.msra.mxu1 %v10500_v5  ;;  %6176 = vmatprep.subr.bf16.mxu0 %v10529_v34  ;;  %v10548_v5 = vld [vmem:[#allocation14 + $0x300] ss:$16 sps:$4 sm:$0xff]   ;;  %v10589_v34 = vld [vmem:[#allocation14 + $0x1e4] ss:$16 sps:$4 sm:$0xff]  }
 0x6db   : > { %6209 = vmatprep.subr.bf16.mxu1 %v10508_v10  ;;  %6177 = vmatpush1.bf16.msra.mxu0 %v10527_v43  ;;  %v10551_v10 = vld [vmem:[#allocation14 + $0x120] ss:$16 sps:$4 sm:$0xff]  }
 0x6dc   : > { %v10584_v43 = vld [vmem:[#allocation14 + $0x3c0] ss:$16 sps:$4 sm:$0xff]  }
 0x6de   : > { %6210 = vmatpush1.bf16.msra.mxu1 %v10506_v3  ;;  %v10559_v3 = vld [vmem:[#allocation14 + $0x144] ss:$16 sps:$4 sm:$0xff]  }
 0x6df   : > { %6211 = vmatprep.subr.bf16.mxu1 %v10514_v63  ;;  %v10557_v63 = vld [vmem:[#allocation14 + $0x140] ss:$16 sps:$4 sm:$0xff]  }
 0x6e2   : > { %6212 = vmatpush1.bf16.msra.mxu1 %v10512_v36  ;;  %v10568_v36 = vld [vmem:[#allocation14 + $0x364] ss:$16 sps:$4 sm:$0xff]  }
 0x6e3   : > { %6213 = vmatprep.subr.bf16.mxu1 %v10520_v15  ;;  %v10574_v15 = vld [vmem:[#allocation14 + $0x384] ss:$16 sps:$4 sm:$0xff]  }
 0x6e6   : > { %6214 = vmatpush1.bf16.msra.mxu1 %v10518_v27  ;;  %v10577_v27 = vld [vmem:[#allocation14 + $0x1a4] ss:$16 sps:$4 sm:$0xff]  }
 0x6e7   : > { %6215 = vmatprep.subr.bf16.mxu1 %v10526_v56  ;;  %v10578_v56 = vld [vmem:[#allocation14 + $0x3a0] ss:$16 sps:$4 sm:$0xff]  }
 0x6e8   : > { %v4337_v7 = vpop.f32.mrb[16].mxu1 }
 0x6e9   : > { %4347 = vst.msk [vmem:[#allocation5] sm:$0x1] %vm12267_vm3, %v4337_v7  ;;  %v9457_v52 = vpop.f32.mrb[17].mxu1  ;;  %v10530_v7 = vld [vmem:[#allocation14 + $0x2a0] ss:$16 sps:$4 sm:$0xff]  }
 0x6ea   : > { %v4340_v37 = vpop.f32.mrb[18].mxu1  ;;  %6216 = vmatpush1.bf16.msra.mxu1 %v10524_v30  ;;  %v10532_v52 = vld [vmem:[#allocation14 + $0x2a4] ss:$16 sps:$4 sm:$0xff]  }
 0x6eb   : > { %v9458_v16 = vpop.f32.mrb[19].mxu1  ;;  %v10535_v37 = vld [vmem:[#allocation14 + $0xc4] ss:$16 sps:$4 sm:$0xff]   ;;  %6217 = vmatprep.subr.bf16.mxu1 %v10532_v52 }
 0x6ec   : > { %v10538_v16 = vld [vmem:[#allocation14 + $0x2c4] ss:$16 sps:$4 sm:$0xff]   ;;  %6178 = vmatprep.subr.bf16.mxu0 %v10535_v37  ;;  %v10590_v37 = vld [vmem:[#allocation14 + $0x3e0] ss:$16 sps:$4 sm:$0xff]  }
 0x6ed   : > { %6179 = vmatpush1.bf16.msra.mxu0 %v10533_v44  ;;  %v10583_v30 = vld [vmem:[#allocation14 + $0x1c4] ss:$16 sps:$4 sm:$0xff]  }
 0x6ee   : > { %6218 = vmatpush1.bf16.msra.mxu1 %v10530_v7  ;;  %6180 = vmatprep.subr.bf16.mxu0 %v10541_v45  ;;  %v10592_v7 = vld [vmem:[#allocation14 + $0x3e4] ss:$16 sps:$4 sm:$0xff]  }
 0x6ef   : > { %6219 = vmatprep.subr.bf16.mxu1 %v10538_v16 }
 0x6f2   : > { %6220 = vmatpush1.bf16.msra.mxu1 %v10536_v42 }
 0x756   : > { %v4478_v54 = vpop.f32.mrb[20].mxu1 }
 0x757   : > { %v4491_v59 = vrot.slane %v4478_v54, %v12274_v47  ;;  %v9469_v46 = vpop.f32.mrb[21].mxu1  ;;  %v10544_v54 = vld [vmem:[#allocation14 + $0x2e4] ss:$16 sps:$4 sm:$0xff]  }
 0x758   : > { %v4481_v13 = vpop.f32.mrb[22].mxu1  ;;  %6221 = vmatprep.subr.bf16.mxu1 %v10544_v54 }
 0x759   : > { %v4498_v20 = vrot.slane %v4491_v59, %v12274_v47  ;;  %v9470_v55 = vpop.f32.mrb[23].mxu1  ;;  %v10539_v59 = vld [vmem:[#allocation14 + $0xe0] ss:$16 sps:$4 sm:$0xff]  }
 0x75a   : > { %v10542_v13 = vld [vmem:[#allocation14 + $0x2e0] ss:$16 sps:$4 sm:$0xff]   ;;  %6181 = vmatpush1.bf16.msra.mxu0 %v10539_v59  ;;  %v10595_v59 = vld [vmem:[#allocation14 + $0xc] ss:$16 sps:$4 sm:$0xff]  }
 0x75b   : > { %4499 = vrot.lane.b32.xlu1 %v4498_v20, %s11512_s16  ;;  %v10547_v20 = vld [vmem:[#allocation14 + $0x104] ss:$16 sps:$4 sm:$0xff]   ;;  %6222 = vmatpush1.bf16.msra.mxu1 %v10542_v13 }
 0x75c   : > { %6182 = vmatprep.subr.bf16.mxu0 %v10547_v20 }
 0x75e   : > { %v4626_v53 = vpop.f32.mrb[24].mxu1  ;;  %6183 = vmatpush1.bf16.msra.mxu0 %v10545_v24 }
 0x75f   : > { %4632 = vst.msk [vmem:[#allocation5 + $0x1] sm:$0x1] %vm12267_vm3, %v4626_v53  ;;  %v9481_v23 = vpop.f32.mrb[25].mxu1  ;;  %6184 = vmatprep.subr.bf16.mxu0 %v10553_v17  ;;  %v10596_v17 = vld [vmem:[#allocation14 + $0x208] ss:$16 sps:$4 sm:$0xff]  }
 0x760   : > { %v4629_v14 = vpop.f32.mrb[26].mxu1  ;;  %v10550_v23 = vld [vmem:[#allocation14 + $0x304] ss:$16 sps:$4 sm:$0xff]  }
 0x761   : > { %v9482_v1 = vpop.f32.mrb[27].mxu1  ;;  %6223 = vmatprep.subr.bf16.mxu1 %v10550_v23 }
 0x762   : > { %6224 = vmatpush1.bf16.msra.mxu1 %v10548_v5  ;;  %6185 = vmatpush1.bf16.msra.mxu0 %v10551_v10  ;;  %v10593_v5 = vld [vmem:[#allocation14 + $0x8] ss:$16 sps:$4 sm:$0xff]  }
 0x763   : > { %6225 = vmatprep.subr.bf16.mxu1 %v10556_v6  ;;  %6186 = vmatprep.subr.bf16.mxu0 %v10559_v3  ;;  %v10604_v3 = vld [vmem:[#allocation14 + $0x22c] ss:$16 sps:$4 sm:$0xff]  }
 0x766   : > { %6226 = vmatpush1.bf16.msra.mxu1 %v10554_v8  ;;  %6187 = vmatpush1.bf16.msra.mxu0 %v10557_v63  ;;  %v10601_v8 = vld [vmem:[#allocation14 + $0x2c] ss:$16 sps:$4 sm:$0xff]   ;;  %v10602_v63 = vld [vmem:[#allocation14 + $0x228] ss:$16 sps:$4 sm:$0xff]  }
 0x767   : > { %6227 = vmatprep.subr.bf16.mxu1 %v10562_v9  ;;  %v10599_v9 = vld [vmem:[#allocation14 + $0x28] ss:$16 sps:$4 sm:$0xff]  }
 0x76a   : > { %v4763_v33 = vpop.f32.mrb[28].mxu1  ;;  %6228 = vmatpush1.bf16.msra.mxu1 %v10560_v32  ;;  %v10607_v32 = vld [vmem:[#allocation14 + $0x4c] ss:$16 sps:$4 sm:$0xff]  }
 0x76b   : > { %v4776_v12 = vrot.slane %v4763_v33, %v12274_v47  ;;  %v9493_v51 = vpop.f32.mrb[29].mxu1  ;;  %v10565_v33 = vld [vmem:[#allocation14 + $0x164] ss:$16 sps:$4 sm:$0xff]   ;;  %6229 = vmatprep.subr.bf16.mxu1 %v10568_v36  ;;  %v10605_v36 = vld [vmem:[#allocation14 + $0x48] ss:$16 sps:$4 sm:$0xff]  }
 0x76c   : > { %v4766_v58 = vpop.f32.mrb[30].mxu1  ;;  %6188 = vmatprep.subr.bf16.mxu0 %v10565_v33  ;;  %v10571_v51 = vld [vmem:[#allocation14 + $0x184] ss:$16 sps:$4 sm:$0xff]   ;;  %v10610_v33 = vld [vmem:[#allocation14 + $0x24c] ss:$16 sps:$4 sm:$0xff]  }
 0x76d   : > { %v4783_v62 = vrot.slane %v4776_v12, %v12274_v47  ;;  %v9494_v57 = vpop.f32.mrb[31].mxu1  ;;  %v10566_v12 = vld [vmem:[#allocation14 + $0x360] ss:$16 sps:$4 sm:$0xff]   ;;  %6189 = vmatpush1.bf16.msra.mxu0 %v10563_v11  ;;  %v10608_v11 = vld [vmem:[#allocation14 + $0x248] ss:$16 sps:$4 sm:$0xff]  }
 0x76e   : > { %v10569_v58 = vld [vmem:[#allocation14 + $0x180] ss:$16 sps:$4 sm:$0xff]   ;;  %6230 = vmatpush1.bf16.msra.mxu1 %v10566_v12  ;;  %6190 = vmatprep.subr.bf16.mxu0 %v10571_v51  ;;  %v10613_v12 = vld [vmem:[#allocation14 + $0x6c] ss:$16 sps:$4 sm:$0xff]  }
 0x76f   : > { %4784 = vrot.lane.b32.xlu1 %v4783_v62, %s11512_s16  ;;  %v10572_v62 = vld [vmem:[#allocation14 + $0x380] ss:$16 sps:$4 sm:$0xff]   ;;  %6231 = vmatprep.subr.bf16.mxu1 %v10574_v15  ;;  %v10616_v51 = vld [vmem:[#allocation14 + $0x26c] ss:$16 sps:$4 sm:$0xff]   ;;  %v10611_v15 = vld [vmem:[#allocation14 + $0x68] ss:$16 sps:$4 sm:$0xff]  }
 0x771   : > { %6191 = vmatpush1.bf16.msra.mxu0 %v10569_v58  ;;  %v10614_v58 = vld [vmem:[#allocation14 + $0x268] ss:$16 sps:$4 sm:$0xff]  }
 0x772   : > { %v4908_v41 = vpop.f32.mrb[32].mxu1  ;;  %6232 = vmatpush1.bf16.msra.mxu1 %v10572_v62  ;;  %6192 = vmatprep.subr.bf16.mxu0 %v10577_v27  ;;  %v10619_v62 = vld [vmem:[#allocation14 + $0x8c] ss:$16 sps:$4 sm:$0xff]   ;;  %v10620_v27 = vld [vmem:[#allocation14 + $0x288] ss:$16 sps:$4 sm:$0xff]  }
 0x773   : > { %4914 = vst.msk [vmem:[#allocation5 + $0x2] sm:$0x1] %vm12267_vm3, %v4908_v41  ;;  %v9505_v61 = vpop.f32.mrb[33].mxu1  ;;  %6233 = vmatprep.subr.bf16.mxu1 %v10580_v29  ;;  %v10623_v29 = vld [vmem:[#allocation14 + $0xa8] ss:$16 sps:$4 sm:$0xff]  }
 0x774   : > { %v4911_v2 = vpop.f32.mrb[34].mxu1 }
 0x775   : > { %v9506_v31 = vpop.f32.mrb[35].mxu1  ;;  %6193 = vmatpush1.bf16.msra.mxu0 %v10575_v35  ;;  %v10581_v2 = vld [vmem:[#allocation14 + $0x1c0] ss:$16 sps:$4 sm:$0xff]   ;;  %v10617_v35 = vld [vmem:[#allocation14 + $0x88] ss:$16 sps:$4 sm:$0xff]  }
 0x776   : > { %v10586_v31 = vld [vmem:[#allocation14 + $0x3c4] ss:$16 sps:$4 sm:$0xff]   ;;  %6234 = vmatpush1.bf16.msra.mxu1 %v10578_v56  ;;  %6194 = vmatprep.subr.bf16.mxu0 %v10583_v30  ;;  %v10628_v56 = vld [vmem:[#allocation14 + $0x2ac] ss:$16 sps:$4 sm:$0xff]  }
 0x777   : > { %6235 = vmatprep.subr.bf16.mxu1 %v10586_v31  ;;  %v10631_v30 = vld [vmem:[#allocation14 + $0xcc] ss:$16 sps:$4 sm:$0xff]   ;;  %v10632_v31 = vld [vmem:[#allocation14 + $0x2c8] ss:$16 sps:$4 sm:$0xff]  }
 0x779   : > { %6195 = vmatpush1.bf16.msra.mxu0 %v10581_v2  ;;  %v10629_v2 = vld [vmem:[#allocation14 + $0xc8] ss:$16 sps:$4 sm:$0xff]  }
 0x77a   : > { %6236 = vmatpush1.bf16.msra.mxu1 %v10584_v43  ;;  %6196 = vmatprep.subr.bf16.mxu0 %v10589_v34  ;;  %v10637_v43 = vld [vmem:[#allocation14 + $0xec] ss:$16 sps:$4 sm:$0xff]  }
 0x77b   : > { %6237 = vmatprep.subr.bf16.mxu1 %v10592_v7  ;;  %v10640_v34 = vld [vmem:[#allocation14 + $0x2ec] ss:$16 sps:$4 sm:$0xff]   ;;  %v10635_v7 = vld [vmem:[#allocation14 + $0xe8] ss:$16 sps:$4 sm:$0xff]  }
 0x77d   : > { %6197 = vmatpush1.bf16.msra.mxu0 %v10587_v19  ;;  %v10638_v19 = vld [vmem:[#allocation14 + $0x2e8] ss:$16 sps:$4 sm:$0xff]  }
 0x77e   : > { %6238 = vmatpush1.bf16.msra.mxu1 %v10590_v37  ;;  %6248 = vmatprep.subr.bf16.mxu0 %v10595_v59  ;;  %v10646_v37 = vld [vmem:[#allocation14 + $0x30c] ss:$16 sps:$4 sm:$0xff]   ;;  %v10650_v59 = vld [vmem:[#allocation14 + $0x328] ss:$16 sps:$4 sm:$0xff]  }
 0x78b   : > { %v5045_v46 = vpop.f32.mrb[36].mxu1 }
 0x78c   : > { %v5058_v55 = vrot.slane %v5045_v46, %v12274_v47  ;;  %v9517_v53 = vpop.f32.mrb[37].mxu1  ;;  %v10598_v46 = vld [vmem:[#allocation14 + $0x20c] ss:$16 sps:$4 sm:$0xff]  }
 0x78d   : > { %v5048_v14 = vpop.f32.mrb[38].mxu1  ;;  %6289 = vmatprep.subr.bf16.mxu1 %v10598_v46  ;;  %v10655_v46 = vld [vmem:[#allocation14 + $0x14c] ss:$16 sps:$4 sm:$0xff]  }
 0x78e   : > { %v5065_v1 = vrot.slane %v5058_v55, %v12274_v47  ;;  %v9518_v4 = vpop.f32.mrb[39].mxu1 }
 0x790   : > { %5066 = vrot.lane.b32.xlu0 %v5065_v1, %s11512_s16 }
 0x7a4   : > { %v5190_v57 = vpop.f32.mrb[40].mxu1 }
 0x7a5   : > { %5196 = vst.msk [vmem:[#allocation5 + $0x3] sm:$0x1] %vm12267_vm3, %v5190_v57  ;;  %v9529_v28 = vpop.f32.mrb[41].mxu1  ;;  %v10622_v57 = vld [vmem:[#allocation14 + $0x28c] ss:$16 sps:$4 sm:$0xff]  }
 0x7a6   : > { %v5193_v41 = vpop.f32.mrb[42].mxu1  ;;  %v10625_v28 = vld [vmem:[#allocation14 + $0xac] ss:$16 sps:$4 sm:$0xff]  }
 0x7a7   : > { %v9530_v61 = vpop.f32.mrb[43].mxu1  ;;  %v10626_v41 = vld [vmem:[#allocation14 + $0x2a8] ss:$16 sps:$4 sm:$0xff]  }
 0x7a8   : > { %v10634_v61 = vld [vmem:[#allocation14 + $0x2cc] ss:$16 sps:$4 sm:$0xff]  }
 0x7ac   : > { %v5327_v52 = vpop.f32.mrb[44].mxu1 }
 0x7ad   : > { %v5340_v16 = vrot.slane %v5327_v52, %v12274_v47  ;;  %v9541_v44 = vpop.f32.mrb[45].mxu1  ;;  %v10643_v52 = vld [vmem:[#allocation14 + $0x10c] ss:$16 sps:$4 sm:$0xff]  }
 0x7ae   : > { %v5330_v42 = vpop.f32.mrb[46].mxu1  ;;  %v10644_v44 = vld [vmem:[#allocation14 + $0x308] ss:$16 sps:$4 sm:$0xff]  }
 0x7af   : > { %v5347_v45 = vrot.slane %v5340_v16, %v12274_v47  ;;  %v9542_v54 = vpop.f32.mrb[47].mxu1  ;;  %v10641_v16 = vld [vmem:[#allocation14 + $0x108] ss:$16 sps:$4 sm:$0xff]   ;;  %v10649_v42 = vld [vmem:[#allocation14 + $0x12c] ss:$16 sps:$4 sm:$0xff]  }
 0x7b0   : > { %v10647_v54 = vld [vmem:[#allocation14 + $0x128] ss:$16 sps:$4 sm:$0xff]  }
 0x7b1   : > { %5348 = vrot.lane.b32.xlu1 %v5347_v45, %s11512_s16  ;;  %v10652_v45 = vld [vmem:[#allocation14 + $0x32c] ss:$16 sps:$4 sm:$0xff]  }
 0x7cd   : > { %v4500_v13 = vpop.permute.xlu1 %4499 }
 0x7ce   : > { %4505 = vst.msk [vmem:[#allocation5] sm:$0x1] %vm4504_vm6, %v4500_v13  ;;  %v10658_v13 = vld [vmem:[#allocation14 + $0x34c] ss:$16 sps:$4 sm:$0xff]  }
 0x7e1   : > { %v4785_v20 = vpop.permute.xlu1 %4784 }
 0x7e2   : > { %4787 = vst.msk [vmem:[#allocation5 + $0x1] sm:$0x1] %vm4504_vm6, %v4785_v20  ;;  %v10653_v20 = vld [vmem:[#allocation14 + $0x148] ss:$16 sps:$4 sm:$0xff]  }
 0x802   : > { %v5067_v55 = vpop.permute.xlu0 %5066 }
 0x803   : > { %5069 = vst.msk [vmem:[#allocation5 + $0x2] sm:$0x1] %vm4504_vm6, %v5067_v55  ;;  %v10656_v55 = vld [vmem:[#allocation14 + $0x348] ss:$16 sps:$4 sm:$0xff]  }
 0x823   : > { %v5349_v47 = vpop.permute.xlu1 %5348 }
 0x824   : > { %5351 = vst.msk [vmem:[#allocation5 + $0x3] sm:$0x1] %vm4504_vm6, %v5349_v47  ;;  %v10661_v47 = vld [vmem:[#allocation14 + $0x16c] ss:$16 sps:$4 sm:$0xff]  }
 0x82b   : > { %v5352_v53 = vld [vmem:[#allocation5] sm:$0xf] }
 0x82c   : > { %v5361_v23 = vrot.slane %v5352_v53, %v11942_v25  ;;  %v5369_v14 = vrot.slane %v5352_v53, %v11945_v26  ;;  %v5357_v1 = vrot.slane %v5352_v53, %v11885_v40  ;;  %v5365_v4 = vrot.slane %v5352_v53, %v11939_v21  ;;  %v10664_v53 = vld [vmem:[#allocation14 + $0x36c] ss:$16 sps:$4 sm:$0xff]  }
 0x82e   : > { %v5375_v24 = vpack.c.bf16 %v5361_v23, %v5361_v23  ;;  %v5377_v38 = vpack.c.bf16 %v5369_v14, %v5369_v14  ;;  %v12300_v6 = vpack.c.bf16 %v5357_v1, %v5357_v1  ;;  %v12302_v10 = vpack.c.bf16 %v5365_v4, %v5365_v4  ;;  %v10659_v23 = vld [vmem:[#allocation14 + $0x168] ss:$16 sps:$4 sm:$0xff]   ;;  %v10667_v1 = vld [vmem:[#allocation14 + $0x18c] ss:$16 sps:$4 sm:$0xff]  }
 0x82f   : > { %v10662_v14 = vld [vmem:[#allocation14 + $0x368] ss:$16 sps:$4 sm:$0xff]   ;;  %v10670_v4 = vld [vmem:[#allocation14 + $0x38c] ss:$16 sps:$4 sm:$0xff]  }
 0x830   : > { %6198 = vmatprep.mubr.bf16.mxu0 %v5375_v24  ;;  %6239 = vmatprep.mubr.bf16.mxu1 %v5377_v38 }
 0x831   : > { %6199 = vmatmul.mubr.bf16.vlgmr.msra.gmra.mrb[48].mxu0 %v12300_v6  ;;  %6240 = vmatmul.mubr.bf16.vlgmr.msra.gmra.mrb[48].mxu1 %v12302_v10 }
 0x832   : > { %6249 = vmatpush1.bf16.msra.mxu0 %v10593_v5  ;;  %6290 = vmatpush1.bf16.msra.mxu1 %v10596_v17  ;;  %v10673_v5 = vld [vmem:[#allocation14 + $0x1ac] ss:$16 sps:$4 sm:$0xff]  }
 0x833   : > { %6280 = vmatprep.mubr.bf16.mxu0 %v5375_v24  ;;  %6321 = vmatprep.mubr.bf16.mxu1 %v5377_v38  ;;  %v10665_v24 = vld [vmem:[#allocation14 + $0x188] ss:$16 sps:$4 sm:$0xff]   ;;  %v10676_v17 = vld [vmem:[#allocation14 + $0x3ac] ss:$16 sps:$4 sm:$0xff]  }
 0x834   : > { %6250 = vmatprep.subr.bf16.mxu0 %v10601_v8  ;;  %6291 = vmatprep.subr.bf16.mxu1 %v10604_v3  ;;  %v10668_v38 = vld [vmem:[#allocation14 + $0x388] ss:$16 sps:$4 sm:$0xff]  }
 0x835   : > { %v10671_v8 = vld [vmem:[#allocation14 + $0x1a8] ss:$16 sps:$4 sm:$0xff]  }
 0x836   : > { %6251 = vmatpush1.bf16.msra.mxu0 %v10599_v9  ;;  %6292 = vmatpush1.bf16.msra.mxu1 %v10602_v63  ;;  %v10674_v3 = vld [vmem:[#allocation14 + $0x3a8] ss:$16 sps:$4 sm:$0xff]   ;;  %v10679_v9 = vld [vmem:[#allocation14 + $0x1cc] ss:$16 sps:$4 sm:$0xff]  }
 0x837   : > { %6252 = vmatprep.subr.bf16.mxu0 %v10607_v32  ;;  %6293 = vmatprep.subr.bf16.mxu1 %v10610_v33  ;;  %v10682_v63 = vld [vmem:[#allocation14 + $0x3cc] ss:$16 sps:$4 sm:$0xff]   ;;  %v10677_v32 = vld [vmem:[#allocation14 + $0x1c8] ss:$16 sps:$4 sm:$0xff]  }
 0x838   : > { %v10680_v33 = vld [vmem:[#allocation14 + $0x3c8] ss:$16 sps:$4 sm:$0xff]  }
 0x83a   : > { %6253 = vmatpush1.bf16.msra.mxu0 %v10605_v36  ;;  %6294 = vmatpush1.bf16.msra.mxu1 %v10608_v11  ;;  %v10685_v36 = vld [vmem:[#allocation14 + $0x1ec] ss:$16 sps:$4 sm:$0xff]  }
 0x83b   : > { %6254 = vmatprep.subr.bf16.mxu0 %v10613_v12  ;;  %6295 = vmatprep.subr.bf16.mxu1 %v10616_v51  ;;  %v10688_v11 = vld [vmem:[#allocation14 + $0x3ec] ss:$16 sps:$4 sm:$0xff]   ;;  %v10683_v12 = vld [vmem:[#allocation14 + $0x1e8] ss:$16 sps:$4 sm:$0xff]  }
 0x83c   : > { %v10686_v51 = vld [vmem:[#allocation14 + $0x3e8] ss:$16 sps:$4 sm:$0xff]  }
 0x83e   : > { %6255 = vmatpush1.bf16.msra.mxu0 %v10611_v15  ;;  %6296 = vmatpush1.bf16.msra.mxu1 %v10614_v58  ;;  %v10691_v15 = vld [vmem:[#allocation15 + $0x4] ss:$16 sps:$4 sm:$0xff]   ;;  %v10694_v58 = vld [vmem:[#allocation15 + $0xc] ss:$16 sps:$4 sm:$0xff]  }
 0x83f   : > { %6256 = vmatprep.subr.bf16.mxu0 %v10619_v62  ;;  %6297 = vmatprep.subr.bf16.mxu1 %v10622_v57  ;;  %v10689_v62 = vld [vmem:[#allocation15] ss:$16 sps:$4 sm:$0xff]   ;;  %v10692_v57 = vld [vmem:[#allocation15 + $0x8] ss:$16 sps:$4 sm:$0xff]  }
 0x842   : > { %6257 = vmatpush1.bf16.msra.mxu0 %v10617_v35  ;;  %6298 = vmatpush1.bf16.msra.mxu1 %v10620_v27  ;;  %v10697_v35 = vld [vmem:[#allocation15 + $0x24] ss:$16 sps:$4 sm:$0xff]   ;;  %v10700_v27 = vld [vmem:[#allocation15 + $0x2c] ss:$16 sps:$4 sm:$0xff]  }
 0x843   : > { %6258 = vmatprep.subr.bf16.mxu0 %v10625_v28  ;;  %6299 = vmatprep.subr.bf16.mxu1 %v10628_v56  ;;  %v10695_v28 = vld [vmem:[#allocation15 + $0x20] ss:$16 sps:$4 sm:$0xff]   ;;  %v10698_v56 = vld [vmem:[#allocation15 + $0x28] ss:$16 sps:$4 sm:$0xff]  }
 0x846   : > { %6259 = vmatpush1.bf16.msra.mxu0 %v10623_v29  ;;  %6300 = vmatpush1.bf16.msra.mxu1 %v10626_v41  ;;  %v10703_v29 = vld [vmem:[#allocation15 + $0x44] ss:$16 sps:$4 sm:$0xff]   ;;  %v10706_v41 = vld [vmem:[#allocation15 + $0x4c] ss:$16 sps:$4 sm:$0xff]  }
 0x847   : > { %6260 = vmatprep.subr.bf16.mxu0 %v10631_v30  ;;  %6301 = vmatprep.subr.bf16.mxu1 %v10634_v61  ;;  %v10701_v30 = vld [vmem:[#allocation15 + $0x40] ss:$16 sps:$4 sm:$0xff]   ;;  %v10704_v61 = vld [vmem:[#allocation15 + $0x48] ss:$16 sps:$4 sm:$0xff]  }
 0x84a   : > { %6261 = vmatpush1.bf16.msra.mxu0 %v10629_v2  ;;  %6302 = vmatpush1.bf16.msra.mxu1 %v10632_v31  ;;  %v10709_v2 = vld [vmem:[#allocation15 + $0x64] ss:$16 sps:$4 sm:$0xff]   ;;  %v10712_v31 = vld [vmem:[#allocation15 + $0x6c] ss:$16 sps:$4 sm:$0xff]  }
 0x84b   : > { %6262 = vmatprep.subr.bf16.mxu0 %v10637_v43  ;;  %6303 = vmatprep.subr.bf16.mxu1 %v10640_v34  ;;  %v10715_v43 = vld [vmem:[#allocation15 + $0x84] ss:$16 sps:$4 sm:$0xff]   ;;  %v10718_v34 = vld [vmem:[#allocation15 + $0x8c] ss:$16 sps:$4 sm:$0xff]  }
 0x84e   : > { %6263 = vmatpush1.bf16.msra.mxu0 %v10635_v7  ;;  %6304 = vmatpush1.bf16.msra.mxu1 %v10638_v19  ;;  %v10713_v7 = vld [vmem:[#allocation15 + $0x80] ss:$16 sps:$4 sm:$0xff]   ;;  %v10716_v19 = vld [vmem:[#allocation15 + $0x88] ss:$16 sps:$4 sm:$0xff]  }
 0x84f   : > { %6264 = vmatprep.subr.bf16.mxu0 %v10643_v52  ;;  %6305 = vmatprep.subr.bf16.mxu1 %v10646_v37  ;;  %v10721_v52 = vld [vmem:[#allocation15 + $0xa4] ss:$16 sps:$4 sm:$0xff]   ;;  %v10724_v37 = vld [vmem:[#allocation15 + $0xac] ss:$16 sps:$4 sm:$0xff]  }
 0x852   : > { %6265 = vmatpush1.bf16.msra.mxu0 %v10641_v16  ;;  %6306 = vmatpush1.bf16.msra.mxu1 %v10644_v44  ;;  %v10719_v16 = vld [vmem:[#allocation15 + $0xa0] ss:$16 sps:$4 sm:$0xff]   ;;  %v10722_v44 = vld [vmem:[#allocation15 + $0xa8] ss:$16 sps:$4 sm:$0xff]  }
 0x853   : > { %6266 = vmatprep.subr.bf16.mxu0 %v10649_v42  ;;  %6307 = vmatprep.subr.bf16.mxu1 %v10652_v45  ;;  %v10727_v42 = vld [vmem:[#allocation15 + $0xc4] ss:$16 sps:$4 sm:$0xff]   ;;  %v10730_v45 = vld [vmem:[#allocation15 + $0xcc] ss:$16 sps:$4 sm:$0xff]  }
 0x856   : > { %6267 = vmatpush1.bf16.msra.mxu0 %v10647_v54  ;;  %6308 = vmatpush1.bf16.msra.mxu1 %v10650_v59  ;;  %v10725_v54 = vld [vmem:[#allocation15 + $0xc0] ss:$16 sps:$4 sm:$0xff]   ;;  %v10728_v59 = vld [vmem:[#allocation15 + $0xc8] ss:$16 sps:$4 sm:$0xff]  }
 0x857   : > { %6268 = vmatprep.subr.bf16.mxu0 %v10655_v46  ;;  %6309 = vmatprep.subr.bf16.mxu1 %v10658_v13  ;;  %v10733_v46 = vld [vmem:[#allocation15 + $0xe4] ss:$16 sps:$4 sm:$0xff]   ;;  %v10736_v13 = vld [vmem:[#allocation15 + $0xec] ss:$16 sps:$4 sm:$0xff]  }
 0x85a   : > { %6269 = vmatpush1.bf16.msra.mxu0 %v10653_v20  ;;  %6310 = vmatpush1.bf16.msra.mxu1 %v10656_v55  ;;  %v10731_v20 = vld [vmem:[#allocation15 + $0xe0] ss:$16 sps:$4 sm:$0xff]   ;;  %v10734_v55 = vld [vmem:[#allocation15 + $0xe8] ss:$16 sps:$4 sm:$0xff]  }
 0x85b   : > { %6270 = vmatprep.subr.bf16.mxu0 %v10661_v47  ;;  %6311 = vmatprep.subr.bf16.mxu1 %v10664_v53  ;;  %v10739_v47 = vld [vmem:[#allocation15 + $0x104] ss:$16 sps:$4 sm:$0xff]   ;;  %v10742_v53 = vld [vmem:[#allocation15 + $0x10c] ss:$16 sps:$4 sm:$0xff]  }
 0x85e   : > { %6271 = vmatpush1.bf16.msra.mxu0 %v10659_v23  ;;  %6312 = vmatpush1.bf16.msra.mxu1 %v10662_v14  ;;  %v10737_v23 = vld [vmem:[#allocation15 + $0x100] ss:$16 sps:$4 sm:$0xff]   ;;  %v10740_v14 = vld [vmem:[#allocation15 + $0x108] ss:$16 sps:$4 sm:$0xff]  }
 0x85f   : > { %6272 = vmatprep.subr.bf16.mxu0 %v10667_v1  ;;  %6313 = vmatprep.subr.bf16.mxu1 %v10670_v4  ;;  %v10745_v1 = vld [vmem:[#allocation15 + $0x124] ss:$16 sps:$4 sm:$0xff]   ;;  %v10748_v4 = vld [vmem:[#allocation15 + $0x12c] ss:$16 sps:$4 sm:$0xff]  }
 0x862   : > { %6273 = vmatpush1.bf16.msra.mxu0 %v10665_v24  ;;  %6314 = vmatpush1.bf16.msra.mxu1 %v10668_v38  ;;  %v10743_v24 = vld [vmem:[#allocation15 + $0x120] ss:$16 sps:$4 sm:$0xff]   ;;  %v10746_v38 = vld [vmem:[#allocation15 + $0x128] ss:$16 sps:$4 sm:$0xff]  }
 0x863   : > { %6274 = vmatprep.subr.bf16.mxu0 %v10673_v5  ;;  %6315 = vmatprep.subr.bf16.mxu1 %v10676_v17  ;;  %v10751_v5 = vld [vmem:[#allocation15 + $0x144] ss:$16 sps:$4 sm:$0xff]   ;;  %v10754_v17 = vld [vmem:[#allocation15 + $0x14c] ss:$16 sps:$4 sm:$0xff]  }
 0x866   : > { %6275 = vmatpush1.bf16.msra.mxu0 %v10671_v8  ;;  %6316 = vmatpush1.bf16.msra.mxu1 %v10674_v3  ;;  %v10749_v8 = vld [vmem:[#allocation15 + $0x140] ss:$16 sps:$4 sm:$0xff]   ;;  %v10752_v3 = vld [vmem:[#allocation15 + $0x148] ss:$16 sps:$4 sm:$0xff]  }
 0x867   : > { %6276 = vmatprep.subr.bf16.mxu0 %v10679_v9  ;;  %6317 = vmatprep.subr.bf16.mxu1 %v10682_v63  ;;  %v10757_v9 = vld [vmem:[#allocation15 + $0x164] ss:$16 sps:$4 sm:$0xff]   ;;  %v10760_v63 = vld [vmem:[#allocation15 + $0x16c] ss:$16 sps:$4 sm:$0xff]  }
 0x86a   : > { %6277 = vmatpush1.bf16.msra.mxu0 %v10677_v32  ;;  %6318 = vmatpush1.bf16.msra.mxu1 %v10680_v33  ;;  %v10755_v32 = vld [vmem:[#allocation15 + $0x160] ss:$16 sps:$4 sm:$0xff]   ;;  %v10758_v33 = vld [vmem:[#allocation15 + $0x168] ss:$16 sps:$4 sm:$0xff]  }
 0x86b   : > { %6278 = vmatprep.subr.bf16.mxu0 %v10685_v36  ;;  %6319 = vmatprep.subr.bf16.mxu1 %v10688_v11  ;;  %v10763_v36 = vld [vmem:[#allocation15 + $0x184] ss:$16 sps:$4 sm:$0xff]   ;;  %v10766_v11 = vld [vmem:[#allocation15 + $0x18c] ss:$16 sps:$4 sm:$0xff]  }
 0x86e   : > { %6279 = vmatpush1.bf16.msra.mxu0 %v10683_v12  ;;  %6320 = vmatpush1.bf16.msra.mxu1 %v10686_v51  ;;  %v10761_v12 = vld [vmem:[#allocation15 + $0x180] ss:$16 sps:$4 sm:$0xff]   ;;  %v10764_v51 = vld [vmem:[#allocation15 + $0x188] ss:$16 sps:$4 sm:$0xff]  }
 0x86f   : > { %7126 = vmatprep.subr.bf16.mxu0 %v10691_v15  ;;  %7208 = vmatprep.subr.bf16.mxu1 %v10694_v58  ;;  %v10769_v15 = vld [vmem:[#allocation15 + $0x1a4] ss:$16 sps:$4 sm:$0xff]   ;;  %v10772_v58 = vld [vmem:[#allocation15 + $0x1ac] ss:$16 sps:$4 sm:$0xff]  }
 0x871   : > { %6281 = vmatmul.mubr.bf16.vlgmr.msra.gmra.mrb[52].mxu0 %v12300_v6  ;;  %6322 = vmatmul.mubr.bf16.vlgmr.msra.gmra.mrb[52].mxu1 %v12302_v10  ;;  %v10707_v6 = vld [vmem:[#allocation15 + $0x60] ss:$16 sps:$4 sm:$0xff]   ;;  %v10710_v10 = vld [vmem:[#allocation15 + $0x68] ss:$16 sps:$4 sm:$0xff]  }
 0x872   : > { %7127 = vmatpush1.bf16.msra.mxu0 %v10689_v62  ;;  %7209 = vmatpush1.bf16.msra.mxu1 %v10692_v57  ;;  %v10767_v62 = vld [vmem:[#allocation15 + $0x1a0] ss:$16 sps:$4 sm:$0xff]   ;;  %v10770_v57 = vld [vmem:[#allocation15 + $0x1a8] ss:$16 sps:$4 sm:$0xff]  }
 0x873   : > { %7128 = vmatprep.subr.bf16.mxu0 %v10697_v35  ;;  %7210 = vmatprep.subr.bf16.mxu1 %v10700_v27  ;;  %v10775_v35 = vld [vmem:[#allocation15 + $0x1c4] ss:$16 sps:$4 sm:$0xff]   ;;  %v10778_v27 = vld [vmem:[#allocation15 + $0x1cc] ss:$16 sps:$4 sm:$0xff]  }
 0x876   : > { %7129 = vmatpush1.bf16.msra.mxu0 %v10695_v28  ;;  %7211 = vmatpush1.bf16.msra.mxu1 %v10698_v56  ;;  %v10773_v28 = vld [vmem:[#allocation15 + $0x1c0] ss:$16 sps:$4 sm:$0xff]   ;;  %v10776_v56 = vld [vmem:[#allocation15 + $0x1c8] ss:$16 sps:$4 sm:$0xff]  }
 0x877   : > { %7130 = vmatprep.subr.bf16.mxu0 %v10703_v29  ;;  %7212 = vmatprep.subr.bf16.mxu1 %v10706_v41  ;;  %v10781_v29 = vld [vmem:[#allocation15 + $0x1e4] ss:$16 sps:$4 sm:$0xff]   ;;  %v10784_v41 = vld [vmem:[#allocation15 + $0x1ec] ss:$16 sps:$4 sm:$0xff]  }
 0x87a   : > { %7131 = vmatpush1.bf16.msra.mxu0 %v10701_v30  ;;  %7213 = vmatpush1.bf16.msra.mxu1 %v10704_v61  ;;  %v10779_v30 = vld [vmem:[#allocation15 + $0x1e0] ss:$16 sps:$4 sm:$0xff]   ;;  %v10782_v61 = vld [vmem:[#allocation15 + $0x1e8] ss:$16 sps:$4 sm:$0xff]  }
 0x87b   : > { %7132 = vmatprep.subr.bf16.mxu0 %v10709_v2  ;;  %7214 = vmatprep.subr.bf16.mxu1 %v10712_v31  ;;  %v10787_v2 = vld [vmem:[#allocation15 + $0x204] ss:$16 sps:$4 sm:$0xff]   ;;  %v10790_v31 = vld [vmem:[#allocation15 + $0x20c] ss:$16 sps:$4 sm:$0xff]  }
 0x87e   : > { %7133 = vmatpush1.bf16.msra.mxu0 %v10707_v6  ;;  %7215 = vmatpush1.bf16.msra.mxu1 %v10710_v10  ;;  %v1271_v6 = vrot.slane %v11896_v60, 4  ;;  %v1278_v10 = vrot.slane %v11900_v0, 4 }
 0x87f   : > { %7134 = vmatprep.subr.bf16.mxu0 %v10715_v43  ;;  %7216 = vmatprep.subr.bf16.mxu1 %v10718_v34 }
 0x880   : > { %v1272_v43 = vadd.f32 %v1271_v6, %v11896_v60  ;;  %v1279_v34 = vadd.f32 %v1278_v10, %v11900_v0  ;;  %v10818_v6 = vld [vmem:[#allocation15 + $0x2a8] ss:$16 sps:$4 sm:$0xff]   ;;  %v10823_v10 = vld [vmem:[#allocation15 + $0x2c4] ss:$16 sps:$4 sm:$0xff]  }
 0x882   : > { %7135 = vmatpush1.bf16.msra.mxu0 %v10713_v7  ;;  %7217 = vmatpush1.bf16.msra.mxu1 %v10716_v19  ;;  %v1273_v7 = vrot.slane %v1272_v43, 2  ;;  %v1280_v19 = vrot.slane %v1279_v34, 2 }
 0x883   : > { %7136 = vmatprep.subr.bf16.mxu0 %v10721_v52  ;;  %7218 = vmatprep.subr.bf16.mxu1 %v10724_v37 }
 0x884   : > { %v1274_v52 = vadd.f32 %v1273_v7, %v1272_v43  ;;  %v1281_v37 = vadd.f32 %v1280_v19, %v1279_v34  ;;  %v10826_v43 = vld [vmem:[#allocation15 + $0x2cc] ss:$16 sps:$4 sm:$0xff]   ;;  %v10821_v34 = vld [vmem:[#allocation15 + $0x2c0] ss:$16 sps:$4 sm:$0xff]   ;;  %v10824_v7 = vld [vmem:[#allocation15 + $0x2c8] ss:$16 sps:$4 sm:$0xff]  }
 0x885   : > { %v10829_v19 = vld [vmem:[#allocation15 + $0x2e4] ss:$16 sps:$4 sm:$0xff]  }
 0x886   : > { %7137 = vmatpush1.bf16.msra.mxu0 %v10719_v16  ;;  %7219 = vmatpush1.bf16.msra.mxu1 %v10722_v44  ;;  %v1275_v16 = vrot.slane %v1274_v52, 1  ;;  %v1282_v44 = vrot.slane %v1281_v37, 1 }
 0x887   : > { %7138 = vmatprep.subr.bf16.mxu0 %v10727_v42  ;;  %7220 = vmatprep.subr.bf16.mxu1 %v10730_v45  ;;  %v12312_v42 = vld [vmem:[#allocation20] sm:$0xff] }
 0x888   : > { %v6149_v45 = vrot.slane %v12312_v42, %v11942_v25  ;;  %v1283_v60 = vadd.f32 %v1282_v44, %v1281_v37  ;;  %v10827_v37 = vld [vmem:[#allocation15 + $0x2e0] ss:$16 sps:$4 sm:$0xff]   ;;  %v10835_v44 = vld [vmem:[#allocation15 + $0x304] ss:$16 sps:$4 sm:$0xff]  }
 0x88a   : > { %7139 = vmatpush1.bf16.msra.mxu0 %v10725_v54  ;;  %7221 = vmatpush1.bf16.msra.mxu1 %v10728_v59  ;;  %v6153_v54 = vrot.slane %v12312_v42, %v11975_v49  ;;  %v1276_v59 = vadd.f32 %v1275_v16, %v1274_v52  ;;  %v10832_v52 = vld [vmem:[#allocation15 + $0x2ec] ss:$16 sps:$4 sm:$0xff]   ;;  %v10830_v16 = vld [vmem:[#allocation15 + $0x2e8] ss:$16 sps:$4 sm:$0xff]  }
 0x88b   : > { %7140 = vmatprep.subr.bf16.mxu0 %v10733_v46  ;;  %7222 = vmatprep.subr.bf16.mxu1 %v10736_v13 }
 0x88e   : > { %7141 = vmatpush1.bf16.msra.mxu0 %v10731_v20  ;;  %7223 = vmatpush1.bf16.msra.mxu1 %v10734_v55 }
 0x88f   : > { %7142 = vmatprep.subr.bf16.mxu0 %v10739_v47  ;;  %7224 = vmatprep.subr.bf16.mxu1 %v10742_v53 }
 0x892   : > { %7143 = vmatpush1.bf16.msra.mxu0 %v10737_v23  ;;  %7225 = vmatpush1.bf16.msra.mxu1 %v10740_v14  ;;  %v1299_v14 = vmul.f32 0.0625, %v1276_v59  ;;  %v10836_v59 = vld [vmem:[#allocation15 + $0x308] ss:$16 sps:$4 sm:$0xff]  }
 0x893   : > { %7144 = vmatprep.subr.bf16.mxu0 %v10745_v1  ;;  %7226 = vmatprep.subr.bf16.mxu1 %v10748_v4 }
 0x896   : > { %7145 = vmatpush1.bf16.msra.mxu0 %v10743_v24  ;;  %7227 = vmatpush1.bf16.msra.mxu1 %v10746_v38  ;;  %v1300_v38 = vmul.f32 0.0625, %v1283_v60  ;;  %v1285_v60 = vrot.slane %v11910_v18, 4 }
 0x897   : > { %7146 = vmatprep.subr.bf16.mxu0 %v10751_v5  ;;  %7228 = vmatprep.subr.bf16.mxu1 %v10754_v17 }
 0x89a   : > { %7147 = vmatpush1.bf16.msra.mxu0 %v10749_v8  ;;  %7229 = vmatpush1.bf16.msra.mxu1 %v10752_v3 }
 0x89b   : > { %7148 = vmatprep.subr.bf16.mxu0 %v10757_v9  ;;  %7230 = vmatprep.subr.bf16.mxu1 %v10760_v63  ;;  %v10785_v9 = vld [vmem:[#allocation15 + $0x200] ss:$16 sps:$4 sm:$0xff]   ;;  %v10788_v63 = vld [vmem:[#allocation15 + $0x208] ss:$16 sps:$4 sm:$0xff]  }
 0x89e   : > { %7149 = vmatpush1.bf16.msra.mxu0 %v10755_v32  ;;  %7231 = vmatpush1.bf16.msra.mxu1 %v10758_v33  ;;  %v10793_v33 = vld [vmem:[#allocation15 + $0x224] ss:$16 sps:$4 sm:$0xff]  }
 0x89f   : > { %7150 = vmatprep.subr.bf16.mxu0 %v10763_v36  ;;  %7232 = vmatprep.subr.bf16.mxu1 %v10766_v11  ;;  %v10796_v36 = vld [vmem:[#allocation15 + $0x22c] ss:$16 sps:$4 sm:$0xff]   ;;  %v10791_v11 = vld [vmem:[#allocation15 + $0x220] ss:$16 sps:$4 sm:$0xff]  }
 0x8a2   : > { %7151 = vmatpush1.bf16.msra.mxu0 %v10761_v12  ;;  %7233 = vmatpush1.bf16.msra.mxu1 %v10764_v51  ;;  %v10794_v12 = vld [vmem:[#allocation15 + $0x228] ss:$16 sps:$4 sm:$0xff]   ;;  %v10799_v51 = vld [vmem:[#allocation15 + $0x244] ss:$16 sps:$4 sm:$0xff]  }
 0x8a3   : > { %7152 = vmatprep.subr.bf16.mxu0 %v10769_v15  ;;  %7234 = vmatprep.subr.bf16.mxu1 %v10772_v58  ;;  %v10802_v15 = vld [vmem:[#allocation15 + $0x24c] ss:$16 sps:$4 sm:$0xff]   ;;  %v10797_v58 = vld [vmem:[#allocation15 + $0x240] ss:$16 sps:$4 sm:$0xff]  }
 0x8a6   : > { %7153 = vmatpush1.bf16.msra.mxu0 %v10767_v62  ;;  %7235 = vmatpush1.bf16.msra.mxu1 %v10770_v57  ;;  %v10800_v62 = vld [vmem:[#allocation15 + $0x248] ss:$16 sps:$4 sm:$0xff]   ;;  %v10805_v57 = vld [vmem:[#allocation15 + $0x264] ss:$16 sps:$4 sm:$0xff]  }
 0x8a7   : > { %7154 = vmatprep.subr.bf16.mxu0 %v10775_v35  ;;  %7236 = vmatprep.subr.bf16.mxu1 %v10778_v27  ;;  %v10808_v35 = vld [vmem:[#allocation15 + $0x26c] ss:$16 sps:$4 sm:$0xff]   ;;  %v10803_v27 = vld [vmem:[#allocation15 + $0x260] ss:$16 sps:$4 sm:$0xff]  }
 0x8aa   : > { %7155 = vmatpush1.bf16.msra.mxu0 %v10773_v28  ;;  %7237 = vmatpush1.bf16.msra.mxu1 %v10776_v56  ;;  %v10806_v28 = vld [vmem:[#allocation15 + $0x268] ss:$16 sps:$4 sm:$0xff]   ;;  %v10811_v56 = vld [vmem:[#allocation15 + $0x284] ss:$16 sps:$4 sm:$0xff]  }
 0x8ab   : > { %7156 = vmatprep.subr.bf16.mxu0 %v10781_v29  ;;  %7238 = vmatprep.subr.bf16.mxu1 %v10784_v41  ;;  %v10814_v29 = vld [vmem:[#allocation15 + $0x28c] ss:$16 sps:$4 sm:$0xff]   ;;  %v10809_v41 = vld [vmem:[#allocation15 + $0x280] ss:$16 sps:$4 sm:$0xff]  }
 0x8ae   : > { %7157 = vmatpush1.bf16.msra.mxu0 %v10779_v30  ;;  %7239 = vmatpush1.bf16.msra.mxu1 %v10782_v61  ;;  %v10812_v30 = vld [vmem:[#allocation15 + $0x288] ss:$16 sps:$4 sm:$0xff]   ;;  %v10817_v61 = vld [vmem:[#allocation15 + $0x2a4] ss:$16 sps:$4 sm:$0xff]  }
 0x8af   : > { %7167 = vmatprep.subr.bf16.mxu0 %v10787_v2  ;;  %7249 = vmatprep.subr.bf16.mxu1 %v10790_v31  ;;  %v10820_v2 = vld [vmem:[#allocation15 + $0x2ac] ss:$16 sps:$4 sm:$0xff]   ;;  %v10815_v31 = vld [vmem:[#allocation15 + $0x2a0] ss:$16 sps:$4 sm:$0xff]  }
 0x904   : > { %v6200_v46 = vpop.f32.mrb[48].mxu0  ;;  %v6241_v13 = vpop.f32.mrb[48].mxu1 }
 0x905   : > { %v6201_v20 = vadd.f32 %v6200_v46, %v6149_v45  ;;  %v6202_v0 = vpop.f32.mrb[49].mxu0  ;;  %v6243_v55 = vpop.f32.mrb[49].mxu1  ;;  %v10838_v45 = vld [vmem:[#allocation15 + $0x30c] ss:$16 sps:$4 sm:$0xff]   ;;  %v10841_v46 = vld [vmem:[#allocation15 + $0x324] ss:$16 sps:$4 sm:$0xff]  }
 0x906   : > { %v6203_v47 = vadd.f32 %v6202_v0, %v6153_v54  ;;  %v6204_v53 = vpop.f32.mrb[50].mxu0  ;;  %v6245_v23 = vpop.f32.mrb[50].mxu1  ;;  %v10833_v54 = vld [vmem:[#allocation15 + $0x300] ss:$16 sps:$4 sm:$0xff]  }
 0x907   : > { %v6242_v1 = vadd.f32 %v6241_v13, %v6201_v20  ;;  %v6205_v4 = vpop.f32.mrb[51].mxu0  ;;  %v6246_v24 = vpop.f32.mrb[51].mxu1  ;;  %v10844_v13 = vld [vmem:[#allocation15 + $0x32c] ss:$16 sps:$4 sm:$0xff]   ;;  %v1292_v20 = vrot.slane %v11914_v22, 4  ;;  %v1286_v23 = vadd.f32 %v1285_v60, %v11910_v18 }
 0x908   : > { %v6244_v5 = vadd.f32 %v6243_v55, %v6203_v47  ;;  %v10839_v0 = vld [vmem:[#allocation15 + $0x320] ss:$16 sps:$4 sm:$0xff]   ;;  %v10842_v55 = vld [vmem:[#allocation15 + $0x328] ss:$16 sps:$4 sm:$0xff]   ;;  %v10847_v47 = vld [vmem:[#allocation15 + $0x344] ss:$16 sps:$4 sm:$0xff]  }
 0x909   : > { %v6330_v17 = vadd.f32 %v6242_v1, %v1299_v14  ;;  %v10850_v53 = vld [vmem:[#allocation15 + $0x34c] ss:$16 sps:$4 sm:$0xff]   ;;  %v1293_v14 = vadd.f32 %v1292_v20, %v11914_v22  ;;  %v10845_v1 = vld [vmem:[#allocation15 + $0x340] ss:$16 sps:$4 sm:$0xff]   ;;  %v10848_v4 = vld [vmem:[#allocation15 + $0x348] ss:$16 sps:$4 sm:$0xff]  }
 0x90a   : > { %v6331_v8 = vadd.f32 %v6244_v5, %v1300_v38  ;;  %v10853_v24 = vld [vmem:[#allocation15 + $0x364] ss:$16 sps:$4 sm:$0xff]   ;;  %v10856_v38 = vld [vmem:[#allocation15 + $0x36c] ss:$16 sps:$4 sm:$0xff]   ;;  %v1287_v5 = vrot.slane %v1286_v23, 2 }
 0x90b   : > { %v6334_v32 = vpack.c.bf16 %v6330_v17, %v6330_v17  ;;  %v1294_v17 = vrot.slane %v1293_v14, 2  ;;  %v10862_v18 = vld [vmem:[#allocation15 + $0x38c] ss:$16 sps:$4 sm:$0xff]   ;;  %v10875_v20 = vld [vmem:[#allocation15 + $0x3e0] ss:$16 sps:$4 sm:$0xff]  }
 0x90c   : > { %v6335_v3 = vpack.c.bf16 %v6331_v8, %v6331_v8  ;;  %v10851_v8 = vld [vmem:[#allocation15 + $0x360] ss:$16 sps:$4 sm:$0xff]  }
 0x90d   : > { %v1295_v22 = vadd.f32 %v1294_v17, %v1293_v14 }
 0x90e   : > { %7158 = vmatprep.mubr.bf16.mxu0 %v6335_v3  ;;  %7240 = vmatprep.mubr.bf16.mxu1 %v6335_v3  ;;  %v10854_v3 = vld [vmem:[#allocation15 + $0x368] ss:$16 sps:$4 sm:$0xff]  }
 0x90f   : > { %7159 = vmatmul.mubr.bf16.vlgmr.msra.gmra.mrb[56].mxu0 %v6334_v32  ;;  %7241 = vmatmul.mubr.bf16.vlgmr.msra.gmra.mrb[56].mxu1 %v6334_v32  ;;  %v10857_v32 = vld [vmem:[#allocation15 + $0x380] ss:$16 sps:$4 sm:$0xff]  }
 0x910   : > { %7168 = vmatpush1.bf16.msra.mxu0 %v10785_v9  ;;  %7250 = vmatpush1.bf16.msra.mxu1 %v10788_v63  ;;  %v10859_v9 = vld [vmem:[#allocation15 + $0x384] ss:$16 sps:$4 sm:$0xff]   ;;  %v1288_v63 = vadd.f32 %v1287_v5, %v1286_v23  ;;  %v10892_v5 = vld [vmem:[#allocation17 + $0x2c] ss:$16 sps:$4 sm:$0xff]  }
 0x911   : > { %7169 = vmatprep.subr.bf16.mxu0 %v10793_v33  ;;  %7251 = vmatprep.subr.bf16.mxu1 %v10796_v36  ;;  %v10860_v33 = vld [vmem:[#allocation15 + $0x388] ss:$16 sps:$4 sm:$0xff]   ;;  %v10865_v36 = vld [vmem:[#allocation15 + $0x3a4] ss:$16 sps:$4 sm:$0xff]  }
 0x914   : > { %7170 = vmatpush1.bf16.msra.mxu0 %v10791_v11  ;;  %7252 = vmatpush1.bf16.msra.mxu1 %v10794_v12  ;;  %v10868_v11 = vld [vmem:[#allocation15 + $0x3ac] ss:$16 sps:$4 sm:$0xff]   ;;  %v11514_v12 = vmov 1983009808  }
 0x915   : > { %7171 = vmatprep.subr.bf16.mxu0 %v10799_v51  ;;  %7253 = vmatprep.subr.bf16.mxu1 %v10802_v15  ;;  %v7458_v51 = vunpack.c.l.s4 %v11514_v12  ;;  %v1289_v15 = vrot.slane %v1288_v63, 1  ;;  %v10907_v12 = vld [vmem:[#allocation17 + $0x84] ss:$16 sps:$4 sm:$0xff]  }
 0x918   : > { %7172 = vmatpush1.bf16.msra.mxu0 %v10797_v58  ;;  %7254 = vmatpush1.bf16.msra.mxu1 %v10800_v62  ;;  %v10863_v58 = vld [vmem:[#allocation15 + $0x3a0] ss:$16 sps:$4 sm:$0xff]   ;;  %v10866_v62 = vld [vmem:[#allocation15 + $0x3a8] ss:$16 sps:$4 sm:$0xff]  }
 0x919   : > { %7173 = vmatprep.subr.bf16.mxu0 %v10805_v57  ;;  %7255 = vmatprep.subr.bf16.mxu1 %v10808_v35  ;;  %v1296_v57 = vrot.slane %v1295_v22, 1  ;;  %v12322_v35 = vld [vmem:[#allocation20 + $0x8] sm:$0xff] }
 0x91c   : > { %7174 = vmatpush1.bf16.msra.mxu0 %v10803_v27  ;;  %7256 = vmatpush1.bf16.msra.mxu1 %v10806_v28  ;;  %v6157_v27 = vrot.slane %v12322_v35, %v11942_v25  ;;  %v10871_v28 = vld [vmem:[#allocation15 + $0x3c4] ss:$16 sps:$4 sm:$0xff]  }
 0x91d   : > { %7175 = vmatprep.subr.bf16.mxu0 %v10811_v56  ;;  %7257 = vmatprep.subr.bf16.mxu1 %v10814_v29  ;;  %v10874_v56 = vld [vmem:[#allocation15 + $0x3cc] ss:$16 sps:$4 sm:$0xff]   ;;  %v6161_v29 = vrot.slane %v12322_v35, %v11975_v49  ;;  %v10877_v25 = vld [vmem:[#allocation15 + $0x3e4] ss:$16 sps:$4 sm:$0xff]  }
 0x920   : > { %7176 = vmatpush1.bf16.msra.mxu0 %v10809_v41  ;;  %7258 = vmatpush1.bf16.msra.mxu1 %v10812_v30  ;;  %v7459_v41 = vunpack.c.0.s8 %v7458_v51  ;;  %v1290_v30 = vadd.f32 %v1289_v15, %v1288_v63  ;;  %v10893_v63 = vld [vmem:[#allocation17 + $0x40] ss:$16 sps:$4 sm:$0xff]   ;;  %v10910_v51 = vld [vmem:[#allocation17 + $0x8c] ss:$16 sps:$4 sm:$0xff]  }
 0x921   : > { %7177 = vmatprep.subr.bf16.mxu0 %v10817_v61  ;;  %7259 = vmatprep.subr.bf16.mxu1 %v10820_v2  ;;  %v10905_v15 = vld [vmem:[#allocation17 + $0x80] ss:$16 sps:$4 sm:$0xff]  }
 0x922   : > { %v12329_v49 = vsub.s32 %v7459_v41, %v11882_v39  ;;  %v10917_v41 = vld [vmem:[#allocation17 + $0xc0] ss:$16 sps:$4 sm:$0xff]  }
 0x924   : > { %7178 = vmatpush1.bf16.msra.mxu0 %v10815_v31  ;;  %7260 = vmatpush1.bf16.msra.mxu1 %v10818_v6  ;;  %v1297_v31 = vadd.f32 %v1296_v57, %v1295_v22  ;;  %v10869_v6 = vld [vmem:[#allocation15 + $0x3c0] ss:$16 sps:$4 sm:$0xff]   ;;  %v10896_v22 = vld [vmem:[#allocation17 + $0x48] ss:$16 sps:$4 sm:$0xff]   ;;  %v10916_v57 = vld [vmem:[#allocation17 + $0xac] ss:$16 sps:$4 sm:$0xff]  }
 0x925   : > { %7179 = vmatprep.subr.bf16.mxu0 %v10823_v10  ;;  %7261 = vmatprep.subr.bf16.mxu1 %v10826_v43  ;;  %v10872_v10 = vld [vmem:[#allocation15 + $0x3c8] ss:$16 sps:$4 sm:$0xff]  }
 0x928   : > { %7180 = vmatpush1.bf16.msra.mxu0 %v10821_v34  ;;  %7262 = vmatpush1.bf16.msra.mxu1 %v10824_v7 }
 0x929   : > { %7181 = vmatprep.subr.bf16.mxu0 %v10829_v19  ;;  %7263 = vmatprep.subr.bf16.mxu1 %v10832_v52  ;;  %v10880_v19 = vld [vmem:[#allocation15 + $0x3ec] ss:$16 sps:$4 sm:$0xff]  }
 0x92c   : > { %7182 = vmatpush1.bf16.msra.mxu0 %v10827_v37  ;;  %7264 = vmatpush1.bf16.msra.mxu1 %v10830_v16 }
 0x92d   : > { %7183 = vmatprep.subr.bf16.mxu0 %v10835_v44  ;;  %7265 = vmatprep.subr.bf16.mxu1 %v10838_v45  ;;  %v1301_v44 = vmul.f32 0.0625, %v1290_v30  ;;  %v10920_v30 = vld [vmem:[#allocation17 + $0xc8] ss:$16 sps:$4 sm:$0xff]  }
 0x930   : > { %7184 = vmatpush1.bf16.msra.mxu0 %v10833_v54  ;;  %7266 = vmatpush1.bf16.msra.mxu1 %v10836_v59 }
 0x931   : > { %7185 = vmatprep.subr.bf16.mxu0 %v10841_v46  ;;  %7267 = vmatprep.subr.bf16.mxu1 %v10844_v13  ;;  %v12331_v46 = vld [vmem:[#allocation9] sm:$0xff]  ;;  %v1302_v13 = vmul.f32 0.0625, %v1297_v31  ;;  %v10923_v31 = vld [vmem:[#allocation17 + $0xe0] ss:$16 sps:$4 sm:$0xff]  }
 0x932   : > { %v12335_v39 = vrot.slane %v12331_v46, %v12329_v49 }
 0x934   : > { %7186 = vmatpush1.bf16.msra.mxu0 %v10839_v0  ;;  %7268 = vmatpush1.bf16.msra.mxu1 %v10842_v55  ;;  %v10878_v0 = vld [vmem:[#allocation15 + $0x3e8] ss:$16 sps:$4 sm:$0xff]   ;;  %v7471_v17 = vcombine.high %v12335_v39, %v12335_v39 }
 0x935   : > { %7187 = vmatprep.subr.bf16.mxu0 %v10847_v47  ;;  %7269 = vmatprep.subr.bf16.mxu1 %v10850_v53  ;;  %v10883_v47 = vld [vmem:[#allocation17 + $0x4] ss:$16 sps:$4 sm:$0xff]   ;;  %v10886_v53 = vld [vmem:[#allocation17 + $0xc] ss:$16 sps:$4 sm:$0xff]  }
 0x938   : > { %7188 = vmatpush1.bf16.msra.mxu0 %v10845_v1  ;;  %7270 = vmatpush1.bf16.msra.mxu1 %v10848_v4  ;;  %v10881_v1 = vld [vmem:[#allocation17] ss:$16 sps:$4 sm:$0xff]   ;;  %v10884_v4 = vld [vmem:[#allocation17 + $0x8] ss:$16 sps:$4 sm:$0xff]  }
 0x939   : > { %7189 = vmatprep.subr.bf16.mxu0 %v10853_v24  ;;  %7271 = vmatprep.subr.bf16.mxu1 %v10856_v38  ;;  %v10889_v38 = vld [vmem:[#allocation17 + $0x24] ss:$16 sps:$4 sm:$0xff]  }
 0x93c   : > { %7190 = vmatpush1.bf16.msra.mxu0 %v10851_v8  ;;  %7272 = vmatpush1.bf16.msra.mxu1 %v10854_v3  ;;  %v10887_v8 = vld [vmem:[#allocation17 + $0x20] ss:$16 sps:$4 sm:$0xff]   ;;  %v10890_v3 = vld [vmem:[#allocation17 + $0x28] ss:$16 sps:$4 sm:$0xff]  }
 0x93d   : > { %7191 = vmatprep.subr.bf16.mxu0 %v10859_v9  ;;  %7273 = vmatprep.subr.bf16.mxu1 %v10862_v18  ;;  %v10895_v9 = vld [vmem:[#allocation17 + $0x44] ss:$16 sps:$4 sm:$0xff]   ;;  %v10898_v18 = vld [vmem:[#allocation17 + $0x4c] ss:$16 sps:$4 sm:$0xff]  }
 0x940   : > { %7192 = vmatpush1.bf16.msra.mxu0 %v10857_v32  ;;  %7274 = vmatpush1.bf16.msra.mxu1 %v10860_v33  ;;  %v10901_v32 = vld [vmem:[#allocation17 + $0x64] ss:$16 sps:$4 sm:$0xff]   ;;  %v10904_v33 = vld [vmem:[#allocation17 + $0x6c] ss:$16 sps:$4 sm:$0xff]  }
 0x941   : > { %7193 = vmatprep.subr.bf16.mxu0 %v10865_v36  ;;  %7275 = vmatprep.subr.bf16.mxu1 %v10868_v11  ;;  %v10899_v36 = vld [vmem:[#allocation17 + $0x60] ss:$16 sps:$4 sm:$0xff]   ;;  %v10902_v11 = vld [vmem:[#allocation17 + $0x68] ss:$16 sps:$4 sm:$0xff]  }
 0x944   : > { %v6282_v61 = vpop.f32.mrb[52].mxu0  ;;  %v6323_v2 = vpop.f32.mrb[52].mxu1  ;;  %7194 = vmatpush1.bf16.msra.mxu0 %v10863_v58  ;;  %7276 = vmatpush1.bf16.msra.mxu1 %v10866_v62  ;;  %v10908_v58 = vld [vmem:[#allocation17 + $0x88] ss:$16 sps:$4 sm:$0xff]   ;;  %v10913_v62 = vld [vmem:[#allocation17 + $0xa4] ss:$16 sps:$4 sm:$0xff]  }
 0x945   : > { %v6283_v43 = vadd.f32 %v6282_v61, %v6157_v27  ;;  %v6284_v34 = vpop.f32.mrb[53].mxu0  ;;  %v6325_v7 = vpop.f32.mrb[53].mxu1  ;;  %7195 = vmatprep.subr.bf16.mxu0 %v10871_v28  ;;  %7277 = vmatprep.subr.bf16.mxu1 %v10874_v56  ;;  %v10911_v27 = vld [vmem:[#allocation17 + $0xa0] ss:$16 sps:$4 sm:$0xff]   ;;  %v10914_v28 = vld [vmem:[#allocation17 + $0xa8] ss:$16 sps:$4 sm:$0xff]  }
 0x946   : > { %v6285_v52 = vadd.f32 %v6284_v34, %v6161_v29  ;;  %v6286_v37 = vpop.f32.mrb[54].mxu0  ;;  %v6327_v16 = vpop.f32.mrb[54].mxu1  ;;  %v10919_v56 = vld [vmem:[#allocation17 + $0xc4] ss:$16 sps:$4 sm:$0xff]   ;;  %v10922_v29 = vld [vmem:[#allocation17 + $0xcc] ss:$16 sps:$4 sm:$0xff]  }
 0x947   : > { %v6324_v45 = vadd.f32 %v6323_v2, %v6283_v43  ;;  %v6287_v54 = vpop.f32.mrb[55].mxu0  ;;  %v6328_v59 = vpop.f32.mrb[55].mxu1  ;;  %v10925_v61 = vld [vmem:[#allocation17 + $0xe4] ss:$16 sps:$4 sm:$0xff]   ;;  %v10928_v2 = vld [vmem:[#allocation17 + $0xec] ss:$16 sps:$4 sm:$0xff]  }
 0x948   : > { %v6326_v60 = vadd.f32 %v6325_v7, %v6285_v52  ;;  %7196 = vmatpush1.bf16.msra.mxu0 %v10869_v6  ;;  %7278 = vmatpush1.bf16.msra.mxu1 %v10872_v10  ;;  %v10926_v6 = vld [vmem:[#allocation17 + $0xe8] ss:$16 sps:$4 sm:$0xff]   ;;  %v10931_v10 = vld [vmem:[#allocation17 + $0x104] ss:$16 sps:$4 sm:$0xff]   ;;  %v10934_v43 = vld [vmem:[#allocation17 + $0x10c] ss:$16 sps:$4 sm:$0xff]  }
 0x949   : > { %v6332_v55 = vadd.f32 %v6324_v45, %v1301_v44  ;;  %7197 = vmatprep.subr.bf16.mxu0 %v10877_v25  ;;  %7279 = vmatprep.subr.bf16.mxu1 %v10880_v19  ;;  %v10929_v34 = vld [vmem:[#allocation17 + $0x100] ss:$16 sps:$4 sm:$0xff]   ;;  %v10932_v7 = vld [vmem:[#allocation17 + $0x108] ss:$16 sps:$4 sm:$0xff]   ;;  %v10937_v25 = vld [vmem:[#allocation17 + $0x124] ss:$16 sps:$4 sm:$0xff]  }
 0x94a   : > { %v6333_v23 = vadd.f32 %v6326_v60, %v1302_v13  ;;  %v10940_v19 = vld [vmem:[#allocation17 + $0x12c] ss:$16 sps:$4 sm:$0xff]   ;;  %v10935_v52 = vld [vmem:[#allocation17 + $0x120] ss:$16 sps:$4 sm:$0xff]   ;;  %v10938_v37 = vld [vmem:[#allocation17 + $0x128] ss:$16 sps:$4 sm:$0xff]  }
 0x94b   : > { %v6336_v24 = vpack.c.bf16 %v6332_v55, %v6332_v55  ;;  %v10943_v16 = vld [vmem:[#allocation17 + $0x144] ss:$16 sps:$4 sm:$0xff]   ;;  %v10946_v44 = vld [vmem:[#allocation17 + $0x14c] ss:$16 sps:$4 sm:$0xff]   ;;  %v10941_v45 = vld [vmem:[#allocation17 + $0x140] ss:$16 sps:$4 sm:$0xff]  }
 0x94c   : > { %v6337_v14 = vpack.c.bf16 %v6333_v23, %v6333_v23  ;;  %7198 = vmatpush1.bf16.msra.mxu0 %v10875_v20  ;;  %7280 = vmatpush1.bf16.msra.mxu1 %v10878_v0  ;;  %v10944_v54 = vld [vmem:[#allocation17 + $0x148] ss:$16 sps:$4 sm:$0xff]   ;;  %v10949_v59 = vld [vmem:[#allocation17 + $0x164] ss:$16 sps:$4 sm:$0xff]   ;;  %v10952_v13 = vld [vmem:[#allocation17 + $0x16c] ss:$16 sps:$4 sm:$0xff]  }
 0x94d   : > { %8117 = vmatprep.subr.bf16.mxu0 %v10883_v47  ;;  %8199 = vmatprep.subr.bf16.mxu1 %v10886_v53  ;;  %v10947_v60 = vld [vmem:[#allocation17 + $0x160] ss:$16 sps:$4 sm:$0xff]   ;;  %v10950_v20 = vld [vmem:[#allocation17 + $0x168] ss:$16 sps:$4 sm:$0xff]   ;;  %v10955_v0 = vld [vmem:[#allocation17 + $0x184] ss:$16 sps:$4 sm:$0xff]  }
 0x94e   : > { %7199 = vmatprep.mubr.bf16.mxu0 %v6337_v14  ;;  %7281 = vmatprep.mubr.bf16.mxu1 %v6337_v14  ;;  %v10958_v55 = vld [vmem:[#allocation17 + $0x18c] ss:$16 sps:$4 sm:$0xff]   ;;  %v10953_v47 = vld [vmem:[#allocation17 + $0x180] ss:$16 sps:$4 sm:$0xff]   ;;  %v10956_v53 = vld [vmem:[#allocation17 + $0x188] ss:$16 sps:$4 sm:$0xff]  }
 0x94f   : > { %7200 = vmatmul.mubr.bf16.vlgmr.msra.gmra.mrb[56].mxu0 %v6336_v24  ;;  %7282 = vmatmul.mubr.bf16.vlgmr.msra.gmra.mrb[56].mxu1 %v6336_v24  ;;  %v10961_v23 = vld [vmem:[#allocation17 + $0x1a4] ss:$16 sps:$4 sm:$0xff]   ;;  %v10964_v14 = vld [vmem:[#allocation17 + $0x1ac] ss:$16 sps:$4 sm:$0xff]  }
 0x950   : > { %8118 = vmatpush1.bf16.msra.mxu0 %v10881_v1  ;;  %8200 = vmatpush1.bf16.msra.mxu1 %v10884_v4  ;;  %v10959_v1 = vld [vmem:[#allocation17 + $0x1a0] ss:$16 sps:$4 sm:$0xff]   ;;  %v10962_v4 = vld [vmem:[#allocation17 + $0x1a8] ss:$16 sps:$4 sm:$0xff]   ;;  %v10967_v24 = vld [vmem:[#allocation17 + $0x1c4] ss:$16 sps:$4 sm:$0xff]  }
 0x951   : > { %8119 = vmatprep.subr.bf16.mxu0 %v10889_v38  ;;  %8201 = vmatprep.subr.bf16.mxu1 %v10892_v5  ;;  %v10970_v38 = vld [vmem:[#allocation17 + $0x1cc] ss:$16 sps:$4 sm:$0xff]   ;;  %v10965_v5 = vld [vmem:[#allocation17 + $0x1c0] ss:$16 sps:$4 sm:$0xff]  }
 0x952   : > { %8149 = vmatprep.mubr.bf16.mxu0 %v7471_v17  ;;  %8231 = vmatprep.mubr.bf16.mxu1 %v7471_v17  ;;  %v10968_v17 = vld [vmem:[#allocation17 + $0x1c8] ss:$16 sps:$4 sm:$0xff]  }
 0x954   : > { %8120 = vmatpush1.bf16.msra.mxu0 %v10887_v8  ;;  %8202 = vmatpush1.bf16.msra.mxu1 %v10890_v3  ;;  %v10973_v8 = vld [vmem:[#allocation17 + $0x1e4] ss:$16 sps:$4 sm:$0xff]   ;;  %v10976_v3 = vld [vmem:[#allocation17 + $0x1ec] ss:$16 sps:$4 sm:$0xff]  }
 0x955   : > { %8121 = vmatprep.subr.bf16.mxu0 %v10895_v9  ;;  %8203 = vmatprep.subr.bf16.mxu1 %v10898_v18  ;;  %v7456_v9 = vcombine.high %v12331_v46, %v12331_v46  ;;  %v10971_v18 = vld [vmem:[#allocation17 + $0x1e0] ss:$16 sps:$4 sm:$0xff]  }
 0x958   : > { %8122 = vmatpush1.bf16.msra.mxu0 %v10893_v63  ;;  %8204 = vmatpush1.bf16.msra.mxu1 %v10896_v22  ;;  %v10974_v63 = vld [vmem:[#allocation17 + $0x1e8] ss:$16 sps:$4 sm:$0xff]   ;;  %v10979_v22 = vld [vmem:[#allocation17 + $0x204] ss:$16 sps:$4 sm:$0xff]  }
 0x959   : > { %8123 = vmatprep.subr.bf16.mxu0 %v10901_v32  ;;  %8205 = vmatprep.subr.bf16.mxu1 %v10904_v33  ;;  %v10982_v32 = vld [vmem:[#allocation17 + $0x20c] ss:$16 sps:$4 sm:$0xff]   ;;  %v12342_v33 = vrot.slane %v7456_v9, %v12329_v49  ;;  %v10986_v49 = vld [vmem:[#allocation17 + $0x228] ss:$16 sps:$4 sm:$0xff]   ;;  %v11057_v9 = vld [vmem:[#allocation17 + $0x3a4] ss:$16 sps:$4 sm:$0xff]  }
 0x95b   : > { %v7472_v46 = vcombine.high %v12342_v33, %v12342_v33 }
 0x95c   : > { %8124 = vmatpush1.bf16.msra.mxu0 %v10899_v36  ;;  %8206 = vmatpush1.bf16.msra.mxu1 %v10902_v11  ;;  %v10977_v36 = vld [vmem:[#allocation17 + $0x200] ss:$16 sps:$4 sm:$0xff]   ;;  %v10980_v11 = vld [vmem:[#allocation17 + $0x208] ss:$16 sps:$4 sm:$0xff]  }
 0x95d   : > { %8125 = vmatprep.subr.bf16.mxu0 %v10907_v12  ;;  %8207 = vmatprep.subr.bf16.mxu1 %v10910_v51  ;;  %v10985_v12 = vld [vmem:[#allocation17 + $0x224] ss:$16 sps:$4 sm:$0xff]   ;;  %v10988_v51 = vld [vmem:[#allocation17 + $0x22c] ss:$16 sps:$4 sm:$0xff]  }
 0x960   : > { %8126 = vmatpush1.bf16.msra.mxu0 %v10905_v15  ;;  %8208 = vmatpush1.bf16.msra.mxu1 %v10908_v58  ;;  %v10983_v15 = vld [vmem:[#allocation17 + $0x220] ss:$16 sps:$4 sm:$0xff]   ;;  %v10991_v58 = vld [vmem:[#allocation17 + $0x244] ss:$16 sps:$4 sm:$0xff]  }
 0x961   : > { %8127 = vmatprep.subr.bf16.mxu0 %v10913_v62  ;;  %8209 = vmatprep.subr.bf16.mxu1 %v10916_v57  ;;  %v10994_v62 = vld [vmem:[#allocation17 + $0x24c] ss:$16 sps:$4 sm:$0xff]   ;;  %v10989_v57 = vld [vmem:[#allocation17 + $0x240] ss:$16 sps:$4 sm:$0xff]  }
 0x964   : > { %8128 = vmatpush1.bf16.msra.mxu0 %v10911_v27  ;;  %8210 = vmatpush1.bf16.msra.mxu1 %v10914_v28  ;;  %v10992_v27 = vld [vmem:[#allocation17 + $0x248] ss:$16 sps:$4 sm:$0xff]   ;;  %v10997_v28 = vld [vmem:[#allocation17 + $0x264] ss:$16 sps:$4 sm:$0xff]  }
 0x965   : > { %8129 = vmatprep.subr.bf16.mxu0 %v10919_v56  ;;  %8211 = vmatprep.subr.bf16.mxu1 %v10922_v29  ;;  %v11000_v56 = vld [vmem:[#allocation17 + $0x26c] ss:$16 sps:$4 sm:$0xff]   ;;  %v10998_v29 = vld [vmem:[#allocation17 + $0x268] ss:$16 sps:$4 sm:$0xff]  }
 0x968   : > { %8130 = vmatpush1.bf16.msra.mxu0 %v10917_v41  ;;  %8212 = vmatpush1.bf16.msra.mxu1 %v10920_v30  ;;  %v11003_v41 = vld [vmem:[#allocation17 + $0x284] ss:$16 sps:$4 sm:$0xff]   ;;  %v11006_v30 = vld [vmem:[#allocation17 + $0x28c] ss:$16 sps:$4 sm:$0xff]  }
 0x969   : > { %8131 = vmatprep.subr.bf16.mxu0 %v10925_v61  ;;  %8213 = vmatprep.subr.bf16.mxu1 %v10928_v2  ;;  %v11001_v61 = vld [vmem:[#allocation17 + $0x280] ss:$16 sps:$4 sm:$0xff]   ;;  %v11004_v2 = vld [vmem:[#allocation17 + $0x288] ss:$16 sps:$4 sm:$0xff]  }
 0x96c   : > { %8132 = vmatpush1.bf16.msra.mxu0 %v10923_v31  ;;  %8214 = vmatpush1.bf16.msra.mxu1 %v10926_v6  ;;  %v11009_v31 = vld [vmem:[#allocation17 + $0x2a4] ss:$16 sps:$4 sm:$0xff]   ;;  %v11012_v6 = vld [vmem:[#allocation17 + $0x2ac] ss:$16 sps:$4 sm:$0xff]  }
 0x96d   : > { %8133 = vmatprep.subr.bf16.mxu0 %v10931_v10  ;;  %8215 = vmatprep.subr.bf16.mxu1 %v10934_v43  ;;  %v11007_v10 = vld [vmem:[#allocation17 + $0x2a0] ss:$16 sps:$4 sm:$0xff]   ;;  %v11010_v43 = vld [vmem:[#allocation17 + $0x2a8] ss:$16 sps:$4 sm:$0xff]  }
 0x970   : > { %8134 = vmatpush1.bf16.msra.mxu0 %v10929_v34  ;;  %8216 = vmatpush1.bf16.msra.mxu1 %v10932_v7  ;;  %v11015_v34 = vld [vmem:[#allocation17 + $0x2c4] ss:$16 sps:$4 sm:$0xff]   ;;  %v11018_v7 = vld [vmem:[#allocation17 + $0x2cc] ss:$16 sps:$4 sm:$0xff]  }
 0x971   : > { %8135 = vmatprep.subr.bf16.mxu0 %v10937_v25  ;;  %8217 = vmatprep.subr.bf16.mxu1 %v10940_v19  ;;  %v11013_v25 = vld [vmem:[#allocation17 + $0x2c0] ss:$16 sps:$4 sm:$0xff]   ;;  %v11016_v19 = vld [vmem:[#allocation17 + $0x2c8] ss:$16 sps:$4 sm:$0xff]  }
 0x974   : > { %8136 = vmatpush1.bf16.msra.mxu0 %v10935_v52  ;;  %8218 = vmatpush1.bf16.msra.mxu1 %v10938_v37  ;;  %v11021_v52 = vld [vmem:[#allocation17 + $0x2e4] ss:$16 sps:$4 sm:$0xff]   ;;  %v11024_v37 = vld [vmem:[#allocation17 + $0x2ec] ss:$16 sps:$4 sm:$0xff]  }
 0x975   : > { %8137 = vmatprep.subr.bf16.mxu0 %v10943_v16  ;;  %8219 = vmatprep.subr.bf16.mxu1 %v10946_v44  ;;  %v11019_v16 = vld [vmem:[#allocation17 + $0x2e0] ss:$16 sps:$4 sm:$0xff]   ;;  %v11022_v44 = vld [vmem:[#allocation17 + $0x2e8] ss:$16 sps:$4 sm:$0xff]  }
 0x978   : > { %8138 = vmatpush1.bf16.msra.mxu0 %v10941_v45  ;;  %8220 = vmatpush1.bf16.msra.mxu1 %v10944_v54  ;;  %v11027_v45 = vld [vmem:[#allocation17 + $0x304] ss:$16 sps:$4 sm:$0xff]   ;;  %v11030_v54 = vld [vmem:[#allocation17 + $0x30c] ss:$16 sps:$4 sm:$0xff]  }
 0x979   : > { %8139 = vmatprep.subr.bf16.mxu0 %v10949_v59  ;;  %8221 = vmatprep.subr.bf16.mxu1 %v10952_v13  ;;  %v11025_v59 = vld [vmem:[#allocation17 + $0x300] ss:$16 sps:$4 sm:$0xff]   ;;  %v11028_v13 = vld [vmem:[#allocation17 + $0x308] ss:$16 sps:$4 sm:$0xff]  }
 0x97c   : > { %8140 = vmatpush1.bf16.msra.mxu0 %v10947_v60  ;;  %8222 = vmatpush1.bf16.msra.mxu1 %v10950_v20  ;;  %v11033_v60 = vld [vmem:[#allocation17 + $0x324] ss:$16 sps:$4 sm:$0xff]   ;;  %v11036_v20 = vld [vmem:[#allocation17 + $0x32c] ss:$16 sps:$4 sm:$0xff]  }
 0x97d   : > { %8141 = vmatprep.subr.bf16.mxu0 %v10955_v0  ;;  %8223 = vmatprep.subr.bf16.mxu1 %v10958_v55  ;;  %v11031_v0 = vld [vmem:[#allocation17 + $0x320] ss:$16 sps:$4 sm:$0xff]   ;;  %v11034_v55 = vld [vmem:[#allocation17 + $0x328] ss:$16 sps:$4 sm:$0xff]  }
 0x980   : > { %8142 = vmatpush1.bf16.msra.mxu0 %v10953_v47  ;;  %8224 = vmatpush1.bf16.msra.mxu1 %v10956_v53  ;;  %v11039_v47 = vld [vmem:[#allocation17 + $0x344] ss:$16 sps:$4 sm:$0xff]   ;;  %v11042_v53 = vld [vmem:[#allocation17 + $0x34c] ss:$16 sps:$4 sm:$0xff]  }
 0x981   : > { %8143 = vmatprep.subr.bf16.mxu0 %v10961_v23  ;;  %8225 = vmatprep.subr.bf16.mxu1 %v10964_v14  ;;  %v11037_v23 = vld [vmem:[#allocation17 + $0x340] ss:$16 sps:$4 sm:$0xff]   ;;  %v11040_v14 = vld [vmem:[#allocation17 + $0x348] ss:$16 sps:$4 sm:$0xff]  }
 0x984   : > { %8144 = vmatpush1.bf16.msra.mxu0 %v10959_v1  ;;  %8226 = vmatpush1.bf16.msra.mxu1 %v10962_v4  ;;  %v11045_v1 = vld [vmem:[#allocation17 + $0x364] ss:$16 sps:$4 sm:$0xff]   ;;  %v11048_v4 = vld [vmem:[#allocation17 + $0x36c] ss:$16 sps:$4 sm:$0xff]  }
 0x985   : > { %8145 = vmatprep.subr.bf16.mxu0 %v10967_v24  ;;  %8227 = vmatprep.subr.bf16.mxu1 %v10970_v38  ;;  %v11043_v24 = vld [vmem:[#allocation17 + $0x360] ss:$16 sps:$4 sm:$0xff]   ;;  %v11046_v38 = vld [vmem:[#allocation17 + $0x368] ss:$16 sps:$4 sm:$0xff]  }
 0x988   : > { %8146 = vmatpush1.bf16.msra.mxu0 %v10965_v5  ;;  %8228 = vmatpush1.bf16.msra.mxu1 %v10968_v17  ;;  %v11051_v5 = vld [vmem:[#allocation17 + $0x384] ss:$16 sps:$4 sm:$0xff]   ;;  %v11054_v17 = vld [vmem:[#allocation17 + $0x38c] ss:$16 sps:$4 sm:$0xff]  }
 0x989   : > { %8147 = vmatprep.subr.bf16.mxu0 %v10973_v8  ;;  %8229 = vmatprep.subr.bf16.mxu1 %v10976_v3  ;;  %v11049_v8 = vld [vmem:[#allocation17 + $0x380] ss:$16 sps:$4 sm:$0xff]   ;;  %v11052_v3 = vld [vmem:[#allocation17 + $0x388] ss:$16 sps:$4 sm:$0xff]  }
 0x98c   : > { %8148 = vmatpush1.bf16.msra.mxu0 %v10971_v18  ;;  %8230 = vmatpush1.bf16.msra.mxu1 %v10974_v63  ;;  %v11060_v18 = vld [vmem:[#allocation17 + $0x3ac] ss:$16 sps:$4 sm:$0xff]   ;;  %v11055_v63 = vld [vmem:[#allocation17 + $0x3a0] ss:$16 sps:$4 sm:$0xff]  }
 0x98d   : > { %8158 = vmatprep.subr.bf16.mxu0 %v10979_v22  ;;  %8240 = vmatprep.subr.bf16.mxu1 %v10982_v32  ;;  %v11058_v22 = vld [vmem:[#allocation17 + $0x3a8] ss:$16 sps:$4 sm:$0xff]   ;;  %v11063_v32 = vld [vmem:[#allocation17 + $0x3c4] ss:$16 sps:$4 sm:$0xff]  }
 0x98f   : > { %8150 = vmatmul.mubr.bf16.vlgmr.msra.gmra.mrb[60].mxu0 %v12335_v39  ;;  %8232 = vmatmul.mubr.bf16.vlgmr.msra.gmra.mrb[60].mxu1 %v12335_v39  ;;  %v10995_v39 = vld [vmem:[#allocation17 + $0x260] ss:$16 sps:$4 sm:$0xff]  }
 0x990   : > { %8159 = vmatpush1.bf16.msra.mxu0 %v10977_v36  ;;  %8241 = vmatpush1.bf16.msra.mxu1 %v10980_v11  ;;  %v11066_v36 = vld [vmem:[#allocation17 + $0x3cc] ss:$16 sps:$4 sm:$0xff]   ;;  %v11061_v11 = vld [vmem:[#allocation17 + $0x3c0] ss:$16 sps:$4 sm:$0xff]  }
 0x991   : > { %8160 = vmatprep.subr.bf16.mxu0 %v10985_v12  ;;  %8242 = vmatprep.subr.bf16.mxu1 %v10988_v51  ;;  %v11064_v12 = vld [vmem:[#allocation17 + $0x3c8] ss:$16 sps:$4 sm:$0xff]   ;;  %v11069_v51 = vld [vmem:[#allocation17 + $0x3e4] ss:$16 sps:$4 sm:$0xff]  }
 0x992   : > { %8190 = vmatprep.mubr.bf16.mxu0 %v7472_v46  ;;  %8272 = vmatprep.mubr.bf16.mxu1 %v7472_v46  ;;  %v11072_v46 = vld [vmem:[#allocation17 + $0x3ec] ss:$16 sps:$4 sm:$0xff]  }
 0x994   : > { %8161 = vmatpush1.bf16.msra.mxu0 %v10983_v15  ;;  %8243 = vmatpush1.bf16.msra.mxu1 %v10986_v49  ;;  %v11067_v15 = vld [vmem:[#allocation17 + $0x3e0] ss:$16 sps:$4 sm:$0xff]   ;;  %v11070_v49 = vld [vmem:[#allocation17 + $0x3e8] ss:$16 sps:$4 sm:$0xff]  }
 0x995   : > { %8162 = vmatprep.subr.bf16.mxu0 %v10991_v58  ;;  %8244 = vmatprep.subr.bf16.mxu1 %v10994_v62 }
 0x998   : > { %8163 = vmatpush1.bf16.msra.mxu0 %v10989_v57  ;;  %8245 = vmatpush1.bf16.msra.mxu1 %v10992_v27 }
 0x999   : > { %8164 = vmatprep.subr.bf16.mxu0 %v10997_v28  ;;  %8246 = vmatprep.subr.bf16.mxu1 %v11000_v56 }
 0x99c   : > { %8165 = vmatpush1.bf16.msra.mxu0 %v10995_v39  ;;  %8247 = vmatpush1.bf16.msra.mxu1 %v10998_v29 }
 0x99d   : > { %8166 = vmatprep.subr.bf16.mxu0 %v11003_v41  ;;  %8248 = vmatprep.subr.bf16.mxu1 %v11006_v30  ;;  %v7109_v41 = vrot.slane %v12312_v42, %v11939_v21  ;;  %v7117_v30 = vrot.slane %v12322_v35, %v11939_v21 }
 0x9a0   : > { %8167 = vmatpush1.bf16.msra.mxu0 %v11001_v61  ;;  %8249 = vmatpush1.bf16.msra.mxu1 %v11004_v2  ;;  %v7422_v61 = vrot.slane %v12312_v42, %v11945_v26  ;;  %v7113_v2 = vrot.slane %v12312_v42, %v11972_v48 }
 0x9a1   : > { %8168 = vmatprep.subr.bf16.mxu0 %v11009_v31  ;;  %8250 = vmatprep.subr.bf16.mxu1 %v11012_v6  ;;  %v7121_v31 = vrot.slane %v12322_v35, %v11972_v48  ;;  %v7426_v6 = vrot.slane %v12312_v42, %v11978_v50 }
 0x9a4   : > { %8169 = vmatpush1.bf16.msra.mxu0 %v11007_v10  ;;  %8251 = vmatpush1.bf16.msra.mxu1 %v11010_v43  ;;  %v7434_v10 = vrot.slane %v12322_v35, %v11978_v50 }
 0x9a5   : > { %8170 = vmatprep.subr.bf16.mxu0 %v11015_v34  ;;  %8252 = vmatprep.subr.bf16.mxu1 %v11018_v7  ;;  %v7442_v34 = vrot.slane %v7422_v61, %v11945_v26 }
 0x9a8   : > { %8171 = vmatpush1.bf16.msra.mxu0 %v11013_v25  ;;  %8253 = vmatpush1.bf16.msra.mxu1 %v11016_v19 }
 0x9a9   : > { %8172 = vmatprep.subr.bf16.mxu0 %v11021_v52  ;;  %8254 = vmatprep.subr.bf16.mxu1 %v11024_v37  ;;  %v7446_v52 = vrot.slane %v7426_v6, %v11945_v26  ;;  %v7454_v37 = vrot.slane %v7434_v10, %v11945_v26 }
 0x9ac   : > { %8173 = vmatpush1.bf16.msra.mxu0 %v11019_v16  ;;  %8255 = vmatpush1.bf16.msra.mxu1 %v11022_v44 }
 0x9ad   : > { %8174 = vmatprep.subr.bf16.mxu0 %v11027_v45  ;;  %8256 = vmatprep.subr.bf16.mxu1 %v11030_v54 }
 0x9b0   : > { %8175 = vmatpush1.bf16.msra.mxu0 %v11025_v59  ;;  %8257 = vmatpush1.bf16.msra.mxu1 %v11028_v13 }
 0x9b1   : > { %8176 = vmatprep.subr.bf16.mxu0 %v11033_v60  ;;  %8258 = vmatprep.subr.bf16.mxu1 %v11036_v20 }
 0x9b4   : > { %8177 = vmatpush1.bf16.msra.mxu0 %v11031_v0  ;;  %8259 = vmatpush1.bf16.msra.mxu1 %v11034_v55 }
 0x9b5   : > { %8178 = vmatprep.subr.bf16.mxu0 %v11039_v47  ;;  %8260 = vmatprep.subr.bf16.mxu1 %v11042_v53 }
 0x9b8   : > { %8179 = vmatpush1.bf16.msra.mxu0 %v11037_v23  ;;  %8261 = vmatpush1.bf16.msra.mxu1 %v11040_v14 }
 0x9b9   : > { %8180 = vmatprep.subr.bf16.mxu0 %v11045_v1  ;;  %8262 = vmatprep.subr.bf16.mxu1 %v11048_v4 }
 0x9bc   : > { %8181 = vmatpush1.bf16.msra.mxu0 %v11043_v24  ;;  %8263 = vmatpush1.bf16.msra.mxu1 %v11046_v38 }
 0x9bd   : > { %8182 = vmatprep.subr.bf16.mxu0 %v11051_v5  ;;  %8264 = vmatprep.subr.bf16.mxu1 %v11054_v17 }
 0x9c0   : > { %8183 = vmatpush1.bf16.msra.mxu0 %v11049_v8  ;;  %8265 = vmatpush1.bf16.msra.mxu1 %v11052_v3 }
 0x9c1   : > { %8184 = vmatprep.subr.bf16.mxu0 %v11057_v9  ;;  %8266 = vmatprep.subr.bf16.mxu1 %v11060_v18 }
 0x9c4   : > { %8185 = vmatpush1.bf16.msra.mxu0 %v11055_v63  ;;  %8267 = vmatpush1.bf16.msra.mxu1 %v11058_v22 }
 0x9c5   : > { %8186 = vmatprep.subr.bf16.mxu0 %v11063_v32  ;;  %8268 = vmatprep.subr.bf16.mxu1 %v11066_v36 }
 0x9c8   : > { %8187 = vmatpush1.bf16.msra.mxu0 %v11061_v11  ;;  %8269 = vmatpush1.bf16.msra.mxu1 %v11064_v12 }
 0x9c9   : > { %8188 = vmatprep.subr.bf16.mxu0 %v11069_v51  ;;  %8270 = vmatprep.subr.bf16.mxu1 %v11072_v46 }
 0x9cc   : > { %8189 = vmatpush1.bf16.msra.mxu0 %v11067_v15  ;;  %8271 = vmatpush1.bf16.msra.mxu1 %v11070_v49 }
 0x9cf   : > { %8191 = vmatmul.mubr.bf16.vlgmr.msra.gmra.mrb[60].mxu0 %v12342_v33  ;;  %8273 = vmatmul.mubr.bf16.vlgmr.msra.gmra.mrb[60].mxu1 %v12342_v33  ;;  %v7430_v33 = vrot.slane %v12322_v35, %v11945_v26 }
 0x9d1   : > { %v7450_v7 = vrot.slane %v7430_v33, %v11945_v26 }
 0xa22   : > { %v7201_v58 = vpop.f32.mrb[56].mxu0  ;;  %v7283_v62 = vpop.f32.mrb[56].mxu1 }
 0xa23   : > { %v7203_v57 = vpop.f32.mrb[57].mxu0  ;;  %v7285_v27 = vpop.f32.mrb[57].mxu1  ;;  %v9575_v43 = vadd.f32 %v7201_v58, %v7109_v41  ;;  %v9577_v21 = vadd.f32 %v7283_v62, %v7117_v30 }
 0xa24   : > { %v7205_v28 = vpop.f32.mrb[58].mxu0  ;;  %v7287_v56 = vpop.f32.mrb[58].mxu1  ;;  %v9576_v25 = vadd.f32 %v7203_v57, %v7113_v2  ;;  %v9578_v19 = vadd.f32 %v7285_v27, %v7121_v31 }
 0xa25   : > { %v7206_v39 = vpop.f32.mrb[59].mxu0  ;;  %v7288_v29 = vpop.f32.mrb[59].mxu1  ;;  %v8284_v44 = vrot.slane %v9575_v43, %v11885_v40  ;;  %v8292_v42 = vrot.slane %v9577_v21, %v11885_v40 }
 0xa26   : > { %v8288_v59 = vrot.slane %v9576_v25, %v11885_v40  ;;  %v8296_v13 = vrot.slane %v9578_v19, %v11885_v40 }
 0xaa2   : > { %v8192_v16 = vpop.f32.mrb[60].mxu0  ;;  %v8274_v48 = vpop.f32.mrb[60].mxu1 }
 0xaa3   : > { %v9579_v45 = vadd.f32 %v8192_v16, %v7442_v34  ;;  %v9581_v50 = vadd.f32 %v8274_v48, %v7450_v7  ;;  %v8194_v35 = vpop.f32.mrb[61].mxu0  ;;  %v8276_v54 = vpop.f32.mrb[61].mxu1 }
 0xaa4   : > { %v9580_v60 = vadd.f32 %v8194_v35, %v7446_v52  ;;  %v9582_v20 = vadd.f32 %v8276_v54, %v7454_v37  ;;  %v8196_v0 = vpop.f32.mrb[62].mxu0  ;;  %v8278_v55 = vpop.f32.mrb[62].mxu1 }
 0xaa5   : > { %v8297_v47 = vmul.f32 %v9579_v45, %v8284_v44  ;;  %v8299_v26 = vmul.f32 %v9581_v50, %v8292_v42  ;;  %v8197_v53 = vpop.f32.mrb[63].mxu0  ;;  %v8279_v23 = vpop.f32.mrb[63].mxu1 }
 0xaa6   : > { %v8298_v14 = vmul.f32 %v9580_v60, %v8288_v59  ;;  %v8300_v1 = vmul.f32 %v9582_v20, %v8296_v13 }
 0xaa7   : > { %v9405_v4 = vmul.f32 -1.442695, %v8297_v47  ;;  %v9407_v24 = vmul.f32 -1.442695, %v8299_v26 }
 0xaa8   : > { %v9406_v38 = vmul.f32 -1.442695, %v8298_v14  ;;  %v9408_v5 = vmul.f32 -1.442695, %v8300_v1 }
 0xaa9   : > { %11138 = vpow2.f32 %v9405_v4 }
 0xaaa   : > { %11140 = vpow2.f32 %v9407_v24 }
 0xaab   : > { %11142 = vpow2.f32 %v9406_v38 }
 0xaac   : > { %11144 = vpow2.f32 %v9408_v5 }
 0xab3   : > { %v11139_v40 = vpop.eup %11138 }
 0xab4   : > { %v11141_v17 = vpop.eup %11140  ;;  %v8313_v8 = vadd.f32 1.0, %v11139_v40 }
 0xab5   : > { %v11143_v3 = vpop.eup %11142  ;;  %v8315_v9 = vadd.f32 1.0, %v11141_v17 }
 0xab6   : > { %v11145_v18 = vpop.eup %11144  ;;  %11146 = vrcp.f32 %v8313_v8  ;;  %v8314_v63 = vadd.f32 1.0, %v11143_v3 }
 0xab7   : > { %11148 = vrcp.f32 %v8315_v9  ;;  %v8316_v22 = vadd.f32 1.0, %v11145_v18 }
 0xab8   : > { %11150 = vrcp.f32 %v8314_v63 }
 0xab9   : > { %11152 = vrcp.f32 %v8316_v22 }
 0xac0   : > { %v11147_v32 = vpop.eup %11146 }
 0xac1   : > { %v11149_v36 = vpop.eup %11148  ;;  %v8325_v11 = vmul.f32 %v11147_v32, %v9579_v45 }
 0xac2   : > { %v11151_v12 = vpop.eup %11150  ;;  %v8327_v51 = vmul.f32 %v11149_v36, %v9581_v50 }
 0xac3   : > { %v11153_v46 = vpop.eup %11152  ;;  %v8326_v15 = vmul.f32 %v11151_v12, %v9580_v60 }
 0xac4   : > { %v8328_v49 = vmul.f32 %v11153_v46, %v9582_v20 }
 0xac5   : > { %v8333_v58 = vcombine.low %v8325_v11, %v8326_v15 }
 0xac6   : > { %v8334_v62 = vcombine.low %v8327_v51, %v8328_v49 }
 0xac7   : > { %8337 = vst [vmem:[%s460_s25] sm:$0xff] %v8333_v58 }
 0xac8   : > { %8338 = vst [vmem:[%s460_s25 + $0x8] sm:$0xff] %v8334_v62 }
 0xac9   : > { %11423 = shalt.err (!%p11420_p0)
}
 0xaca   : > { %s11424_s17 = scalar_lea.hbm %s12379_s28, 256  ;;  %s11428_s14 = scalar_lea.hbm %s12461_s18, 512 }
 0xacb   : > { %p11425_p2 = scmp.ne.s32.totalorder %s12379_s28, %s11424_s17  ;;  %p11429_p11 = scmp.lt.u32.totalorder %s12379_s28, %s12461_s18 }
 0xacc   : > { %p11430_p10 = scmp.lt.u32.totalorder %s11428_s14, %s11424_s17  ;;  %p11432_p5 = scmp.lt.u32.totalorder %s11424_s17, %s12379_s28 }
 0xacd   : > { %p11426_p9 = pnand %p11425_p2, %p12462_p7 }
 0xace   : > { %p11431_p12 = por %p11430_p10, %p11429_p11 }
 0xacf   : > { %p11427_p6 = pneg %p11426_p9 }
 0xad0   : > { %p11433_p4 = por %p11432_p5, %p11431_p12 }
 0xad2   : > { %p11434_p1 = pnand %p11433_p4, %p11427_p6 }
 0xad4   : > { %11437 = shalt.err (!%p11434_p1)
}
 0xad5   : > { %9668 = dma.vmem_to_hbm [thread:$0]  (%p12462_p7), %s12381_s13, 256, %s12379_s28, %s8340_s27  }
 0xad6 PF: > { %s8366_s3 = sand.u32 1, %s11480_s30   ;;  %p12463_p3 = scmp.ne.s32.totalorder %s12448_s20, 0 }
 0xad7   : > { %p12464_p8 = scmp.ge.s32.totalorder %s11492_s12, 2  ;;  %s8367_s21 = scalar_lea.sflag [#allocation8], %s8366_s3 }
 0xad9   : > { %p9700_p13 = pnand %p12464_p8, %p12463_p3 }
 0xadb   : > { %11475 = dma.done.wait (!%p9700_p13), %s8367_s21, 256  }
 0xadc   : > { %11477 = vsyncadd (!%p9700_p13), %s8367_s21, 4294967040  ;;  %p26_p0 = scmp.ge.s32.totalorder %s11779_s19, 4   ;;  %s12465_s30 = smov %s11484_s10 }
 0xadd   : > { %s12466_s10 = smov %s11488_s11  ;;  %s12467_s11 = smov %s11790_s1 }
 0xade   : > { %s12468_s12 = smov %s11779_s19  ;;  %28 = sbr.rel (!%p26_p0) target bundleno = 13 (0xd), region = 133 }
 0xae5   :  { %8372 = vsyncpa [#allocation7], 1 }
 0xae6   :  { %8374 = vsyncpa [#allocation7 + $0x1], 1 }
 0xae7   :  { %8375 = vsyncpa [#allocation10], 1 }
 0xae8   :  { %8376 = vsyncpa [#allocation13], 1 }
 0xae9   :  { %8377 = vsyncpa [#allocation16], 1 }
 0xaea   :  { %8378 = vsyncpa [#allocation19], 1 }
 0xaeb   :  { %8379 = vsyncpa [#allocation8], 1 }
 0xaec   :  { %8381 = vsyncpa [#allocation8 + $0x1], 1 }

</bundles_post_ra>
